<compile_context>
chip_gen: v7x
topology: tpu7x:2x2x1
jax: 0.10.0
libtpu: 0.0.40
codegen_flags: <defaults>
</compile_context>

<pallas_src>
import functools

import numpy as np
import jax
import jax.numpy as jnp
from jax import lax
from jax.experimental import pallas as pl
from jax.experimental.pallas import tpu as pltpu

LRELU_ALPHA = 0.2
LRELU_GAIN = float(np.sqrt(2.0))   # bias_act def_gain for 'lrelu'


# ---------------------------------------------------------------------------
# Polyphase folding of {stride-2 transposed 3x3 conv + [1,3,3,1] FIR, gain 4}
# ---------------------------------------------------------------------------
# Per-axis mixing matrix A[p, d, k]: output-pixel parity p in {0,1}, input tap
# offset (d-1) in {-1,0,1}, original 3-tap weight index k in {0,1,2}.
_F1 = np.array([1.0, 3.0, 3.0, 1.0], np.float64)
_F1 = _F1 / _F1.sum() * 2.0        # per-axis filter incl. per-axis upsample gain
_A = np.zeros((2, 3, 3), np.float32)
for _p in range(2):
    for _d in range(3):
        for _k in range(3):
            _a = 2 * (_d - 1) + _k + 1 - _p
            if 0 <= _a < 4:
                _A[_p, _d, _k] = _F1[_a]


def _polyphase_weights(weight, bias):
    """weight: (C_out, C_in, 3, 3) torch layout, bias: (C_out,).

    Returns
      w_poly : (18, C_in, 2*C_out)  tap index = (py*3+dy)*3+dx, col = px*C_out+co
      b_poly : (1, 2*C_out)
    """
    c_out, c_in, kh, kw = weight.shape
    gain = 1.0 / np.sqrt(c_in * kh * kw)                     # Conv2dLayer weight_gain
    a = jnp.asarray(_A)
    w = weight.astype(jnp.float32) * gain
    k = jnp.einsum('pdk,qel,oikl->pdeiqo', a, a, w)          # (2,3,3,C_in,2,C_out)
    w_poly = k.reshape(18, c_in, 2 * c_out)
    b_poly = jnp.tile(bias.astype(jnp.float32).reshape(1, c_out), (1, 2))
    return w_poly, b_poly


def _choose_row_tile(h, w, target_rows=256, max_rows=2048):
    """Row tile TH (divides h) so each tap matmul has TH*W rows of a few
    hundred (feeds the MXU) while keeping the output block VMEM bounded."""
    divisors = [d for d in range(1, h + 1) if h % d == 0]
    fitting = [d for d in divisors if d * w <= max_rows]
    if not fitting:
        return 1
    for d in fitting:
        if d * w >= target_rows:
            return d
    return fitting[-1]


# ---------------------------------------------------------------------------
# Fused Pallas kernel
# ---------------------------------------------------------------------------
def _make_kernel(H, W, Cin, Cout, TH):
    two_cout = 2 * Cout

    def kernel(x_ref, w_ref, b_ref, o_ref, xpad_ref):
        # x_ref   : (1, H, W, Cin)        full image, resident across row tiles
        # w_ref   : (18, Cin, 2*Cout)     folded polyphase kernels
        # b_ref   : (1, 2*Cout)
        # o_ref   : (TH, 2, W, 2*Cout)    row-tile of the (B*H, 2, W, 2*Cout) output
        # xpad_ref: VMEM scratch (H+2, W+2, Cin), zero-padded image
        t = pl.program_id(1)

        # Build the zero-padded image in VMEM once per batch element
        # (first row-tile). Avoids a host-side jnp.pad pass over HBM.
        @pl.when(t == 0)
        def _fill_halo():
            xpad_ref[...] = jnp.zeros_like(xpad_ref)
            xpad_ref[pl.ds(1, H), pl.ds(1, W), :] = x_ref[0]

        row0 = t * TH
        bias = b_ref[...]                                        # (1, 2*Cout)
        # three halo row-slabs reused by both output-row parities
        rows = [xpad_ref[pl.ds(row0 + dy, TH), :, :] for dy in range(3)]

        for py in range(2):                                      # output row parity
            acc = jnp.zeros((TH * W, two_cout), jnp.float32)
            for dy in range(3):
                for dx in range(3):
                    patch = rows[dy][:, dx:dx + W, :]            # (TH, W, Cin)
                    acc = acc + jnp.dot(
                        patch.reshape(TH * W, Cin),
                        w_ref[(py * 3 + dy) * 3 + dx],
                        preferred_element_type=jnp.float32)
            # epilogue once per tile: bias -> lrelu(0.2) -> *sqrt(2)
            y = acc + bias
            y = jnp.where(y >= 0.0, y, LRELU_ALPHA * y) * LRELU_GAIN
            o_ref[:, py, :, :] = y.reshape(TH, W, two_cout).astype(o_ref.dtype)

    return kernel


@functools.partial(jax.jit, static_argnums=(3,))
def _conv_up2_lrelu(x_tokens, weight, bias, x_size):
    h, w = x_size
    b, n, c_in = x_tokens.shape
    assert n == h * w, "token count must equal H*W"
    c_out = weight.shape[0]

    w_poly, b_poly = _polyphase_weights(weight, bias)
    x = x_tokens.astype(jnp.float32).reshape(b, h, w, c_in)     # tokens == flat NHWC

    th = _choose_row_tile(h, w)
    n_t = h // th

    out = pl.pallas_call(
        _make_kernel(h, w, c_in, c_out, th),
        out_shape=jax.ShapeDtypeStruct((b * h, 2, w, 2 * c_out), jnp.float32),
        grid=(b, n_t),
        in_specs=[
            pl.BlockSpec((1, h, w, c_in), lambda bi, ti: (bi, 0, 0, 0)),
            pl.BlockSpec((18, c_in, 2 * c_out), lambda bi, ti: (0, 0, 0)),
            pl.BlockSpec((1, 2 * c_out), lambda bi, ti: (0, 0)),
        ],
        out_specs=pl.BlockSpec((th, 2, w, 2 * c_out),
                               lambda bi, ti: (bi * n_t + ti, 0, 0, 0)),
        scratch_shapes=[pltpu.VMEM((h + 2, w + 2, c_in), jnp.float32)],
        compiler_params=pltpu.CompilerParams(
            dimension_semantics=("parallel", "arbitrary")),
    )(x, w_poly, b_poly)

    # (B*H, 2, W, 2*C_out) row-major is exactly token order ((2m+py)*2W+2n+px, co)
    return out.reshape(b, 4 * h * w, c_out)


# ---------------------------------------------------------------------------
# PatchUpsampling forward (token in / token out, like the PyTorch module)
# ---------------------------------------------------------------------------
def patch_upsampling_forward(x_tokens, x_size, params, mask=None, up=2):
    if up != 2:
        # TODO(synk): generalize the polyphase folding to arbitrary `up`
        # (PatchUpsampling only ever uses the default up=2 in MAT).
        raise NotImplementedError("Pallas PatchUpsampling kernel is specialized for up=2")
    if mask is not None:
        # TODO(synk): partial-conv mask path: the reference computes mask_ratio at
        # input resolution while the feature path is 2x-upsampled, so x*mask_ratio
        # is shape-inconsistent for up=2 even in PyTorch; it is only called with
        # mask=None, which is what this kernel implements.
        raise NotImplementedError("mask path not supported (see TODO)")
    h, w = int(x_size[0]), int(x_size[1])
    y = _conv_up2_lrelu(x_tokens, params["weight"], params["bias"], (h, w))
    return y, (h * up, w * up), None


def init_params(key, in_channels, out_channels):
    # Conv2dLayer init: weight ~ N(0,1) (scaled by weight_gain at forward time),
    # bias = zeros. Torch weight layout (C_out, C_in, kh, kw).
    return {
        "weight": jax.random.normal(key, (out_channels, in_channels, 3, 3), jnp.float32),
        "bias": jnp.zeros((out_channels,), jnp.float32),
    }


# ---------------------------------------------------------------------------
# Plain-JAX reference (direct port of Conv2dLayer(up=2) math) for self-check
# ---------------------------------------------------------------------------
def patch_upsampling_reference(x_tokens, x_size, params, up=2):
    weight, bias = params["weight"], params["bias"]
    h, w = x_size
    b, n, c_in = x_tokens.shape
    c_out = weight.shape[0]
    x = jnp.transpose(x_tokens, (0, 2, 1)).reshape(b, c_in, h, w)      # token2feature
    wg = weight.astype(jnp.float32) * (1.0 / np.sqrt(c_in * 9))
    # conv_transpose2d(x, w.transpose(0,1), stride=2) == dilated conv with flipped w
    y = lax.conv_general_dilated(
        x, jnp.flip(wg, (2, 3)), window_strides=(1, 1),
        padding=((2, 2), (2, 2)), lhs_dilation=(2, 2),
        dimension_numbers=('NCHW', 'OIHW', 'NCHW'),
        precision=lax.Precision.HIGHEST)
    # upfirdn2d: pad 1, depthwise 4x4 filter outer([1,3,3,1])/64, gain = up**2
    f1 = jnp.asarray([1.0, 3.0, 3.0, 1.0], jnp.float32)
    f2 = jnp.outer(f1, f1)
    f2 = f2 / f2.sum() * (up ** 2)
    fk = jnp.broadcast_to(f2, (c_out, 1, 4, 4))
    y = lax.conv_general_dilated(
        y, fk, window_strides=(1, 1), padding=((1, 1), (1, 1)),
        feature_group_count=c_out,
        dimension_numbers=('NCHW', 'OIHW', 'NCHW'),
        precision=lax.Precision.HIGHEST)
    y = y + bias.astype(jnp.float32).reshape(1, c_out, 1, 1)
    y = jnp.where(y >= 0.0, y, LRELU_ALPHA * y) * LRELU_GAIN
    return jnp.transpose(y, (0, 2, 3, 1)).reshape(b, 4 * h * w, c_out)  # feature2token


if __name__ == "__main__":
    B, C_IN, C_OUT = 2, 4, 32
    H, W = 16, 16

    key = jax.random.PRNGKey(0)
    k_w, k_b, k_x = jax.random.split(key, 3)

    params = init_params(k_w, C_IN, C_OUT)
    # non-zero bias so the bias+lrelu epilogue is actually exercised
    params["bias"] = 0.1 * jax.random.normal(k_b, (C_OUT,), jnp.float32)

    x_tokens = jax.random.normal(k_x, (B, H * W, C_IN), jnp.float32)

    y, new_size, new_mask = patch_upsampling_forward(x_tokens, (H, W), params)
    y = jax.block_until_ready(y)

    assert y.shape == (B, 4 * H * W, C_OUT) and y.dtype == jnp.float32
    assert new_size == (2 * H, 2 * W) and new_mask is None

    # numerical self-check against the plain-JAX port of the reference math
    y_ref = patch_upsampling_reference(x_tokens, (H, W), params)
    np.testing.assert_allclose(np.asarray(y), np.asarray(y_ref), rtol=5e-2, atol=5e-2)

    print("KERNEL_OK")
</pallas_src>

<mosaic_0001>
module attributes {stable_mosaic.version = 11 : i64} {
  func.func @kernel(%arg0: i32, %arg1: i32, %arg2: memref<1x16x16x4xf32, #tpu.memory_space<vmem>>, %arg3: memref<18x4x64xf32, #tpu.memory_space<vmem>>, %arg4: memref<1x64xf32, #tpu.memory_space<vmem>>, %arg5: memref<16x2x16x64xf32, #tpu.memory_space<vmem>>, %arg6: memref<18x18x4xf32, #tpu.memory_space<vmem>>) attributes {dimension_semantics = [#tpu.dimension_semantics<parallel>, #tpu.dimension_semantics<arbitrary>], iteration_bounds = array<i64: 2, 1>, scalar_prefetch = 0 : i64, scratch_operands = 1 : i64, tpu.core_type = #tpu.core_type<tc>, window_params = [{transform_indices = @transform_0, window_bounds = array<i64: 1, 16, 16, 4>}, {pipeline_mode = #tpu.pipeline_mode<synchronous>, transform_indices = @transform_1, window_bounds = array<i64: 18, 4, 64>}, {pipeline_mode = #tpu.pipeline_mode<synchronous>, transform_indices = @transform_2, window_bounds = array<i64: 1, 64>}, {transform_indices = @transform_3, window_bounds = array<i64: 16, 2, 16, 64>}]} {
    %c0_i32 = arith.constant 0 : i32
    %0 = arith.cmpi eq, %arg1, %c0_i32 : i32
    %1 = arith.extui %0 : i1 to i32
    %c0_i32_0 = arith.constant 0 : i32
    %2 = arith.cmpi ne, %1, %c0_i32_0 : i32
    scf.if %2 {
      %cst_79 = arith.constant 0.000000e+00 : f32
      %150 = vector.broadcast %cst_79 : f32 to vector<18x18x4xf32>
      %c0_80 = arith.constant 0 : index
      %c0_81 = arith.constant 0 : index
      %c0_82 = arith.constant 0 : index
      %151 = vector.load %arg6[%c0_80, %c0_81, %c0_82] : memref<18x18x4xf32, #tpu.memory_space<vmem>>, vector<18x18x4xf32>
      tpu.vector_store %arg6[%c0_80, %c0_81, %c0_82], %150 {strides = array<i32>} : memref<18x18x4xf32, #tpu.memory_space<vmem>>, vector<18x18x4xf32>,
      %c0_83 = arith.constant 0 : index
      %c0_84 = arith.constant 0 : index
      %c0_85 = arith.constant 0 : index
      %c0_86 = arith.constant 0 : index
      %152 = vector.load %arg2[%c0_83, %c0_84, %c0_85, %c0_86] : memref<1x16x16x4xf32, #tpu.memory_space<vmem>>, vector<1x16x16x4xf32>
      %153 = vector.shape_cast %152 : vector<1x16x16x4xf32> to vector<16x16x4xf32>
      %c1_87 = arith.constant 1 : index
      %c1_88 = arith.constant 1 : index
      %c0_89 = arith.constant 0 : index
      %154 = vector.load %arg6[%c1_87, %c1_88, %c0_89] : memref<18x18x4xf32, #tpu.memory_space<vmem>>, vector<16x16x4xf32>
      tpu.vector_store %arg6[%c1_87, %c1_88, %c0_89], %153 {strides = array<i32>} : memref<18x18x4xf32, #tpu.memory_space<vmem>>, vector<16x16x4xf32>,
    } else {
    }
    %c16_i32 = arith.constant 16 : i32
    %3 = arith.muli %arg1, %c16_i32 : i32
    %c0 = arith.constant 0 : index
    %c0_1 = arith.constant 0 : index
    %4 = vector.load %arg4[%c0, %c0_1] : memref<1x64xf32, #tpu.memory_space<vmem>>, vector<1x64xf32>
    %c0_i32_2 = arith.constant 0 : i32
    %5 = arith.addi %3, %c0_i32_2 : i32
    %6 = arith.index_cast %5 : i32 to index
    %c0_3 = arith.constant 0 : index
    %c0_4 = arith.constant 0 : index
    %7 = vector.load %arg6[%6, %c0_3, %c0_4] : memref<18x18x4xf32, #tpu.memory_space<vmem>>, vector<16x18x4xf32>
    %c1_i32 = arith.constant 1 : i32
    %8 = arith.addi %3, %c1_i32 : i32
    %9 = arith.index_cast %8 : i32 to index
    %c0_5 = arith.constant 0 : index
    %c0_6 = arith.constant 0 : index
    %10 = vector.load %arg6[%9, %c0_5, %c0_6] : memref<18x18x4xf32, #tpu.memory_space<vmem>>, vector<16x18x4xf32>
    %c2_i32 = arith.constant 2 : i32
    %11 = arith.addi %3, %c2_i32 : i32
    %12 = arith.index_cast %11 : i32 to index
    %c0_7 = arith.constant 0 : index
    %c0_8 = arith.constant 0 : index
    %13 = vector.load %arg6[%12, %c0_7, %c0_8] : memref<18x18x4xf32, #tpu.memory_space<vmem>>, vector<16x18x4xf32>
    %cst = arith.constant 0.000000e+00 : f32
    %14 = vector.broadcast %cst : f32 to vector<256x64xf32>
    %15 = vector.extract_strided_slice %7 {offsets = [0, 0, 0], sizes = [16, 16, 4], strides = [1, 1, 1]} : vector<16x18x4xf32> to vector<16x16x4xf32>
    %16 = vector.shape_cast %15 : vector<16x16x4xf32> to vector<256x4xf32>
    %c0_9 = arith.constant 0 : index
    %c0_10 = arith.constant 0 : index
    %c0_11 = arith.constant 0 : index
    %17 = vector.load %arg3[%c0_9, %c0_10, %c0_11] : memref<18x4x64xf32, #tpu.memory_space<vmem>>, vector<1x4x64xf32>
    %18 = vector.shape_cast %17 : vector<1x4x64xf32> to vector<4x64xf32>
    %cst_12 = arith.constant dense<0.000000e+00> : vector<256x64xf32>
    %19 = tpu.matmul %16, %18, %cst_12 {dimension_numbers = #tpu.dot_dimension_numbers<[1], [0], [0], [1], [0, 0, 1, 1], [], []>} : vector<256x4xf32>, vector<4x64xf32>, vector<256x64xf32> -> vector<256x64xf32>
    %20 = arith.addf %14, %19 : vector<256x64xf32>
    %21 = vector.extract_strided_slice %7 {offsets = [0, 1, 0], sizes = [16, 16, 4], strides = [1, 1, 1]} : vector<16x18x4xf32> to vector<16x16x4xf32>
    %22 = vector.shape_cast %21 : vector<16x16x4xf32> to vector<256x4xf32>
    %c1 = arith.constant 1 : index
    %c0_13 = arith.constant 0 : index
    %c0_14 = arith.constant 0 : index
    %23 = vector.load %arg3[%c1, %c0_13, %c0_14] : memref<18x4x64xf32, #tpu.memory_space<vmem>>, vector<1x4x64xf32>
    %24 = vector.shape_cast %23 : vector<1x4x64xf32> to vector<4x64xf32>
    %cst_15 = arith.constant dense<0.000000e+00> : vector<256x64xf32>
    %25 = tpu.matmul %22, %24, %cst_15 {dimension_numbers = #tpu.dot_dimension_numbers<[1], [0], [0], [1], [0, 0, 1, 1], [], []>} : vector<256x4xf32>, vector<4x64xf32>, vector<256x64xf32> -> vector<256x64xf32>
    %26 = arith.addf %20, %25 : vector<256x64xf32>
    %27 = vector.extract_strided_slice %7 {offsets = [0, 2, 0], sizes = [16, 16, 4], strides = [1, 1, 1]} : vector<16x18x4xf32> to vector<16x16x4xf32>
    %28 = vector.shape_cast %27 : vector<16x16x4xf32> to vector<256x4xf32>
    %c2 = arith.constant 2 : index
    %c0_16 = arith.constant 0 : index
    %c0_17 = arith.constant 0 : index
    %29 = vector.load %arg3[%c2, %c0_16, %c0_17] : memref<18x4x64xf32, #tpu.memory_space<vmem>>, vector<1x4x64xf32>
    %30 = vector.shape_cast %29 : vector<1x4x64xf32> to vector<4x64xf32>
    %cst_18 = arith.constant dense<0.000000e+00> : vector<256x64xf32>
    %31 = tpu.matmul %28, %30, %cst_18 {dimension_numbers = #tpu.dot_dimension_numbers<[1], [0], [0], [1], [0, 0, 1, 1], [], []>} : vector<256x4xf32>, vector<4x64xf32>, vector<256x64xf32> -> vector<256x64xf32>
    %32 = arith.addf %26, %31 : vector<256x64xf32>
    %33 = vector.extract_strided_slice %10 {offsets = [0, 0, 0], sizes = [16, 16, 4], strides = [1, 1, 1]} : vector<16x18x4xf32> to vector<16x16x4xf32>
    %34 = vector.shape_cast %33 : vector<16x16x4xf32> to vector<256x4xf32>
    %c3 = arith.constant 3 : index
    %c0_19 = arith.constant 0 : index
    %c0_20 = arith.constant 0 : index
    %35 = vector.load %arg3[%c3, %c0_19, %c0_20] : memref<18x4x64xf32, #tpu.memory_space<vmem>>, vector<1x4x64xf32>
    %36 = vector.shape_cast %35 : vector<1x4x64xf32> to vector<4x64xf32>
    %cst_21 = arith.constant dense<0.000000e+00> : vector<256x64xf32>
    %37 = tpu.matmul %34, %36, %cst_21 {dimension_numbers = #tpu.dot_dimension_numbers<[1], [0], [0], [1], [0, 0, 1, 1], [], []>} : vector<256x4xf32>, vector<4x64xf32>, vector<256x64xf32> -> vector<256x64xf32>
    %38 = arith.addf %32, %37 : vector<256x64xf32>
    %39 = vector.extract_strided_slice %10 {offsets = [0, 1, 0], sizes = [16, 16, 4], strides = [1, 1, 1]} : vector<16x18x4xf32> to vector<16x16x4xf32>
    %40 = vector.shape_cast %39 : vector<16x16x4xf32> to vector<256x4xf32>
    %c4 = arith.constant 4 : index
    %c0_22 = arith.constant 0 : index
    %c0_23 = arith.constant 0 : index
    %41 = vector.load %arg3[%c4, %c0_22, %c0_23] : memref<18x4x64xf32, #tpu.memory_space<vmem>>, vector<1x4x64xf32>
    %42 = vector.shape_cast %41 : vector<1x4x64xf32> to vector<4x64xf32>
    %cst_24 = arith.constant dense<0.000000e+00> : vector<256x64xf32>
    %43 = tpu.matmul %40, %42, %cst_24 {dimension_numbers = #tpu.dot_dimension_numbers<[1], [0], [0], [1], [0, 0, 1, 1], [], []>} : vector<256x4xf32>, vector<4x64xf32>, vector<256x64xf32> -> vector<256x64xf32>
    %44 = arith.addf %38, %43 : vector<256x64xf32>
    %45 = vector.extract_strided_slice %10 {offsets = [0, 2, 0], sizes = [16, 16, 4], strides = [1, 1, 1]} : vector<16x18x4xf32> to vector<16x16x4xf32>
    %46 = vector.shape_cast %45 : vector<16x16x4xf32> to vector<256x4xf32>
    %c5 = arith.constant 5 : index
    %c0_25 = arith.constant 0 : index
    %c0_26 = arith.constant 0 : index
    %47 = vector.load %arg3[%c5, %c0_25, %c0_26] : memref<18x4x64xf32, #tpu.memory_space<vmem>>, vector<1x4x64xf32>
    %48 = vector.shape_cast %47 : vector<1x4x64xf32> to vector<4x64xf32>
    %cst_27 = arith.constant dense<0.000000e+00> : vector<256x64xf32>
    %49 = tpu.matmul %46, %48, %cst_27 {dimension_numbers = #tpu.dot_dimension_numbers<[1], [0], [0], [1], [0, 0, 1, 1], [], []>} : vector<256x4xf32>, vector<4x64xf32>, vector<256x64xf32> -> vector<256x64xf32>
    %50 = arith.addf %44, %49 : vector<256x64xf32>
    %51 = vector.extract_strided_slice %13 {offsets = [0, 0, 0], sizes = [16, 16, 4], strides = [1, 1, 1]} : vector<16x18x4xf32> to vector<16x16x4xf32>
    %52 = vector.shape_cast %51 : vector<16x16x4xf32> to vector<256x4xf32>
    %c6 = arith.constant 6 : index
    %c0_28 = arith.constant 0 : index
    %c0_29 = arith.constant 0 : index
    %53 = vector.load %arg3[%c6, %c0_28, %c0_29] : memref<18x4x64xf32, #tpu.memory_space<vmem>>, vector<1x4x64xf32>
    %54 = vector.shape_cast %53 : vector<1x4x64xf32> to vector<4x64xf32>
    %cst_30 = arith.constant dense<0.000000e+00> : vector<256x64xf32>
    %55 = tpu.matmul %52, %54, %cst_30 {dimension_numbers = #tpu.dot_dimension_numbers<[1], [0], [0], [1], [0, 0, 1, 1], [], []>} : vector<256x4xf32>, vector<4x64xf32>, vector<256x64xf32> -> vector<256x64xf32>
    %56 = arith.addf %50, %55 : vector<256x64xf32>
    %57 = vector.extract_strided_slice %13 {offsets = [0, 1, 0], sizes = [16, 16, 4], strides = [1, 1, 1]} : vector<16x18x4xf32> to vector<16x16x4xf32>
    %58 = vector.shape_cast %57 : vector<16x16x4xf32> to vector<256x4xf32>
    %c7 = arith.constant 7 : index
    %c0_31 = arith.constant 0 : index
    %c0_32 = arith.constant 0 : index
    %59 = vector.load %arg3[%c7, %c0_31, %c0_32] : memref<18x4x64xf32, #tpu.memory_space<vmem>>, vector<1x4x64xf32>
    %60 = vector.shape_cast %59 : vector<1x4x64xf32> to vector<4x64xf32>
    %cst_33 = arith.constant dense<0.000000e+00> : vector<256x64xf32>
    %61 = tpu.matmul %58, %60, %cst_33 {dimension_numbers = #tpu.dot_dimension_numbers<[1], [0], [0], [1], [0, 0, 1, 1], [], []>} : vector<256x4xf32>, vector<4x64xf32>, vector<256x64xf32> -> vector<256x64xf32>
    %62 = arith.addf %56, %61 : vector<256x64xf32>
    %63 = vector.extract_strided_slice %13 {offsets = [0, 2, 0], sizes = [16, 16, 4], strides = [1, 1, 1]} : vector<16x18x4xf32> to vector<16x16x4xf32>
    %64 = vector.shape_cast %63 : vector<16x16x4xf32> to vector<256x4xf32>
    %c8 = arith.constant 8 : index
    %c0_34 = arith.constant 0 : index
    %c0_35 = arith.constant 0 : index
    %65 = vector.load %arg3[%c8, %c0_34, %c0_35] : memref<18x4x64xf32, #tpu.memory_space<vmem>>, vector<1x4x64xf32>
    %66 = vector.shape_cast %65 : vector<1x4x64xf32> to vector<4x64xf32>
    %cst_36 = arith.constant dense<0.000000e+00> : vector<256x64xf32>
    %67 = tpu.matmul %64, %66, %cst_36 {dimension_numbers = #tpu.dot_dimension_numbers<[1], [0], [0], [1], [0, 0, 1, 1], [], []>} : vector<256x4xf32>, vector<4x64xf32>, vector<256x64xf32> -> vector<256x64xf32>
    %68 = arith.addf %62, %67 : vector<256x64xf32>
    %69 = vector.broadcast %4 : vector<1x64xf32> to vector<256x64xf32>
    %70 = arith.addf %68, %69 : vector<256x64xf32>
    %cst_37 = arith.constant 0.000000e+00 : f32
    %71 = vector.broadcast %cst_37 : f32 to vector<256x64xf32>
    %72 = arith.cmpf oge, %70, %71 : vector<256x64xf32>
    %cst_38 = arith.constant 2.000000e-01 : f32
    %73 = vector.broadcast %cst_38 : f32 to vector<256x64xf32>
    %74 = arith.mulf %73, %70 : vector<256x64xf32>
    %75 = arith.select %72, %70, %74 : vector<256x64xi1>, vector<256x64xf32>
    %cst_39 = arith.constant 1.41421354 : f32
    %76 = vector.broadcast %cst_39 : f32 to vector<256x64xf32>
    %77 = arith.mulf %75, %76 : vector<256x64xf32>
    %78 = vector.shape_cast %77 : vector<256x64xf32> to vector<16x16x64xf32>
    %c0_40 = arith.constant 0 : index
    %c0_41 = arith.constant 0 : index
    %c0_42 = arith.constant 0 : index
    %c0_43 = arith.constant 0 : index
    %79 = vector.load %arg5[%c0_40, %c0_41, %c0_42, %c0_43] : memref<16x2x16x64xf32, #tpu.memory_space<vmem>>, vector<16x1x16x64xf32>
    %80 = vector.shape_cast %79 : vector<16x1x16x64xf32> to vector<16x16x64xf32>
    %81 = vector.shape_cast %78 : vector<16x16x64xf32> to vector<16x1x16x64xf32>
    tpu.vector_store %arg5[%c0_40, %c0_41, %c0_42, %c0_43], %81 {strides = array<i32>} : memref<16x2x16x64xf32, #tpu.memory_space<vmem>>, vector<16x1x16x64xf32>,
    %cst_44 = arith.constant 0.000000e+00 : f32
    %82 = vector.broadcast %cst_44 : f32 to vector<256x64xf32>
    %83 = vector.extract_strided_slice %7 {offsets = [0, 0, 0], sizes = [16, 16, 4], strides = [1, 1, 1]} : vector<16x18x4xf32> to vector<16x16x4xf32>
    %84 = vector.shape_cast %83 : vector<16x16x4xf32> to vector<256x4xf32>
    %c9 = arith.constant 9 : index
    %c0_45 = arith.constant 0 : index
    %c0_46 = arith.constant 0 : index
    %85 = vector.load %arg3[%c9, %c0_45, %c0_46] : memref<18x4x64xf32, #tpu.memory_space<vmem>>, vector<1x4x64xf32>
    %86 = vector.shape_cast %85 : vector<1x4x64xf32> to vector<4x64xf32>
    %cst_47 = arith.constant dense<0.000000e+00> : vector<256x64xf32>
    %87 = tpu.matmul %84, %86, %cst_47 {dimension_numbers = #tpu.dot_dimension_numbers<[1], [0], [0], [1], [0, 0, 1, 1], [], []>} : vector<256x4xf32>, vector<4x64xf32>, vector<256x64xf32> -> vector<256x64xf32>
    %88 = arith.addf %82, %87 : vector<256x64xf32>
    %89 = vector.extract_strided_slice %7 {offsets = [0, 1, 0], sizes = [16, 16, 4], strides = [1, 1, 1]} : vector<16x18x4xf32> to vector<16x16x4xf32>
    %90 = vector.shape_cast %89 : vector<16x16x4xf32> to vector<256x4xf32>
    %c10 = arith.constant 10 : index
    %c0_48 = arith.constant 0 : index
    %c0_49 = arith.constant 0 : index
    %91 = vector.load %arg3[%c10, %c0_48, %c0_49] : memref<18x4x64xf32, #tpu.memory_space<vmem>>, vector<1x4x64xf32>
    %92 = vector.shape_cast %91 : vector<1x4x64xf32> to vector<4x64xf32>
    %cst_50 = arith.constant dense<0.000000e+00> : vector<256x64xf32>
    %93 = tpu.matmul %90, %92, %cst_50 {dimension_numbers = #tpu.dot_dimension_numbers<[1], [0], [0], [1], [0, 0, 1, 1], [], []>} : vector<256x4xf32>, vector<4x64xf32>, vector<256x64xf32> -> vector<256x64xf32>
    %94 = arith.addf %88, %93 : vector<256x64xf32>
    %95 = vector.extract_strided_slice %7 {offsets = [0, 2, 0], sizes = [16, 16, 4], strides = [1, 1, 1]} : vector<16x18x4xf32> to vector<16x16x4xf32>
    %96 = vector.shape_cast %95 : vector<16x16x4xf32> to vector<256x4xf32>
    %c11 = arith.constant 11 : index
    %c0_51 = arith.constant 0 : index
    %c0_52 = arith.constant 0 : index
    %97 = vector.load %arg3[%c11, %c0_51, %c0_52] : memref<18x4x64xf32, #tpu.memory_space<vmem>>, vector<1x4x64xf32>
    %98 = vector.shape_cast %97 : vector<1x4x64xf32> to vector<4x64xf32>
    %cst_53 = arith.constant dense<0.000000e+00> : vector<256x64xf32>
    %99 = tpu.matmul %96, %98, %cst_53 {dimension_numbers = #tpu.dot_dimension_numbers<[1], [0], [0], [1], [0, 0, 1, 1], [], []>} : vector<256x4xf32>, vector<4x64xf32>, vector<256x64xf32> -> vector<256x64xf32>
    %100 = arith.addf %94, %99 : vector<256x64xf32>
    %101 = vector.extract_strided_slice %10 {offsets = [0, 0, 0], sizes = [16, 16, 4], strides = [1, 1, 1]} : vector<16x18x4xf32> to vector<16x16x4xf32>
    %102 = vector.shape_cast %101 : vector<16x16x4xf32> to vector<256x4xf32>
    %c12 = arith.constant 12 : index
    %c0_54 = arith.constant 0 : index
    %c0_55 = arith.constant 0 : index
    %103 = vector.load %arg3[%c12, %c0_54, %c0_55] : memref<18x4x64xf32, #tpu.memory_space<vmem>>, vector<1x4x64xf32>
    %104 = vector.shape_cast %103 : vector<1x4x64xf32> to vector<4x64xf32>
    %cst_56 = arith.constant dense<0.000000e+00> : vector<256x64xf32>
    %105 = tpu.matmul %102, %104, %cst_56 {dimension_numbers = #tpu.dot_dimension_numbers<[1], [0], [0], [1], [0, 0, 1, 1], [], []>} : vector<256x4xf32>, vector<4x64xf32>, vector<256x64xf32> -> vector<256x64xf32>
    %106 = arith.addf %100, %105 : vector<256x64xf32>
    %107 = vector.extract_strided_slice %10 {offsets = [0, 1, 0], sizes = [16, 16, 4], strides = [1, 1, 1]} : vector<16x18x4xf32> to vector<16x16x4xf32>
    %108 = vector.shape_cast %107 : vector<16x16x4xf32> to vector<256x4xf32>
    %c13 = arith.constant 13 : index
    %c0_57 = arith.constant 0 : index
    %c0_58 = arith.constant 0 : index
    %109 = vector.load %arg3[%c13, %c0_57, %c0_58] : memref<18x4x64xf32, #tpu.memory_space<vmem>>, vector<1x4x64xf32>
    %110 = vector.shape_cast %109 : vector<1x4x64xf32> to vector<4x64xf32>
    %cst_59 = arith.constant dense<0.000000e+00> : vector<256x64xf32>
    %111 = tpu.matmul %108, %110, %cst_59 {dimension_numbers = #tpu.dot_dimension_numbers<[1], [0], [0], [1], [0, 0, 1, 1], [], []>} : vector<256x4xf32>, vector<4x64xf32>, vector<256x64xf32> -> vector<256x64xf32>
    %112 = arith.addf %106, %111 : vector<256x64xf32>
    %113 = vector.extract_strided_slice %10 {offsets = [0, 2, 0], sizes = [16, 16, 4], strides = [1, 1, 1]} : vector<16x18x4xf32> to vector<16x16x4xf32>
    %114 = vector.shape_cast %113 : vector<16x16x4xf32> to vector<256x4xf32>
    %c14 = arith.constant 14 : index
    %c0_60 = arith.constant 0 : index
    %c0_61 = arith.constant 0 : index
    %115 = vector.load %arg3[%c14, %c0_60, %c0_61] : memref<18x4x64xf32, #tpu.memory_space<vmem>>, vector<1x4x64xf32>
    %116 = vector.shape_cast %115 : vector<1x4x64xf32> to vector<4x64xf32>
    %cst_62 = arith.constant dense<0.000000e+00> : vector<256x64xf32>
    %117 = tpu.matmul %114, %116, %cst_62 {dimension_numbers = #tpu.dot_dimension_numbers<[1], [0], [0], [1], [0, 0, 1, 1], [], []>} : vector<256x4xf32>, vector<4x64xf32>, vector<256x64xf32> -> vector<256x64xf32>
    %118 = arith.addf %112, %117 : vector<256x64xf32>
    %119 = vector.extract_strided_slice %13 {offsets = [0, 0, 0], sizes = [16, 16, 4], strides = [1, 1, 1]} : vector<16x18x4xf32> to vector<16x16x4xf32>
    %120 = vector.shape_cast %119 : vector<16x16x4xf32> to vector<256x4xf32>
    %c15 = arith.constant 15 : index
    %c0_63 = arith.constant 0 : index
    %c0_64 = arith.constant 0 : index
    %121 = vector.load %arg3[%c15, %c0_63, %c0_64] : memref<18x4x64xf32, #tpu.memory_space<vmem>>, vector<1x4x64xf32>
    %122 = vector.shape_cast %121 : vector<1x4x64xf32> to vector<4x64xf32>
    %cst_65 = arith.constant dense<0.000000e+00> : vector<256x64xf32>
    %123 = tpu.matmul %120, %122, %cst_65 {dimension_numbers = #tpu.dot_dimension_numbers<[1], [0], [0], [1], [0, 0, 1, 1], [], []>} : vector<256x4xf32>, vector<4x64xf32>, vector<256x64xf32> -> vector<256x64xf32>
    %124 = arith.addf %118, %123 : vector<256x64xf32>
    %125 = vector.extract_strided_slice %13 {offsets = [0, 1, 0], sizes = [16, 16, 4], strides = [1, 1, 1]} : vector<16x18x4xf32> to vector<16x16x4xf32>
    %126 = vector.shape_cast %125 : vector<16x16x4xf32> to vector<256x4xf32>
    %c16 = arith.constant 16 : index
    %c0_66 = arith.constant 0 : index
    %c0_67 = arith.constant 0 : index
    %127 = vector.load %arg3[%c16, %c0_66, %c0_67] : memref<18x4x64xf32, #tpu.memory_space<vmem>>, vector<1x4x64xf32>
    %128 = vector.shape_cast %127 : vector<1x4x64xf32> to vector<4x64xf32>
    %cst_68 = arith.constant dense<0.000000e+00> : vector<256x64xf32>
    %129 = tpu.matmul %126, %128, %cst_68 {dimension_numbers = #tpu.dot_dimension_numbers<[1], [0], [0], [1], [0, 0, 1, 1], [], []>} : vector<256x4xf32>, vector<4x64xf32>, vector<256x64xf32> -> vector<256x64xf32>
    %130 = arith.addf %124, %129 : vector<256x64xf32>
    %131 = vector.extract_strided_slice %13 {offsets = [0, 2, 0], sizes = [16, 16, 4], strides = [1, 1, 1]} : vector<16x18x4xf32> to vector<16x16x4xf32>
    %132 = vector.shape_cast %131 : vector<16x16x4xf32> to vector<256x4xf32>
    %c17 = arith.constant 17 : index
    %c0_69 = arith.constant 0 : index
    %c0_70 = arith.constant 0 : index
    %133 = vector.load %arg3[%c17, %c0_69, %c0_70] : memref<18x4x64xf32, #tpu.memory_space<vmem>>, vector<1x4x64xf32>
    %134 = vector.shape_cast %133 : vector<1x4x64xf32> to vector<4x64xf32>
    %cst_71 = arith.constant dense<0.000000e+00> : vector<256x64xf32>
    %135 = tpu.matmul %132, %134, %cst_71 {dimension_numbers = #tpu.dot_dimension_numbers<[1], [0], [0], [1], [0, 0, 1, 1], [], []>} : vector<256x4xf32>, vector<4x64xf32>, vector<256x64xf32> -> vector<256x64xf32>
    %136 = arith.addf %130, %135 : vector<256x64xf32>
    %137 = vector.broadcast %4 : vector<1x64xf32> to vector<256x64xf32>
    %138 = arith.addf %136, %137 : vector<256x64xf32>
    %cst_72 = arith.constant 0.000000e+00 : f32
    %139 = vector.broadcast %cst_72 : f32 to vector<256x64xf32>
    %140 = arith.cmpf oge, %138, %139 : vector<256x64xf32>
    %cst_73 = arith.constant 2.000000e-01 : f32
    %141 = vector.broadcast %cst_73 : f32 to vector<256x64xf32>
    %142 = arith.mulf %141, %138 : vector<256x64xf32>
    %143 = arith.select %140, %138, %142 : vector<256x64xi1>, vector<256x64xf32>
    %cst_74 = arith.constant 1.41421354 : f32
    %144 = vector.broadcast %cst_74 : f32 to vector<256x64xf32>
    %145 = arith.mulf %143, %144 : vector<256x64xf32>
    %146 = vector.shape_cast %145 : vector<256x64xf32> to vector<16x16x64xf32>
    %c0_75 = arith.constant 0 : index
    %c1_76 = arith.constant 1 : index
    %c0_77 = arith.constant 0 : index
    %c0_78 = arith.constant 0 : index
    %147 = vector.load %arg5[%c0_75, %c1_76, %c0_77, %c0_78] : memref<16x2x16x64xf32, #tpu.memory_space<vmem>>, vector<16x1x16x64xf32>
    %148 = vector.shape_cast %147 : vector<16x1x16x64xf32> to vector<16x16x64xf32>
    %149 = vector.shape_cast %146 : vector<16x16x64xf32> to vector<16x1x16x64xf32>
    tpu.vector_store %arg5[%c0_75, %c1_76, %c0_77, %c0_78], %149 {strides = array<i32>} : memref<16x2x16x64xf32, #tpu.memory_space<vmem>>, vector<16x1x16x64xf32>,
    return
  }
  func.func @transform_0(%arg0: i32, %arg1: i32) -> (i32, i32, i32, i32) {
    %c0_i32 = arith.constant 0 : i32
    %c0_i32_0 = arith.constant 0 : i32
    %c0_i32_1 = arith.constant 0 : i32
    %c0_i32_2 = arith.constant 0 : i32
    return %arg0, %c0_i32, %c0_i32_0, %c0_i32_1 : i32, i32, i32, i32
  }
  func.func @transform_1(%arg0: i32, %arg1: i32) -> (i32, i32, i32) {
    %c0_i32 = arith.constant 0 : i32
    %c0_i32_0 = arith.constant 0 : i32
    %c0_i32_1 = arith.constant 0 : i32
    %c0_i32_2 = arith.constant 0 : i32
    return %c0_i32, %c0_i32_0, %c0_i32_1 : i32, i32, i32
  }
  func.func @transform_2(%arg0: i32, %arg1: i32) -> (i32, i32) {
    %c0_i32 = arith.constant 0 : i32
    %c0_i32_0 = arith.constant 0 : i32
    %c0_i32_1 = arith.constant 0 : i32
    return %c0_i32, %c0_i32_0 : i32, i32
  }
  func.func @transform_3(%arg0: i32, %arg1: i32) -> (i32, i32, i32, i32) {
    %c1_i32 = arith.constant 1 : i32
    %0 = arith.muli %arg0, %c1_i32 : i32
    %1 = arith.addi %0, %arg1 : i32
    %c0_i32 = arith.constant 0 : i32
    %c0_i32_0 = arith.constant 0 : i32
    %c0_i32_1 = arith.constant 0 : i32
    %c0_i32_2 = arith.constant 0 : i32
    return %1, %c0_i32, %c0_i32_0, %c0_i32_1 : i32, i32, i32, i32
  }
}

</mosaic_0001>

<bundles_post_ra>
// kernel: _conv_up2_lrelu.1
= control target key start
LH: loop header
LB: loop body
LE: loop exit
PB: predicated region body
PF: predicated region fallthrough
CT: control target
= control target key end

     0   :  { %s9563_s12 = smov 0   ;;  %s9565_s13 = smov 0   ;;  %s11868_s0 = inlined_call_operand.vmem [shape: f32[2,16,16,4], index: 0, kind: input, shape index: {}]   ;;  %s11869_s1 = inlined_call_operand.vmem [shape: f32[18,4,64], index: 1, kind: input, shape index: {}]   ;;  %s11870_s2 = inlined_call_operand.vmem [shape: f32[1,64], index: 2, kind: input, shape index: {}]   ;;  %s11871_s3 = inlined_call_operand.vmem [shape: f32[32,2,16,64], index: 3, kind: output, shape index: {}]  }
   0x1   :  { %s9567_s14 = smov 0  }
   0x2 LB: > { %s25_s15 = sadd.s32 1, %s9536_s13  ;;  %p6737_p0 = scmp.ge.s32.totalorder %s9540_s14, 1  ;;  %s9540_s14 = sphi %s9567_s14, %s13_s14   ;;  %s9536_s13 = sphi %s9565_s13, %s11990_s13   ;;  %s9532_s12 = sphi %s9563_s12, %s11989_s12  }
   0x3   : > { %p27_p1 = scmp.ge.s32.totalorder %s25_s15, 2  ;;  %p151_p2 = scmp.lt.s32.totalorder %s9540_s14, 3 }
   0x5   : > { %s11992_s15 = smov (%p27_p1, %s25_s15), 0  ;;  %p152_p3 = pnand %p6737_p0, %p151_p2 }
   0x7   : > { %155 = sbr.rel (%p152_p3) target bundleno = 862 (0x35e), region = 32 }
   0xe   : > { %v6839_v0 = vld [vmem:[%s11869_s1 + $0x4] sm:$0xf]  ;;  %vm667_vm0 = vcmask 1043456   ;;  %v7146_v1 = vld [vmem:[%s11869_s1 + $0x28] sm:$0xf]  ;;  %vm195_vm1 = vcmask 31744  }
   0xf   : > { %8081 = vmatprep.subr.msk.mxu0 %vm667_vm0, %v6839_v0  ;;  %8531 = vmatprep.subr.msk.mxu1 %vm667_vm0, %v7146_v1  ;;  %v9594_v2 = vld [vmem:[%s11869_s1] sm:$0xf]  ;;  %v9599_v3 = vld [vmem:[%s11869_s1 + $0x24] sm:$0xf]  ;;  %v9542_v4 = vmov 0.0   ;;  %vm198_vm2 = vcmask 25600  }
  0x10   : > { %8082 = vmatpush3.msk.msra.mxu0 %vm667_vm0, %v6839_v0  ;;  %8532 = vmatpush3.msk.msra.mxu1 %vm667_vm0, %v7146_v1  ;;  %196 = vst.msk [vmem:[#allocation2] sm:$0xff] %vm195_vm1, %v9542_v4  ;;  %197 = vst.msk [vmem:[#allocation2 + $0x8] sm:$0xff] %vm195_vm1, %v9542_v4  ;;  %p177_p4 = scmp.lt.s32.totalorder %s9532_s12, 1  ;;  %vm519_vm3 = vcmask 1046528   ;;  %v9697_v20 = vld [vmem:[%s11869_s1 + $0x8] sm:$0xf] }
  0x11   : > { %200 = vst.msk [vmem:[#allocation2 + $0x18] sm:$0xff] %vm195_vm1, %v9542_v4  ;;  %201 = vst.msk [vmem:[#allocation2 + $0x20] sm:$0xff] %vm195_vm1, %v9542_v4  ;;  %8131 = vmatprep.subr.msk.mxu0 %vm667_vm0, %v9594_v2  ;;  %8581 = vmatprep.subr.msk.mxu1 %vm667_vm0, %v9599_v3  ;;  %v9702_v21 = vld [vmem:[%s11869_s1 + $0x2c] sm:$0xf]  ;;  %vm1188_vm4 = vcmask 1045504   ;;  %s6740_s7 = sshll.u32 %s9532_s12, 4 }
  0x12   : > { %203 = vst.msk [vmem:[#allocation2 + $0x30] sm:$0xff] %vm195_vm1, %v9542_v4  ;;  %204 = vst.msk [vmem:[#allocation2 + $0x38] sm:$0xff] %vm195_vm1, %v9542_v4  ;;  %s178_s24 = scalar_select %p177_p4, %s9532_s12, 1  ;;  %vm4133_vm9 = vcmask 523264  }
  0x13   : > { %206 = vst.msk [vmem:[#allocation2 + $0x48] sm:$0xff] %vm195_vm1, %v9542_v4  ;;  %207 = vst.msk [vmem:[#allocation2 + $0x50] sm:$0xff] %vm195_vm1, %v9542_v4  ;;  %p184_p5 = scmp.lt.s32.totalorder %s6740_s7, 31 }
  0x14   : > { %209 = vst.msk [vmem:[#allocation2 + $0x60] sm:$0xff] %vm195_vm1, %v9542_v4  ;;  %210 = vst.msk [vmem:[#allocation2 + $0x68] sm:$0xff] %vm195_vm1, %v9542_v4  ;;  %s7485_s25 = sshll.u32 %s178_s24, 8 }
  0x15   : > { %212 = vst.msk [vmem:[#allocation2 + $0x78] sm:$0xff] %vm195_vm1, %v9542_v4  ;;  %213 = vst.msk [vmem:[#allocation2 + $0x80] sm:$0xff] %vm195_vm1, %v9542_v4  ;;  %s9668_s28 = scalar_lea.vmem %s11868_s0, %s7485_s25  ;;  %s11994_s7 = smov (!%p184_p5, %s6740_s7), 31 }
  0x16   : > { %215 = vst.msk [vmem:[#allocation2 + $0x90] sm:$0xff] %vm195_vm1, %v9542_v4  ;;  %216 = vst.msk [vmem:[#allocation2 + $0x98] sm:$0xff] %vm195_vm1, %v9542_v4  ;;  %v251_v5 = vld [vmem:[%s9668_s28] sm:$0xff]  ;;  %v252_v6 = vld [vmem:[%s9668_s28 + $0x8] sm:$0xff]  ;;  %s7486_s10 = sshll.u32 %s11994_s7, 5 }
  0x17   : > { %218 = vst.msk [vmem:[#allocation2 + $0xa8] sm:$0xff] %vm195_vm1, %v9542_v4  ;;  %219 = vst.msk [vmem:[#allocation2 + $0xb0] sm:$0xff] %vm195_vm1, %v9542_v4  ;;  %v253_v7 = vld [vmem:[%s9668_s28 + $0x10] sm:$0xff]  ;;  %v9673_v8 = vld [vmem:[#allocation2] sm:$0xff]  ;;  %s11605_s16 = scalar_lea.vmem %s11871_s3, %s7486_s10 }
  0x18   : > { %221 = vst.msk [vmem:[#allocation2 + $0xc0] sm:$0xff] %vm195_vm1, %v9542_v4  ;;  %222 = vst.msk [vmem:[#allocation2 + $0xc8] sm:$0xff] %vm195_vm1, %v9542_v4  ;;  %v9675_v9 = vld [vmem:[#allocation2 + $0x8] sm:$0xff]  ;;  %v254_v10 = vld [vmem:[%s9668_s28 + $0x18] sm:$0xff]  ;;  %v520_v11 = vrot.slane %v9673_v8, 1 }
  0x19   : > { %224 = vst.msk [vmem:[#allocation2 + $0xd8] sm:$0xff] %vm195_vm1, %v9542_v4  ;;  %225 = vst.msk [vmem:[#allocation2 + $0xe0] sm:$0xff] %vm195_vm1, %v9542_v4  ;;  %v521_v12 = vrot.slane %v9675_v9, 1  ;;  %v255_v14 = vld [vmem:[%s9668_s28 + $0x20] sm:$0xff]  ;;  %v256_v15 = vld [vmem:[%s9668_s28 + $0x28] sm:$0xff] }
  0x1a   : > { %227 = vst.msk [vmem:[#allocation2 + $0xf0] sm:$0xff] %vm195_vm1, %v9542_v4  ;;  %228 = vst.msk [vmem:[#allocation2 + $0xf8] sm:$0xff] %vm195_vm1, %v9542_v4  ;;  %v257_v17 = vld [vmem:[%s9668_s28 + $0x30] sm:$0xff]  ;;  %v258_v18 = vld [vmem:[%s9668_s28 + $0x38] sm:$0xff] }
  0x1b   : > { %230 = vst.msk [vmem:[#allocation2 + $0x108] sm:$0xff] %vm195_vm1, %v9542_v4  ;;  %231 = vst.msk [vmem:[#allocation2 + $0x110] sm:$0xff] %vm195_vm1, %v9542_v4  ;;  %v259_v19 = vld [vmem:[%s9668_s28 + $0x40] sm:$0xff]  ;;  %v522_v22 = vsel %vm519_vm3, %v520_v11, %v521_v12  ;;  %v260_v23 = vld [vmem:[%s9668_s28 + $0x48] sm:$0xff] }
  0x1c   : > { %233 = vst.msk [vmem:[#allocation2 + $0x120] sm:$0xff] %vm195_vm1, %v9542_v4  ;;  %234 = vst.msk [vmem:[#allocation2 + $0x128] sm:$0xff] %vm195_vm1, %v9542_v4  ;;  %v261_v24 = vld [vmem:[%s9668_s28 + $0x50] sm:$0xff]  ;;  %v262_v25 = vld [vmem:[%s9668_s28 + $0x58] sm:$0xff]  ;;  %8083 = vmatprep.mubr.msk.f32.mxu0 %vm195_vm1, %v522_v22  ;;  %8533 = vmatprep.mubr.msk.f32.mxu1 %vm195_vm1, %v522_v22 }
  0x1d   : > { %236 = vst.msk [vmem:[#allocation2 + $0x138] sm:$0xff] %vm195_vm1, %v9542_v4  ;;  %237 = vst.msk [vmem:[#allocation2 + $0x140] sm:$0xff] %vm195_vm1, %v9542_v4  ;;  %v263_v27 = vld [vmem:[%s9668_s28 + $0x60] sm:$0xff]  ;;  %v264_v28 = vld [vmem:[%s9668_s28 + $0x68] sm:$0xff] }
  0x1e   : > { %239 = vst.msk [vmem:[#allocation2 + $0x150] sm:$0xff] %vm195_vm1, %v9542_v4  ;;  %240 = vst.msk [vmem:[#allocation2 + $0x158] sm:$0xff] %vm195_vm1, %v9542_v4  ;;  %v265_v29 = vld [vmem:[%s9668_s28 + $0x70] sm:$0xff]  ;;  %v266_v30 = vld [vmem:[%s9668_s28 + $0x78] sm:$0xff] }
  0x1f   : > { %242 = vst.msk [vmem:[#allocation2 + $0x168] sm:$0xff] %vm195_vm1, %v9542_v4  ;;  %243 = vst.msk [vmem:[#allocation2 + $0x170] sm:$0xff] %vm195_vm1, %v9542_v4  ;;  %v267_v31 = vld [vmem:[%s9668_s28 + $0x80] sm:$0xff]  ;;  %v268_v32 = vld [vmem:[%s9668_s28 + $0x88] sm:$0xff] }
  0x20   : > { %245 = vst.msk [vmem:[#allocation2 + $0x180] sm:$0xff] %vm195_vm1, %v9542_v4  ;;  %246 = vst.msk [vmem:[#allocation2 + $0x188] sm:$0xff] %vm195_vm1, %v9542_v4  ;;  %v269_v33 = vld [vmem:[%s9668_s28 + $0x90] sm:$0xff]  ;;  %v270_v34 = vld [vmem:[%s9668_s28 + $0x98] sm:$0xff] }
  0x21   : > { %248 = vst.msk [vmem:[#allocation2 + $0x198] sm:$0xff] %vm195_vm1, %v9542_v4  ;;  %249 = vst.msk [vmem:[#allocation2 + $0x1a0] sm:$0xff] %vm195_vm1, %v9542_v4  ;;  %v271_v35 = vld [vmem:[%s9668_s28 + $0xa0] sm:$0xff]  ;;  %v272_v44 = vld [vmem:[%s9668_s28 + $0xa8] sm:$0xff] }
  0x22   : > { %199 = vst.msk [vmem:[#allocation2 + $0x10] sm:$0x3] %vm198_vm2, %v9542_v4  ;;  %202 = vst.msk [vmem:[#allocation2 + $0x28] sm:$0x3] %vm198_vm2, %v9542_v4 }
  0x23   : > { %205 = vst.msk [vmem:[#allocation2 + $0x40] sm:$0x3] %vm198_vm2, %v9542_v4  ;;  %208 = vst.msk [vmem:[#allocation2 + $0x58] sm:$0x3] %vm198_vm2, %v9542_v4 }
  0x24   : > { %211 = vst.msk [vmem:[#allocation2 + $0x70] sm:$0x3] %vm198_vm2, %v9542_v4  ;;  %214 = vst.msk [vmem:[#allocation2 + $0x88] sm:$0x3] %vm198_vm2, %v9542_v4 }
  0x25   : > { %217 = vst.msk [vmem:[#allocation2 + $0xa0] sm:$0x3] %vm198_vm2, %v9542_v4  ;;  %220 = vst.msk [vmem:[#allocation2 + $0xb8] sm:$0x3] %vm198_vm2, %v9542_v4 }
  0x26   : > { %223 = vst.msk [vmem:[#allocation2 + $0xd0] sm:$0x3] %vm198_vm2, %v9542_v4  ;;  %226 = vst.msk [vmem:[#allocation2 + $0xe8] sm:$0x3] %vm198_vm2, %v9542_v4 }
  0x27   : > { %229 = vst.msk [vmem:[#allocation2 + $0x100] sm:$0x3] %vm198_vm2, %v9542_v4  ;;  %232 = vst.msk [vmem:[#allocation2 + $0x118] sm:$0x3] %vm198_vm2, %v9542_v4 }
  0x28   : > { %235 = vst.msk [vmem:[#allocation2 + $0x130] sm:$0x3] %vm198_vm2, %v9542_v4  ;;  %238 = vst.msk [vmem:[#allocation2 + $0x148] sm:$0x3] %vm198_vm2, %v9542_v4 }
  0x29   : > { %241 = vst.msk [vmem:[#allocation2 + $0x160] sm:$0x3] %vm198_vm2, %v9542_v4  ;;  %244 = vst.msk [vmem:[#allocation2 + $0x178] sm:$0x3] %vm198_vm2, %v9542_v4  ;;  %v9683_v13 = vld [vmem:[#allocation2 + $0x10] sm:$0x3] }
  0x2a   : > { %247 = vst.msk [vmem:[#allocation2 + $0x190] sm:$0x3] %vm198_vm2, %v9542_v4  ;;  %250 = vst.msk [vmem:[#allocation2 + $0x1a8] sm:$0x3] %vm198_vm2, %v9542_v4  ;;  %v523_v16 = vrot.slane %v9683_v13, 1 }
  0x2b   : > { %284 = vst.msk [vmem:[#allocation2 + $0x19] sm:$0xff] %vm195_vm1, %v251_v5  ;;  %285 = vst.msk [vmem:[#allocation2 + $0x21] sm:$0xff] %vm195_vm1, %v252_v6 }
  0x2c   : > { %286 = vst.msk [vmem:[#allocation2 + $0x31] sm:$0xff] %vm195_vm1, %v253_v7  ;;  %287 = vst.msk [vmem:[#allocation2 + $0x39] sm:$0xff] %vm195_vm1, %v254_v10  ;;  %v524_v26 = vsel %vm519_vm3, %v521_v12, %v523_v16  ;;  %v275_v16 = vld [vmem:[%s9668_s28 + $0xc0] sm:$0xff] }
  0x2d   : > { %288 = vst.msk [vmem:[#allocation2 + $0x49] sm:$0xff] %vm195_vm1, %v255_v14  ;;  %289 = vst.msk [vmem:[#allocation2 + $0x51] sm:$0xff] %vm195_vm1, %v256_v15  ;;  %8084 = vmatmul.mubr.msk.f32.vlgmr.msra.gmra.mrb[0].mxu0 %vm195_vm1, %v524_v26  ;;  %8534 = vmatmul.mubr.msk.f32.vlgmr.msra.gmra.mrb[0].mxu1 %vm195_vm1, %v524_v26  ;;  %v273_v14 = vld [vmem:[%s9668_s28 + $0xb0] sm:$0xff]  ;;  %v274_v15 = vld [vmem:[%s9668_s28 + $0xb8] sm:$0xff] }
  0x2e   : > { %290 = vst.msk [vmem:[#allocation2 + $0x61] sm:$0xff] %vm195_vm1, %v257_v17  ;;  %291 = vst.msk [vmem:[#allocation2 + $0x69] sm:$0xff] %vm195_vm1, %v258_v18  ;;  %8132 = vmatpush3.msk.msra.mxu0 %vm667_vm0, %v9594_v2  ;;  %8582 = vmatpush3.msk.msra.mxu1 %vm667_vm0, %v9599_v3  ;;  %v276_v17 = vld [vmem:[%s9668_s28 + $0xc8] sm:$0xff]  ;;  %v277_v18 = vld [vmem:[%s9668_s28 + $0xd0] sm:$0xff] }
  0x2f   : > { %292 = vst.msk [vmem:[#allocation2 + $0x79] sm:$0xff] %vm195_vm1, %v259_v19  ;;  %293 = vst.msk [vmem:[#allocation2 + $0x81] sm:$0xff] %vm195_vm1, %v260_v23  ;;  %8181 = vmatprep.subr.msk.mxu0 %vm667_vm0, %v9697_v20  ;;  %8631 = vmatprep.subr.msk.mxu1 %vm667_vm0, %v9702_v21  ;;  %v278_v23 = vld [vmem:[%s9668_s28 + $0xd8] sm:$0xff] }
  0x30   : > { %294 = vst.msk [vmem:[#allocation2 + $0x91] sm:$0xff] %vm195_vm1, %v261_v24  ;;  %295 = vst.msk [vmem:[#allocation2 + $0x99] sm:$0xff] %vm195_vm1, %v262_v25  ;;  %v279_v24 = vld [vmem:[%s9668_s28 + $0xe0] sm:$0xff]  ;;  %v280_v25 = vld [vmem:[%s9668_s28 + $0xe8] sm:$0xff] }
  0x31   : > { %296 = vst.msk [vmem:[#allocation2 + $0xa9] sm:$0xff] %vm195_vm1, %v263_v27  ;;  %297 = vst.msk [vmem:[#allocation2 + $0xb1] sm:$0xff] %vm195_vm1, %v264_v28 }
  0x32   : > { %298 = vst.msk [vmem:[#allocation2 + $0xc1] sm:$0xff] %vm195_vm1, %v265_v29  ;;  %299 = vst.msk [vmem:[#allocation2 + $0xc9] sm:$0xff] %vm195_vm1, %v266_v30  ;;  %v9738_v36 = vld [vmem:[#allocation2 + $0x18] sm:$0xff]  ;;  %v9740_v37 = vld [vmem:[#allocation2 + $0x20] sm:$0xff] }
  0x33   : > { %300 = vst.msk [vmem:[#allocation2 + $0xd9] sm:$0xff] %vm195_vm1, %v267_v31  ;;  %301 = vst.msk [vmem:[#allocation2 + $0xe1] sm:$0xff] %vm195_vm1, %v268_v32  ;;  %v9742_v38 = vld [vmem:[#allocation2 + $0x28] sm:$0x3]  ;;  %v525_v39 = vrot.slane %v9738_v36, 1  ;;  %v9753_v40 = vrot.slane %v9740_v37, 1 }
  0x34   : > { %302 = vst.msk [vmem:[#allocation2 + $0xf1] sm:$0xff] %vm195_vm1, %v269_v33  ;;  %303 = vst.msk [vmem:[#allocation2 + $0xf9] sm:$0xff] %vm195_vm1, %v270_v34  ;;  %v528_v41 = vrot.slane %v9742_v38, 1  ;;  %v9756_v42 = vld [vmem:[#allocation2 + $0x30] sm:$0xff]  ;;  %v9758_v43 = vld [vmem:[#allocation2 + $0x38] sm:$0xff] }
  0x35   : > { %304 = vst.msk [vmem:[#allocation2 + $0x109] sm:$0xff] %vm195_vm1, %v271_v35  ;;  %v530_v45 = vrot.slane %v9756_v42, 1  ;;  %v9763_v46 = vrot.slane %v9758_v43, 1  ;;  %v9765_v47 = vld [vmem:[#allocation2 + $0x40] sm:$0x3]  ;;  %v9767_v48 = vld [vmem:[#allocation2 + $0x48] sm:$0xff]  ;;  %v9774_v50 = vsel %vm519_vm3, %v525_v39, %v9753_v40 }
  0x36   : > { %v9769_v49 = vld [vmem:[#allocation2 + $0x50] sm:$0xff]  ;;  %305 = vst.msk [vmem:[#allocation2 + $0x111] sm:$0xff] %vm195_vm1, %v272_v44  ;;  %v529_v51 = vsel %vm519_vm3, %v9753_v40, %v528_v41  ;;  %v533_v52 = vrot.slane %v9765_v47, 1  ;;  %v535_v53 = vrot.slane %v9767_v48, 1  ;;  %v9780_v54 = vld [vmem:[#allocation2 + $0x58] sm:$0x3]  ;;  %8086 = vmatprep.mubr.msk.f32.mxu0 %vm195_vm1, %v9774_v50  ;;  %8536 = vmatprep.mubr.msk.f32.mxu1 %vm195_vm1, %v9774_v50 }
  0x37   : > { %v9788_v55 = vsel %vm519_vm3, %v530_v45, %v9763_v46  ;;  %v9791_v56 = vrot.slane %v9769_v49, 1  ;;  %v9793_v57 = vld [vmem:[#allocation2 + $0x60] sm:$0xff]  ;;  %v9795_v58 = vld [vmem:[#allocation2 + $0x68] sm:$0xff]  ;;  %8087 = vmatmul.mubr.msk.f32.gmra.mrb[2].mxu0 %vm195_vm1, %v529_v51  ;;  %8537 = vmatmul.mubr.msk.f32.gmra.mrb[2].mxu1 %vm195_vm1, %v529_v51  ;;  %v538_v60 = vrot.slane %v9780_v54, 1  ;;  %v9814_v0 = vld [vmem:[#allocation2 + $0x70] sm:$0x3] }
  0x38   : > { %8089 = vmatprep.mubr.msk.f32.mxu0 %vm195_vm1, %v9788_v55  ;;  %8539 = vmatprep.mubr.msk.f32.mxu1 %vm195_vm1, %v9788_v55  ;;  %v534_v59 = vsel %vm519_vm3, %v9763_v46, %v533_v52  ;;  %v540_v62 = vrot.slane %v9793_v57, 1  ;;  %v9812_v63 = vrot.slane %v9795_v58, 1  ;;  %v9816_v1 = vld [vmem:[#allocation2 + $0x78] sm:$0xff]  ;;  %v9818_v2 = vld [vmem:[#allocation2 + $0x80] sm:$0xff]  ;;  %v543_v4 = vrot.slane %v9814_v0, 1  ;;  %v9839_v11 = vld [vmem:[#allocation2 + $0x90] sm:$0xff] }
  0x39   : > { %11919 = vst [vmem:[#allocation3_spill] sm:$0xff] %v9791_v56  ;;  %v9808_v61 = vsel %vm519_vm3, %v535_v53, %v9791_v56  ;;  %v539_v3 = vsel %vm519_vm3, %v9791_v56, %v538_v60  ;;  %v545_v6 = vrot.slane %v9816_v1, 1  ;;  %v9835_v7 = vrot.slane %v9818_v2, 1  ;;  %v9837_v10 = vld [vmem:[#allocation2 + $0x88] sm:$0x3]  ;;  %v9841_v12 = vld [vmem:[#allocation2 + $0x98] sm:$0xff] }
  0x3a   : > { %11920 = vst [vmem:[#allocation4_spill] sm:$0xff] %v9808_v61  ;;  %11921 = vst [vmem:[#allocation5_spill] sm:$0xff] %v9812_v63  ;;  %v9831_v5 = vsel %vm519_vm3, %v540_v62, %v9812_v63  ;;  %v544_v19 = vsel %vm519_vm3, %v9812_v63, %v543_v4  ;;  %v548_v22 = vrot.slane %v9837_v10, 1  ;;  %v550_v27 = vrot.slane %v9839_v11, 1  ;;  %v9873_v29 = vld [vmem:[#allocation2 + $0xa0] sm:$0x3] }
  0x3b   : > { %8090 = vmatmul.mubr.msk.f32.gmra.mrb[4].mxu0 %vm195_vm1, %v534_v59  ;;  %8540 = vmatmul.mubr.msk.f32.gmra.mrb[4].mxu1 %vm195_vm1, %v534_v59  ;;  %11922 = vst [vmem:[#allocation6_spill] sm:$0xff] %v9831_v5  ;;  %11923 = vst [vmem:[#allocation7_spill] sm:$0xff] %v9835_v7  ;;  %v9867_v26 = vsel %vm519_vm3, %v545_v6, %v9835_v7  ;;  %v9871_v28 = vrot.slane %v9841_v12, 1  ;;  %v9878_v30 = vld [vmem:[#allocation2 + $0xa8] sm:$0xff]  ;;  %v9880_v31 = vld [vmem:[#allocation2 + $0xb0] sm:$0xff]  ;;  %v553_v33 = vrot.slane %v9873_v29, 1 }
  0x3c   : > { %8092 = vmatprep.mubr.msk.f32.mxu0 %vm195_vm1, %v9808_v61  ;;  %8542 = vmatprep.mubr.msk.f32.mxu1 %vm195_vm1, %v9808_v61  ;;  %306 = vst.msk [vmem:[#allocation2 + $0x121] sm:$0xff] %vm195_vm1, %v273_v14  ;;  %307 = vst.msk [vmem:[#allocation2 + $0x129] sm:$0xff] %vm195_vm1, %v274_v15  ;;  %v549_v32 = vsel %vm519_vm3, %v9835_v7, %v548_v22  ;;  %v555_v35 = vrot.slane %v9878_v30, 1  ;;  %v9897_v39 = vrot.slane %v9880_v31, 1  ;;  %v9899_v41 = vld [vmem:[#allocation2 + $0xb8] sm:$0x3] }
  0x3d   : > { %308 = vst.msk [vmem:[#allocation2 + $0x139] sm:$0xff] %vm195_vm1, %v275_v16  ;;  %309 = vst.msk [vmem:[#allocation2 + $0x141] sm:$0xff] %vm195_vm1, %v276_v17  ;;  %v9893_v34 = vsel %vm519_vm3, %v550_v27, %v9871_v28  ;;  %v9901_v44 = vld [vmem:[#allocation2 + $0xc0] sm:$0xff]  ;;  %v9903_v45 = vld [vmem:[#allocation2 + $0xc8] sm:$0xff]  ;;  %v554_v51 = vsel %vm519_vm3, %v9871_v28, %v553_v33  ;;  %v558_v52 = vrot.slane %v9899_v41, 1 }
  0x3e   : > { %310 = vst.msk [vmem:[#allocation2 + $0x151] sm:$0xff] %vm195_vm1, %v277_v18  ;;  %11924 = vst [vmem:[#allocation8_spill] sm:$0xff] %v9867_v26  ;;  %v9916_v53 = vsel %vm519_vm3, %v555_v35, %v9897_v39  ;;  %v560_v59 = vrot.slane %v9901_v44, 1  ;;  %v9920_v60 = vrot.slane %v9903_v45, 1  ;;  %v9922_v62 = vld [vmem:[#allocation2 + $0xd0] sm:$0x3] }
  0x3f   : > { %8093 = vmatmul.mubr.msk.f32.gmra.mrb[6].mxu0 %vm195_vm1, %v539_v3  ;;  %8543 = vmatmul.mubr.msk.f32.gmra.mrb[6].mxu1 %vm195_vm1, %v539_v3  ;;  %11925 = vst [vmem:[#allocation9_spill] sm:$0xff] %v9871_v28  ;;  %311 = vst.msk [vmem:[#allocation2 + $0x159] sm:$0xff] %vm195_vm1, %v278_v23  ;;  %v9924_v3 = vld [vmem:[#allocation2 + $0xd8] sm:$0xff]  ;;  %v9926_v4 = vld [vmem:[#allocation2 + $0xe0] sm:$0xff]  ;;  %v559_v6 = vsel %vm519_vm3, %v9897_v39, %v558_v52  ;;  %v563_v14 = vrot.slane %v9922_v62, 1 }
  0x40   : > { %8095 = vmatprep.mubr.msk.f32.mxu0 %vm195_vm1, %v9831_v5  ;;  %8545 = vmatprep.mubr.msk.f32.mxu1 %vm195_vm1, %v9831_v5  ;;  %312 = vst.msk [vmem:[#allocation2 + $0x169] sm:$0xff] %vm195_vm1, %v279_v24  ;;  %313 = vst.msk [vmem:[#allocation2 + $0x171] sm:$0xff] %vm195_vm1, %v280_v25  ;;  %v9939_v15 = vsel %vm519_vm3, %v560_v59, %v9920_v60  ;;  %v565_v16 = vrot.slane %v9924_v3, 1  ;;  %v9943_v17 = vrot.slane %v9926_v4, 1  ;;  %v9945_v18 = vld [vmem:[#allocation2 + $0xe8] sm:$0x3] }
  0x41   : > { %11926 = vst [vmem:[#allocation10_spill] sm:$0xff] %v9893_v34  ;;  %11927 = vst [vmem:[#allocation11_spill] sm:$0xff] %v9897_v39  ;;  %v9949_v22 = vld [vmem:[#allocation2 + $0xf8] sm:$0xff]  ;;  %v564_v23 = vsel %vm519_vm3, %v9920_v60, %v563_v14  ;;  %v568_v24 = vrot.slane %v9945_v18, 1  ;;  %v9968_v33 = vld [vmem:[#allocation2 + $0x100] sm:$0x3] }
  0x42   : > { %11928 = vst [vmem:[#allocation12_spill] sm:$0xff] %v9916_v53  ;;  %11929 = vst [vmem:[#allocation13_spill] sm:$0xff] %v9920_v60  ;;  %v9962_v25 = vsel %vm519_vm3, %v565_v16, %v9943_v17  ;;  %v9970_v35 = vld [vmem:[#allocation2 + $0x108] sm:$0xff]  ;;  %v573_v59 = vrot.slane %v9968_v33, 1 }
  0x43   : > { %8096 = vmatmul.mubr.msk.f32.gmra.mrb[8].mxu0 %vm195_vm1, %v544_v19  ;;  %8546 = vmatmul.mubr.msk.f32.gmra.mrb[8].mxu1 %vm195_vm1, %v544_v19  ;;  %11930 = vst [vmem:[#allocation14_spill] sm:$0xff] %v9939_v15  ;;  %11931 = vst [vmem:[#allocation15_spill] sm:$0xff] %v9943_v17  ;;  %v9947_v19 = vld [vmem:[#allocation2 + $0xf0] sm:$0xff]  ;;  %v569_v52 = vsel %vm519_vm3, %v9943_v17, %v568_v24  ;;  %v575_v14 = vrot.slane %v9970_v35, 1  ;;  %v9993_v60 = vld [vmem:[#allocation2 + $0x120] sm:$0xff] }
  0x44   : > { %8098 = vmatprep.mubr.msk.f32.mxu0 %vm195_vm1, %v9867_v26  ;;  %8548 = vmatprep.mubr.msk.f32.mxu1 %vm195_vm1, %v9867_v26  ;;  %11932 = vst [vmem:[#allocation16_spill] sm:$0xff] %v9962_v25  ;;  %v570_v27 = vrot.slane %v9947_v19, 1  ;;  %v10018_v28 = vld [vmem:[#allocation2 + $0x140] sm:$0xff] }
  0x45   : > { %v10039_v7 = vld [vmem:[#allocation2 + $0x150] sm:$0xff] }
  0x46   : > { %v10041_v26 = vld [vmem:[#allocation2 + $0x158] sm:$0xff] }
  0x47   : > { %8099 = vmatmul.mubr.msk.f32.gmra.mrb[10].mxu0 %vm195_vm1, %v549_v32  ;;  %8549 = vmatmul.mubr.msk.f32.gmra.mrb[10].mxu1 %vm195_vm1, %v549_v32  ;;  %v9966_v32 = vrot.slane %v9949_v22, 1  ;;  %v10058_v63 = vrot.slane %v10041_v26, 1  ;;  %v10062_v5 = vld [vmem:[#allocation2 + $0x168] sm:$0xff]  ;;  %v10064_v56 = vld [vmem:[#allocation2 + $0x170] sm:$0xff] }
  0x48   : > { %8101 = vmatprep.mubr.msk.f32.mxu0 %vm195_vm1, %v9893_v34  ;;  %8551 = vmatprep.mubr.msk.f32.mxu1 %vm195_vm1, %v9893_v34  ;;  %v10035_v34 = vrot.slane %v10018_v28, 1  ;;  %v10081_v61 = vrot.slane %v10064_v56, 1 }
  0x49   : > { %11933 = vst [vmem:[#allocation17_spill] sm:$0xff] %v9966_v32  ;;  %v574_v24 = vsel %vm519_vm3, %v9966_v32, %v573_v59 }
  0x4a   : > { %11939 = vst [vmem:[#allocation23_spill] sm:$0xff] %v10035_v34  ;;  %11940 = vst [vmem:[#allocation24_spill] sm:$0xff] %v10081_v61 }
  0x4b   : > { %8102 = vmatmul.mubr.msk.f32.gmra.mrb[12].mxu0 %vm195_vm1, %v554_v51  ;;  %8552 = vmatmul.mubr.msk.f32.gmra.mrb[12].mxu1 %vm195_vm1, %v554_v51  ;;  %v9972_v51 = vld [vmem:[#allocation2 + $0x110] sm:$0xff] }
  0x4c   : > { %8104 = vmatprep.mubr.msk.f32.mxu0 %vm195_vm1, %v9916_v53  ;;  %8554 = vmatprep.mubr.msk.f32.mxu1 %vm195_vm1, %v9916_v53  ;;  %v9989_v16 = vrot.slane %v9972_v51, 1  ;;  %v10016_v53 = vld [vmem:[#allocation2 + $0x138] sm:$0xff] }
  0x4e   : > { %11935 = vst [vmem:[#allocation19_spill] sm:$0xff] %v9989_v16  ;;  %v10008_v17 = vsel %vm519_vm3, %v575_v14, %v9989_v16 }
  0x4f   : > { %8105 = vmatmul.mubr.msk.f32.gmra.mrb[14].mxu0 %vm195_vm1, %v559_v6  ;;  %8555 = vmatmul.mubr.msk.f32.gmra.mrb[14].mxu1 %vm195_vm1, %v559_v6  ;;  %v9985_v6 = vsel %vm519_vm3, %v570_v27, %v9966_v32  ;;  %11936 = vst [vmem:[#allocation20_spill] sm:$0xff] %v10008_v17 }
  0x50   : > { %8107 = vmatprep.mubr.msk.f32.mxu0 %vm195_vm1, %v9939_v15  ;;  %8557 = vmatprep.mubr.msk.f32.mxu1 %vm195_vm1, %v9939_v15  ;;  %11934 = vst [vmem:[#allocation18_spill] sm:$0xff] %v9985_v6  ;;  %v9995_v15 = vld [vmem:[#allocation2 + $0x128] sm:$0xff] }
  0x51   : > { %v10012_v39 = vrot.slane %v9995_v15, 1 }
  0x53   : > { %8108 = vmatmul.mubr.msk.f32.gmra.mrb[16].mxu0 %vm195_vm1, %v564_v23  ;;  %8558 = vmatmul.mubr.msk.f32.gmra.mrb[16].mxu1 %vm195_vm1, %v564_v23  ;;  %v9991_v23 = vld [vmem:[#allocation2 + $0x118] sm:$0x3]  ;;  %11937 = vst [vmem:[#allocation21_spill] sm:$0xff] %v10012_v39 }
  0x54   : > { %8110 = vmatprep.mubr.msk.f32.mxu0 %vm195_vm1, %v9962_v25  ;;  %8560 = vmatprep.mubr.msk.f32.mxu1 %vm195_vm1, %v9962_v25  ;;  %v578_v27 = vrot.slane %v9991_v23, 1  ;;  %v580_v25 = vrot.slane %v9993_v60, 1 }
  0x56   : > { %v579_v59 = vsel %vm519_vm3, %v9989_v16, %v578_v27  ;;  %v10031_v32 = vsel %vm519_vm3, %v580_v25, %v10012_v39 }
  0x57   : > { %8111 = vmatmul.mubr.msk.f32.gmra.mrb[18].mxu0 %vm195_vm1, %v569_v52  ;;  %8561 = vmatmul.mubr.msk.f32.gmra.mrb[18].mxu1 %vm195_vm1, %v569_v52  ;;  %v10014_v52 = vld [vmem:[#allocation2 + $0x130] sm:$0x3]  ;;  %11938 = vst [vmem:[#allocation22_spill] sm:$0xff] %v10031_v32 }
  0x58   : > { %8113 = vmatprep.mubr.msk.f32.mxu0 %vm195_vm1, %v9985_v6  ;;  %8563 = vmatprep.mubr.msk.f32.mxu1 %vm195_vm1, %v9985_v6  ;;  %v583_v14 = vrot.slane %v10014_v52, 1  ;;  %v585_v6 = vrot.slane %v10016_v53, 1 }
  0x5a   : > { %v584_v25 = vsel %vm519_vm3, %v10012_v39, %v583_v14  ;;  %v10054_v16 = vsel %vm519_vm3, %v585_v6, %v10035_v34 }
  0x5b   : > { %8114 = vmatmul.mubr.msk.f32.gmra.mrb[20].mxu0 %vm195_vm1, %v574_v24  ;;  %8564 = vmatmul.mubr.msk.f32.gmra.mrb[20].mxu1 %vm195_vm1, %v574_v24  ;;  %v10037_v24 = vld [vmem:[#allocation2 + $0x148] sm:$0x3] }
  0x5c   : > { %8116 = vmatprep.mubr.msk.f32.mxu0 %vm195_vm1, %v10008_v17  ;;  %8566 = vmatprep.mubr.msk.f32.mxu1 %vm195_vm1, %v10008_v17  ;;  %v588_v27 = vrot.slane %v10037_v24, 1  ;;  %v590_v17 = vrot.slane %v10039_v7, 1 }
  0x5e   : > { %v589_v6 = vsel %vm519_vm3, %v10035_v34, %v588_v27  ;;  %v10077_v39 = vsel %vm519_vm3, %v590_v17, %v10058_v63 }
  0x5f   : > { %8117 = vmatmul.mubr.msk.f32.gmra.mrb[22].mxu0 %vm195_vm1, %v579_v59  ;;  %8567 = vmatmul.mubr.msk.f32.gmra.mrb[22].mxu1 %vm195_vm1, %v579_v59  ;;  %v10060_v59 = vld [vmem:[#allocation2 + $0x160] sm:$0x3] }
  0x60   : > { %8119 = vmatprep.mubr.msk.f32.mxu0 %vm195_vm1, %v10031_v32  ;;  %8569 = vmatprep.mubr.msk.f32.mxu1 %vm195_vm1, %v10031_v32  ;;  %v593_v14 = vrot.slane %v10060_v59, 1  ;;  %v595_v32 = vrot.slane %v10062_v5, 1 }
  0x62   : > { %v594_v17 = vsel %vm519_vm3, %v10058_v63, %v593_v14  ;;  %v10096_v34 = vsel %vm519_vm3, %v595_v32, %v10081_v61  ;;  %v10119_v32 = vld [vmem:[%s11869_s1 + $0xc] sm:$0xf]  ;;  %v10124_v14 = vld [vmem:[%s11869_s1 + $0x30] sm:$0xf] }
  0x63   : > { %8120 = vmatmul.mubr.msk.f32.gmra.mrb[24].mxu0 %vm195_vm1, %v584_v25  ;;  %8570 = vmatmul.mubr.msk.f32.gmra.mrb[24].mxu1 %vm195_vm1, %v584_v25  ;;  %v10083_v25 = vld [vmem:[#allocation2 + $0x178] sm:$0x3]  ;;  %11941 = vst [vmem:[#allocation25_spill] sm:$0xff] %v10096_v34 }
  0x64   : > { %8122 = vmatprep.mubr.msk.f32.mxu0 %vm195_vm1, %v10054_v16  ;;  %8572 = vmatprep.mubr.msk.f32.mxu1 %vm195_vm1, %v10054_v16  ;;  %v598_v27 = vrot.slane %v10083_v25, 1 }
  0x67   : > { %8123 = vmatmul.mubr.msk.f32.gmra.mrb[26].mxu0 %vm195_vm1, %v589_v6  ;;  %8573 = vmatmul.mubr.msk.f32.gmra.mrb[26].mxu1 %vm195_vm1, %v589_v6  ;;  %v599_v6 = vsel %vm519_vm3, %v10081_v61, %v598_v27  ;;  %v1190_v27 = vrot.slane %v9675_v9, 2  ;;  %v10272_v61 = vrot.slane %v9758_v43, 2 }
  0x68   : > { %8125 = vmatprep.mubr.msk.f32.mxu0 %vm195_vm1, %v10077_v39  ;;  %8575 = vmatprep.mubr.msk.f32.mxu1 %vm195_vm1, %v10077_v39 }
  0x6b   : > { %8126 = vmatmul.mubr.msk.f32.gmra.mrb[28].mxu0 %vm195_vm1, %v594_v17  ;;  %8576 = vmatmul.mubr.msk.f32.gmra.mrb[28].mxu1 %vm195_vm1, %v594_v17  ;;  %v1189_v17 = vrot.slane %v9673_v8, 2 }
  0x6c   : > { %8128 = vmatprep.mubr.msk.f32.mxu0 %vm195_vm1, %v10096_v34  ;;  %8578 = vmatprep.mubr.msk.f32.mxu1 %vm195_vm1, %v10096_v34 }
  0x6f   : > { %8129 = vmatmul.mubr.msk.f32.gmra.mrb[30].mxu0 %vm195_vm1, %v599_v6  ;;  %8579 = vmatmul.mubr.msk.f32.gmra.mrb[30].mxu1 %vm195_vm1, %v599_v6  ;;  %v1192_v6 = vrot.slane %v9683_v13, 2 }
  0x70   : > { %8133 = vmatprep.mubr.msk.f32.mxu0 %vm195_vm1, %v9673_v8  ;;  %8583 = vmatprep.mubr.msk.f32.mxu1 %vm195_vm1, %v9673_v8  ;;  %v1194_v8 = vrot.slane %v9738_v36, 2 }
  0x71   : > { %v1193_v13 = vsel %vm1188_vm4, %v1190_v27, %v1192_v6  ;;  %v1202_v6 = vrot.slane %v9765_v47, 2 }
  0x73   : > { %8134 = vmatmul.mubr.msk.f32.vlgmr.msra.gmra.mrb[0].mxu0 %vm195_vm1, %v9675_v9  ;;  %8584 = vmatmul.mubr.msk.f32.vlgmr.msra.gmra.mrb[0].mxu1 %vm195_vm1, %v9675_v9  ;;  %v10260_v9 = vrot.slane %v9740_v37, 2  ;;  %v1203_v47 = vsel %vm1188_vm4, %v10272_v61, %v1202_v6 }
  0x74   : > { %8182 = vmatpush3.msk.msra.mxu0 %vm667_vm0, %v9697_v20  ;;  %8632 = vmatpush3.msk.msra.mxu1 %vm667_vm0, %v9702_v21  ;;  %v281_v20 = vld [vmem:[%s9668_s28 + $0xf0] sm:$0xff]  ;;  %v282_v21 = vld [vmem:[%s9668_s28 + $0xf8] sm:$0xff] }
  0x75   : > { %8136 = vmatprep.mubr.msk.f32.mxu0 %vm195_vm1, %v9738_v36  ;;  %8586 = vmatprep.mubr.msk.f32.mxu1 %vm195_vm1, %v9738_v36  ;;  %314 = vst.msk [vmem:[#allocation2 + $0x181] sm:$0xff] %vm195_vm1, %v281_v20  ;;  %315 = vst.msk [vmem:[#allocation2 + $0x189] sm:$0xff] %vm195_vm1, %v282_v21  ;;  %v1191_v20 = vsel %vm1188_vm4, %v1189_v17, %v1190_v27  ;;  %v1197_v21 = vrot.slane %v9742_v38, 2  ;;  %v1199_v17 = vrot.slane %v9756_v42, 2  ;;  %v10288_v38 = vld [vmem:[%s11869_s1 + $0x34] sm:$0xf] }
  0x76   : > { %8231 = vmatprep.subr.msk.mxu0 %vm667_vm0, %v10119_v32  ;;  %8681 = vmatprep.subr.msk.mxu1 %vm667_vm0, %v10124_v14  ;;  %11942 = vst [vmem:[#allocation26_spill] sm:$0xff] %v10260_v9  ;;  %v10276_v34 = vsel %vm1188_vm4, %v1194_v8, %v10260_v9 }
  0x77   : > { %8137 = vmatmul.mubr.msk.f32.gmra.mrb[2].mxu0 %vm195_vm1, %v9740_v37  ;;  %8587 = vmatmul.mubr.msk.f32.gmra.mrb[2].mxu1 %vm195_vm1, %v9740_v37  ;;  %v1198_v27 = vsel %vm1188_vm4, %v10260_v9, %v1197_v21  ;;  %v10303_v8 = vsel %vm1188_vm4, %v1199_v17, %v10272_v61  ;;  %v1209_v17 = vrot.slane %v9793_v57, 2  ;;  %v10328_v9 = vrot.slane %v9795_v58, 2 }
  0x78   : > { %8139 = vmatprep.mubr.msk.f32.mxu0 %vm195_vm1, %v9756_v42  ;;  %8589 = vmatprep.mubr.msk.f32.mxu1 %vm195_vm1, %v9756_v42  ;;  %11943 = vst [vmem:[#allocation27_spill] sm:$0xff] %v10303_v8 }
  0x79   : > { %11945 = vst [vmem:[#allocation29_spill] sm:$0xff] %v10328_v9  ;;  %v10341_v6 = vsel %vm1188_vm4, %v1209_v17, %v10328_v9  ;;  %v1219_v17 = vrot.slane %v9839_v11, 2 }
  0x7b   : > { %8140 = vmatmul.mubr.msk.f32.gmra.mrb[4].mxu0 %vm195_vm1, %v9758_v43  ;;  %8590 = vmatmul.mubr.msk.f32.gmra.mrb[4].mxu1 %vm195_vm1, %v9758_v43 }
  0x7c   : > { %8142 = vmatprep.mubr.msk.f32.mxu0 %vm195_vm1, %v9767_v48  ;;  %8592 = vmatprep.mubr.msk.f32.mxu1 %vm195_vm1, %v9767_v48 }
  0x7f   : > { %8143 = vmatmul.mubr.msk.f32.gmra.mrb[6].mxu0 %vm195_vm1, %v9769_v49  ;;  %8593 = vmatmul.mubr.msk.f32.gmra.mrb[6].mxu1 %vm195_vm1, %v9769_v49 }
  0x80   : > { %8145 = vmatprep.mubr.msk.f32.mxu0 %vm195_vm1, %v9793_v57  ;;  %8595 = vmatprep.mubr.msk.f32.mxu1 %vm195_vm1, %v9793_v57 }
  0x83   : > { %8146 = vmatmul.mubr.msk.f32.gmra.mrb[8].mxu0 %vm195_vm1, %v9795_v58  ;;  %8596 = vmatmul.mubr.msk.f32.gmra.mrb[8].mxu1 %vm195_vm1, %v9795_v58 }
  0x84   : > { %8148 = vmatprep.mubr.msk.f32.mxu0 %vm195_vm1, %v9816_v1  ;;  %8598 = vmatprep.mubr.msk.f32.mxu1 %vm195_vm1, %v9816_v1 }
  0x87   : > { %8149 = vmatmul.mubr.msk.f32.gmra.mrb[10].mxu0 %vm195_vm1, %v9818_v2  ;;  %8599 = vmatmul.mubr.msk.f32.gmra.mrb[10].mxu1 %vm195_vm1, %v9818_v2 }
  0x88   : > { %8151 = vmatprep.mubr.msk.f32.mxu0 %vm195_vm1, %v9839_v11  ;;  %8601 = vmatprep.mubr.msk.f32.mxu1 %vm195_vm1, %v9839_v11 }
  0x8b   : > { %8152 = vmatmul.mubr.msk.f32.gmra.mrb[12].mxu0 %vm195_vm1, %v9841_v12  ;;  %8602 = vmatmul.mubr.msk.f32.gmra.mrb[12].mxu1 %vm195_vm1, %v9841_v12 }
  0x8c   : > { %8154 = vmatprep.mubr.msk.f32.mxu0 %vm195_vm1, %v9878_v30  ;;  %8604 = vmatprep.mubr.msk.f32.mxu1 %vm195_vm1, %v9878_v30 }
  0x8f   : > { %8155 = vmatmul.mubr.msk.f32.gmra.mrb[14].mxu0 %vm195_vm1, %v9880_v31  ;;  %8605 = vmatmul.mubr.msk.f32.gmra.mrb[14].mxu1 %vm195_vm1, %v9880_v31 }
  0x90   : > { %8157 = vmatprep.mubr.msk.f32.mxu0 %vm195_vm1, %v9901_v44  ;;  %8607 = vmatprep.mubr.msk.f32.mxu1 %vm195_vm1, %v9901_v44 }
  0x93   : > { %8158 = vmatmul.mubr.msk.f32.gmra.mrb[16].mxu0 %vm195_vm1, %v9903_v45  ;;  %8608 = vmatmul.mubr.msk.f32.gmra.mrb[16].mxu1 %vm195_vm1, %v9903_v45 }
  0x94   : > { %8160 = vmatprep.mubr.msk.f32.mxu0 %vm195_vm1, %v9924_v3  ;;  %8610 = vmatprep.mubr.msk.f32.mxu1 %vm195_vm1, %v9924_v3 }
  0x97   : > { %8161 = vmatmul.mubr.msk.f32.gmra.mrb[18].mxu0 %vm195_vm1, %v9926_v4  ;;  %8611 = vmatmul.mubr.msk.f32.gmra.mrb[18].mxu1 %vm195_vm1, %v9926_v4 }
  0x98   : > { %8163 = vmatprep.mubr.msk.f32.mxu0 %vm195_vm1, %v9947_v19  ;;  %8613 = vmatprep.mubr.msk.f32.mxu1 %vm195_vm1, %v9947_v19 }
  0x9b   : > { %8164 = vmatmul.mubr.msk.f32.gmra.mrb[20].mxu0 %vm195_vm1, %v9949_v22  ;;  %8614 = vmatmul.mubr.msk.f32.gmra.mrb[20].mxu1 %vm195_vm1, %v9949_v22 }
  0x9c   : > { %8166 = vmatprep.mubr.msk.f32.mxu0 %vm195_vm1, %v9970_v35  ;;  %8616 = vmatprep.mubr.msk.f32.mxu1 %vm195_vm1, %v9970_v35 }
  0x9f   : > { %8167 = vmatmul.mubr.msk.f32.gmra.mrb[22].mxu0 %vm195_vm1, %v9972_v51  ;;  %8617 = vmatmul.mubr.msk.f32.gmra.mrb[22].mxu1 %vm195_vm1, %v9972_v51 }
  0xa0   : > { %8169 = vmatprep.mubr.msk.f32.mxu0 %vm195_vm1, %v9993_v60  ;;  %8619 = vmatprep.mubr.msk.f32.mxu1 %vm195_vm1, %v9993_v60 }
  0xa3   : > { %8170 = vmatmul.mubr.msk.f32.gmra.mrb[24].mxu0 %vm195_vm1, %v9995_v15  ;;  %8620 = vmatmul.mubr.msk.f32.gmra.mrb[24].mxu1 %vm195_vm1, %v9995_v15 }
  0xa4   : > { %8172 = vmatprep.mubr.msk.f32.mxu0 %vm195_vm1, %v10016_v53  ;;  %8622 = vmatprep.mubr.msk.f32.mxu1 %vm195_vm1, %v10016_v53 }
  0xa7   : > { %8173 = vmatmul.mubr.msk.f32.gmra.mrb[26].mxu0 %vm195_vm1, %v10018_v28  ;;  %8623 = vmatmul.mubr.msk.f32.gmra.mrb[26].mxu1 %vm195_vm1, %v10018_v28 }
  0xa8   : > { %8175 = vmatprep.mubr.msk.f32.mxu0 %vm195_vm1, %v10039_v7  ;;  %8625 = vmatprep.mubr.msk.f32.mxu1 %vm195_vm1, %v10039_v7 }
  0xab   : > { %8176 = vmatmul.mubr.msk.f32.gmra.mrb[28].mxu0 %vm195_vm1, %v10041_v26  ;;  %8626 = vmatmul.mubr.msk.f32.gmra.mrb[28].mxu1 %vm195_vm1, %v10041_v26 }
  0xac   : > { %8178 = vmatprep.mubr.msk.f32.mxu0 %vm195_vm1, %v10062_v5  ;;  %8628 = vmatprep.mubr.msk.f32.mxu1 %vm195_vm1, %v10062_v5 }
  0xaf   : > { %8179 = vmatmul.mubr.msk.f32.gmra.mrb[30].mxu0 %vm195_vm1, %v10064_v56  ;;  %8629 = vmatmul.mubr.msk.f32.gmra.mrb[30].mxu1 %vm195_vm1, %v10064_v56 }
  0xb0   : > { %8183 = vmatprep.mubr.msk.f32.mxu0 %vm195_vm1, %v1191_v20  ;;  %8633 = vmatprep.mubr.msk.f32.mxu1 %vm195_vm1, %v1191_v20  ;;  %v10283_v20 = vld [vmem:[%s11869_s1 + $0x10] sm:$0xf] }
  0xb3   : > { %8184 = vmatmul.mubr.msk.f32.vlgmr.msra.gmra.mrb[0].mxu0 %vm195_vm1, %v1193_v13  ;;  %8634 = vmatmul.mubr.msk.f32.vlgmr.msra.gmra.mrb[0].mxu1 %vm195_vm1, %v1193_v13  ;;  %v10307_v13 = vrot.slane %v9769_v49, 2 }
  0xb4   : > { %8232 = vmatpush3.msk.msra.mxu0 %vm667_vm0, %v10119_v32  ;;  %8682 = vmatpush3.msk.msra.mxu1 %vm667_vm0, %v10124_v14  ;;  %v1204_v32 = vrot.slane %v9767_v48, 2  ;;  %v1207_v14 = vrot.slane %v9780_v54, 2 }
  0xb5   : > { %8186 = vmatprep.mubr.msk.f32.mxu0 %vm195_vm1, %v10276_v34  ;;  %8636 = vmatprep.mubr.msk.f32.mxu1 %vm195_vm1, %v10276_v34  ;;  %11944 = vst [vmem:[#allocation28_spill] sm:$0xff] %v10307_v13 }
  0xb6   : > { %8281 = vmatprep.subr.msk.mxu0 %vm667_vm0, %v10283_v20  ;;  %8731 = vmatprep.subr.msk.mxu1 %vm667_vm0, %v10288_v38  ;;  %v10324_v21 = vsel %vm1188_vm4, %v1204_v32, %v10307_v13  ;;  %v1208_v54 = vsel %vm1188_vm4, %v10307_v13, %v1207_v14  ;;  %v1214_v32 = vrot.slane %v9816_v1, 2  ;;  %v10362_v13 = vrot.slane %v9841_v12, 2 }
  0xb7   : > { %8187 = vmatmul.mubr.msk.f32.gmra.mrb[2].mxu0 %vm195_vm1, %v1198_v27  ;;  %8637 = vmatmul.mubr.msk.f32.gmra.mrb[2].mxu1 %vm195_vm1, %v1198_v27  ;;  %v1212_v27 = vrot.slane %v9814_v0, 2 }
  0xb8   : > { %8189 = vmatprep.mubr.msk.f32.mxu0 %vm195_vm1, %v10303_v8  ;;  %8639 = vmatprep.mubr.msk.f32.mxu1 %vm195_vm1, %v10303_v8  ;;  %v10345_v8 = vrot.slane %v9818_v2, 2  ;;  %11947 = vst [vmem:[#allocation31_spill] sm:$0xff] %v10362_v13 }
  0xb9   : > { %v1213_v0 = vsel %vm1188_vm4, %v10328_v9, %v1212_v27  ;;  %v10375_v27 = vsel %vm1188_vm4, %v1219_v17, %v10362_v13  ;;  %v10379_v9 = vrot.slane %v9880_v31, 2  ;;  %v1229_v17 = vrot.slane %v9901_v44, 2 }
  0xba   : > { %11946 = vst [vmem:[#allocation30_spill] sm:$0xff] %v10345_v8  ;;  %v10358_v14 = vsel %vm1188_vm4, %v1214_v32, %v10345_v8  ;;  %v1224_v32 = vrot.slane %v9878_v30, 2 }
  0xbb   : > { %8190 = vmatmul.mubr.msk.f32.gmra.mrb[4].mxu0 %vm195_vm1, %v1203_v47  ;;  %8640 = vmatmul.mubr.msk.f32.gmra.mrb[4].mxu1 %vm195_vm1, %v1203_v47  ;;  %v1217_v47 = vrot.slane %v9837_v10, 2  ;;  %11948 = vst [vmem:[#allocation32_spill] sm:$0xff] %v10379_v9 }
  0xbc   : > { %8192 = vmatprep.mubr.msk.f32.mxu0 %vm195_vm1, %v10324_v21  ;;  %8642 = vmatprep.mubr.msk.f32.mxu1 %vm195_vm1, %v10324_v21 }
  0xbd   : > { %v1218_v10 = vsel %vm1188_vm4, %v10345_v8, %v1217_v47  ;;  %v10392_v47 = vsel %vm1188_vm4, %v1224_v32, %v10379_v9  ;;  %v10396_v8 = vrot.slane %v9903_v45, 2  ;;  %v1234_v32 = vrot.slane %v9924_v3, 2 }
  0xbf   : > { %8193 = vmatmul.mubr.msk.f32.gmra.mrb[6].mxu0 %vm195_vm1, %v1208_v54  ;;  %8643 = vmatmul.mubr.msk.f32.gmra.mrb[6].mxu1 %vm195_vm1, %v1208_v54  ;;  %v1222_v54 = vrot.slane %v9873_v29, 2  ;;  %11949 = vst [vmem:[#allocation33_spill] sm:$0xff] %v10396_v8 }
  0xc0   : > { %8195 = vmatprep.mubr.msk.f32.mxu0 %vm195_vm1, %v10341_v6  ;;  %8645 = vmatprep.mubr.msk.f32.mxu1 %vm195_vm1, %v10341_v6 }
  0xc1   : > { %v1223_v29 = vsel %vm1188_vm4, %v10362_v13, %v1222_v54  ;;  %v10409_v54 = vsel %vm1188_vm4, %v1229_v17, %v10396_v8  ;;  %v10413_v13 = vrot.slane %v9926_v4, 2  ;;  %v1239_v17 = vrot.slane %v9947_v19, 2 }
  0xc3   : > { %8196 = vmatmul.mubr.msk.f32.gmra.mrb[8].mxu0 %vm195_vm1, %v1213_v0  ;;  %8646 = vmatmul.mubr.msk.f32.gmra.mrb[8].mxu1 %vm195_vm1, %v1213_v0  ;;  %v1227_v0 = vrot.slane %v9899_v41, 2  ;;  %11950 = vst [vmem:[#allocation34_spill] sm:$0xff] %v10413_v13 }
  0xc4   : > { %8198 = vmatprep.mubr.msk.f32.mxu0 %vm195_vm1, %v10358_v14  ;;  %8648 = vmatprep.mubr.msk.f32.mxu1 %vm195_vm1, %v10358_v14 }
  0xc5   : > { %v1228_v41 = vsel %vm1188_vm4, %v10379_v9, %v1227_v0  ;;  %v10426_v0 = vsel %vm1188_vm4, %v1234_v32, %v10413_v13  ;;  %v10430_v9 = vrot.slane %v9949_v22, 2  ;;  %v1244_v32 = vrot.slane %v9970_v35, 2 }
  0xc7   : > { %8199 = vmatmul.mubr.msk.f32.gmra.mrb[10].mxu0 %vm195_vm1, %v1218_v10  ;;  %8649 = vmatmul.mubr.msk.f32.gmra.mrb[10].mxu1 %vm195_vm1, %v1218_v10  ;;  %v1232_v10 = vrot.slane %v9922_v62, 2  ;;  %11951 = vst [vmem:[#allocation35_spill] sm:$0xff] %v10430_v9 }
  0xc8   : > { %8201 = vmatprep.mubr.msk.f32.mxu0 %vm195_vm1, %v10375_v27  ;;  %8651 = vmatprep.mubr.msk.f32.mxu1 %vm195_vm1, %v10375_v27 }
  0xc9   : > { %v1233_v62 = vsel %vm1188_vm4, %v10396_v8, %v1232_v10  ;;  %v10443_v10 = vsel %vm1188_vm4, %v1239_v17, %v10430_v9  ;;  %v10447_v8 = vrot.slane %v9972_v51, 2  ;;  %v1249_v17 = vrot.slane %v9993_v60, 2 }
  0xcb   : > { %8202 = vmatmul.mubr.msk.f32.gmra.mrb[12].mxu0 %vm195_vm1, %v1223_v29  ;;  %8652 = vmatmul.mubr.msk.f32.gmra.mrb[12].mxu1 %vm195_vm1, %v1223_v29  ;;  %v1237_v29 = vrot.slane %v9945_v18, 2  ;;  %11952 = vst [vmem:[#allocation36_spill] sm:$0xff] %v10447_v8 }
  0xcc   : > { %8204 = vmatprep.mubr.msk.f32.mxu0 %vm195_vm1, %v10392_v47  ;;  %8654 = vmatprep.mubr.msk.f32.mxu1 %vm195_vm1, %v10392_v47 }
  0xcd   : > { %v1238_v18 = vsel %vm1188_vm4, %v10413_v13, %v1237_v29  ;;  %v10460_v29 = vsel %vm1188_vm4, %v1244_v32, %v10447_v8  ;;  %v10464_v13 = vrot.slane %v9995_v15, 2  ;;  %v1254_v32 = vrot.slane %v10016_v53, 2 }
  0xcf   : > { %8205 = vmatmul.mubr.msk.f32.gmra.mrb[14].mxu0 %vm195_vm1, %v1228_v41  ;;  %8655 = vmatmul.mubr.msk.f32.gmra.mrb[14].mxu1 %vm195_vm1, %v1228_v41  ;;  %v1242_v41 = vrot.slane %v9968_v33, 2  ;;  %11953 = vst [vmem:[#allocation37_spill] sm:$0xff] %v10464_v13 }
  0xd0   : > { %8207 = vmatprep.mubr.msk.f32.mxu0 %vm195_vm1, %v10409_v54  ;;  %8657 = vmatprep.mubr.msk.f32.mxu1 %vm195_vm1, %v10409_v54 }
  0xd1   : > { %v1243_v33 = vsel %vm1188_vm4, %v10430_v9, %v1242_v41  ;;  %v10477_v41 = vsel %vm1188_vm4, %v1249_v17, %v10464_v13  ;;  %v10481_v9 = vrot.slane %v10018_v28, 2  ;;  %v1259_v17 = vrot.slane %v10039_v7, 2 }
  0xd3   : > { %8208 = vmatmul.mubr.msk.f32.gmra.mrb[16].mxu0 %vm195_vm1, %v1233_v62  ;;  %8658 = vmatmul.mubr.msk.f32.gmra.mrb[16].mxu1 %vm195_vm1, %v1233_v62  ;;  %v1247_v62 = vrot.slane %v9991_v23, 2 }
  0xd4   : > { %8210 = vmatprep.mubr.msk.f32.mxu0 %vm195_vm1, %v10426_v0  ;;  %8660 = vmatprep.mubr.msk.f32.mxu1 %vm195_vm1, %v10426_v0 }
  0xd5   : > { %v1248_v23 = vsel %vm1188_vm4, %v10447_v8, %v1247_v62  ;;  %v10494_v62 = vsel %vm1188_vm4, %v1254_v32, %v10481_v9  ;;  %v10498_v8 = vrot.slane %v10041_v26, 2  ;;  %v1264_v32 = vrot.slane %v10062_v5, 2 }
  0xd7   : > { %8211 = vmatmul.mubr.msk.f32.gmra.mrb[18].mxu0 %vm195_vm1, %v1238_v18  ;;  %8661 = vmatmul.mubr.msk.f32.gmra.mrb[18].mxu1 %vm195_vm1, %v1238_v18  ;;  %v1252_v18 = vrot.slane %v10014_v52, 2 }
  0xd8   : > { %8213 = vmatprep.mubr.msk.f32.mxu0 %vm195_vm1, %v10443_v10  ;;  %8663 = vmatprep.mubr.msk.f32.mxu1 %vm195_vm1, %v10443_v10 }
  0xd9   : > { %v1253_v52 = vsel %vm1188_vm4, %v10464_v13, %v1252_v18  ;;  %v10511_v18 = vsel %vm1188_vm4, %v1259_v17, %v10498_v8  ;;  %v10515_v13 = vrot.slane %v10064_v56, 2 }
  0xdb   : > { %8214 = vmatmul.mubr.msk.f32.gmra.mrb[20].mxu0 %vm195_vm1, %v1243_v33  ;;  %8664 = vmatmul.mubr.msk.f32.gmra.mrb[20].mxu1 %vm195_vm1, %v1243_v33  ;;  %v1257_v33 = vrot.slane %v10037_v24, 2 }
  0xdc   : > { %8216 = vmatprep.mubr.msk.f32.mxu0 %vm195_vm1, %v10460_v29  ;;  %8666 = vmatprep.mubr.msk.f32.mxu1 %vm195_vm1, %v10460_v29 }
  0xdd   : > { %v1258_v24 = vsel %vm1188_vm4, %v10481_v9, %v1257_v33  ;;  %v10528_v33 = vsel %vm1188_vm4, %v1264_v32, %v10515_v13  ;;  %v10786_v32 = vld [vmem:[#allocation2 + $0xe8] sm:$0x3] }
  0xdf   : > { %8217 = vmatmul.mubr.msk.f32.gmra.mrb[22].mxu0 %vm195_vm1, %v1248_v23  ;;  %8667 = vmatmul.mubr.msk.f32.gmra.mrb[22].mxu1 %vm195_vm1, %v1248_v23  ;;  %v1262_v23 = vrot.slane %v10060_v59, 2 }
  0xe0   : > { %8219 = vmatprep.mubr.msk.f32.mxu0 %vm195_vm1, %v10477_v41  ;;  %8669 = vmatprep.mubr.msk.f32.mxu1 %vm195_vm1, %v10477_v41 }
  0xe1   : > { %v1263_v59 = vsel %vm1188_vm4, %v10498_v8, %v1262_v23 }
  0xe3   : > { %8220 = vmatmul.mubr.msk.f32.gmra.mrb[24].mxu0 %vm195_vm1, %v1253_v52  ;;  %8670 = vmatmul.mubr.msk.f32.gmra.mrb[24].mxu1 %vm195_vm1, %v1253_v52  ;;  %v1267_v52 = vrot.slane %v10083_v25, 2  ;;  %v10551_v25 = vld [vmem:[%s11869_s1 + $0x14] sm:$0xf] }
  0xe4   : > { %8222 = vmatprep.mubr.msk.f32.mxu0 %vm195_vm1, %v10494_v62  ;;  %8672 = vmatprep.mubr.msk.f32.mxu1 %vm195_vm1, %v10494_v62 }
  0xe5   : > { %v1268_v17 = vsel %vm1188_vm4, %v10515_v13, %v1267_v52  ;;  %v11965_v52 = vld [vmem:[#allocation13_spill] sm:$0xff] }
  0xe7   : > { %8223 = vmatmul.mubr.msk.f32.gmra.mrb[26].mxu0 %vm195_vm1, %v1258_v24  ;;  %8673 = vmatmul.mubr.msk.f32.gmra.mrb[26].mxu1 %vm195_vm1, %v1258_v24  ;;  %v10556_v24 = vld [vmem:[%s11869_s1 + $0x38] sm:$0xf] }
  0xe8   : > { %8225 = vmatprep.mubr.msk.f32.mxu0 %vm195_vm1, %v10511_v18  ;;  %8675 = vmatprep.mubr.msk.f32.mxu1 %vm195_vm1, %v10511_v18 }
  0xeb   : > { %8226 = vmatmul.mubr.msk.f32.gmra.mrb[28].mxu0 %vm195_vm1, %v1263_v59  ;;  %8676 = vmatmul.mubr.msk.f32.gmra.mrb[28].mxu1 %vm195_vm1, %v1263_v59  ;;  %v11964_v59 = vld [vmem:[#allocation14_spill] sm:$0xff] }
  0xec   : > { %8228 = vmatprep.mubr.msk.f32.mxu0 %vm195_vm1, %v10528_v33  ;;  %8678 = vmatprep.mubr.msk.f32.mxu1 %vm195_vm1, %v10528_v33 }
  0xef   : > { %8229 = vmatmul.mubr.msk.f32.gmra.mrb[30].mxu0 %vm195_vm1, %v1268_v17  ;;  %8679 = vmatmul.mubr.msk.f32.gmra.mrb[30].mxu1 %vm195_vm1, %v1268_v17 }
  0xf0   : > { %8233 = vmatprep.mubr.msk.f32.mxu0 %vm195_vm1, %v9738_v36  ;;  %8683 = vmatprep.mubr.msk.f32.mxu1 %vm195_vm1, %v9738_v36  ;;  %v10674_v36 = vld [vmem:[#allocation2 + $0x180] sm:$0xff] }
  0xf3   : > { %8234 = vmatmul.mubr.msk.f32.vlgmr.msra.gmra.mrb[0].mxu0 %vm195_vm1, %v9740_v37  ;;  %8684 = vmatmul.mubr.msk.f32.vlgmr.msra.gmra.mrb[0].mxu1 %vm195_vm1, %v9740_v37  ;;  %v10676_v37 = vld [vmem:[#allocation2 + $0x28] sm:$0x3] }
  0xf4   : > { %8282 = vmatpush3.msk.msra.mxu0 %vm667_vm0, %v10283_v20  ;;  %8732 = vmatpush3.msk.msra.mxu1 %vm667_vm0, %v10288_v38  ;;  %v11963_v20 = vld [vmem:[#allocation11_spill] sm:$0xff] }
  0xf5   : > { %8236 = vmatprep.mubr.msk.f32.mxu0 %vm195_vm1, %v9756_v42  ;;  %8686 = vmatprep.mubr.msk.f32.mxu1 %vm195_vm1, %v9756_v42  ;;  %v10686_v42 = vld [vmem:[#allocation2 + $0x188] sm:$0xff] }
  0xf6   : > { %8331 = vmatprep.subr.msk.mxu0 %vm667_vm0, %v10551_v25  ;;  %8781 = vmatprep.subr.msk.mxu1 %vm667_vm0, %v10556_v24 }
  0xf7   : > { %8237 = vmatmul.mubr.msk.f32.gmra.mrb[2].mxu0 %vm195_vm1, %v9758_v43  ;;  %8687 = vmatmul.mubr.msk.f32.gmra.mrb[2].mxu1 %vm195_vm1, %v9758_v43  ;;  %v1972_v43 = vrot.slane %v10676_v37, 1 }
  0xf8   : > { %8239 = vmatprep.mubr.msk.f32.mxu0 %vm195_vm1, %v9767_v48  ;;  %8689 = vmatprep.mubr.msk.f32.mxu1 %vm195_vm1, %v9767_v48  ;;  %v10689_v48 = vld [vmem:[#allocation2 + $0x40] sm:$0x3] }
  0xfb   : > { %8240 = vmatmul.mubr.msk.f32.gmra.mrb[4].mxu0 %vm195_vm1, %v9769_v49  ;;  %8690 = vmatmul.mubr.msk.f32.gmra.mrb[4].mxu1 %vm195_vm1, %v9769_v49  ;;  %v1973_v49 = vsel %vm519_vm3, %v9753_v40, %v1972_v43  ;;  %v11966_v43 = vld [vmem:[#allocation16_spill] sm:$0xff] }
  0xfc   : > { %8242 = vmatprep.mubr.msk.f32.mxu0 %vm195_vm1, %v9793_v57  ;;  %8692 = vmatprep.mubr.msk.f32.mxu1 %vm195_vm1, %v9793_v57  ;;  %v10702_v57 = vld [vmem:[#allocation2 + $0x58] sm:$0x3] }
  0xff   : > { %8243 = vmatmul.mubr.msk.f32.gmra.mrb[6].mxu0 %vm195_vm1, %v9795_v58  ;;  %8693 = vmatmul.mubr.msk.f32.gmra.mrb[6].mxu1 %vm195_vm1, %v9795_v58  ;;  %v10709_v58 = vld [vmem:[%s11869_s1 + $0x18] sm:$0xf] }
 0x100   : > { %8245 = vmatprep.mubr.msk.f32.mxu0 %vm195_vm1, %v9816_v1  ;;  %8695 = vmatprep.mubr.msk.f32.mxu1 %vm195_vm1, %v9816_v1  ;;  %v1982_v1 = vrot.slane %v10702_v57, 1 }
 0x103   : > { %8246 = vmatmul.mubr.msk.f32.gmra.mrb[8].mxu0 %vm195_vm1, %v9818_v2  ;;  %8696 = vmatmul.mubr.msk.f32.gmra.mrb[8].mxu1 %vm195_vm1, %v9818_v2  ;;  %v10727_v2 = vld [vmem:[#allocation2 + $0x70] sm:$0x3] }
 0x104   : > { %8248 = vmatprep.mubr.msk.f32.mxu0 %vm195_vm1, %v9839_v11  ;;  %8698 = vmatprep.mubr.msk.f32.mxu1 %vm195_vm1, %v9839_v11  ;;  %v10742_v11 = vld [vmem:[#allocation2 + $0x88] sm:$0x3] }
 0x107   : > { %8249 = vmatmul.mubr.msk.f32.gmra.mrb[10].mxu0 %vm195_vm1, %v9841_v12  ;;  %8699 = vmatmul.mubr.msk.f32.gmra.mrb[10].mxu1 %vm195_vm1, %v9841_v12  ;;  %v11956_v12 = vld [vmem:[#allocation6_spill] sm:$0xff] }
 0x108   : > { %8251 = vmatprep.mubr.msk.f32.mxu0 %vm195_vm1, %v9878_v30  ;;  %8701 = vmatprep.mubr.msk.f32.mxu1 %vm195_vm1, %v9878_v30  ;;  %v1992_v30 = vrot.slane %v10742_v11, 1 }
 0x10b   : > { %8252 = vmatmul.mubr.msk.f32.gmra.mrb[12].mxu0 %vm195_vm1, %v9880_v31  ;;  %8702 = vmatmul.mubr.msk.f32.gmra.mrb[12].mxu1 %vm195_vm1, %v9880_v31  ;;  %v10753_v31 = vld [vmem:[#allocation2 + $0xa0] sm:$0x3] }
 0x10c   : > { %8254 = vmatprep.mubr.msk.f32.mxu0 %vm195_vm1, %v9901_v44  ;;  %8704 = vmatprep.mubr.msk.f32.mxu1 %vm195_vm1, %v9901_v44  ;;  %v11958_v44 = vld [vmem:[#allocation8_spill] sm:$0xff] }
 0x10f   : > { %8255 = vmatmul.mubr.msk.f32.gmra.mrb[14].mxu0 %vm195_vm1, %v9903_v45  ;;  %8705 = vmatmul.mubr.msk.f32.gmra.mrb[14].mxu1 %vm195_vm1, %v9903_v45  ;;  %v11959_v45 = vld [vmem:[#allocation7_spill] sm:$0xff] }
 0x110   : > { %8257 = vmatprep.mubr.msk.f32.mxu0 %vm195_vm1, %v9924_v3  ;;  %8707 = vmatprep.mubr.msk.f32.mxu1 %vm195_vm1, %v9924_v3  ;;  %v10764_v3 = vld [vmem:[#allocation2 + $0xb8] sm:$0x3] }
 0x113   : > { %8258 = vmatmul.mubr.msk.f32.gmra.mrb[16].mxu0 %vm195_vm1, %v9926_v4  ;;  %8708 = vmatmul.mubr.msk.f32.gmra.mrb[16].mxu1 %vm195_vm1, %v9926_v4  ;;  %v11960_v4 = vld [vmem:[#allocation10_spill] sm:$0xff] }
 0x114   : > { %8260 = vmatprep.mubr.msk.f32.mxu0 %vm195_vm1, %v9947_v19  ;;  %8710 = vmatprep.mubr.msk.f32.mxu1 %vm195_vm1, %v9947_v19 }
 0x117   : > { %8261 = vmatmul.mubr.msk.f32.gmra.mrb[18].mxu0 %vm195_vm1, %v9949_v22  ;;  %8711 = vmatmul.mubr.msk.f32.gmra.mrb[18].mxu1 %vm195_vm1, %v9949_v22  ;;  %v2002_v22 = vrot.slane %v10764_v3, 1 }
 0x118   : > { %8263 = vmatprep.mubr.msk.f32.mxu0 %vm195_vm1, %v9970_v35  ;;  %8713 = vmatprep.mubr.msk.f32.mxu1 %vm195_vm1, %v9970_v35  ;;  %v10775_v35 = vld [vmem:[#allocation2 + $0xd0] sm:$0x3] }
 0x119   : > { %v2003_v38 = vsel %vm519_vm3, %v11963_v20, %v2002_v22  ;;  %v2007_v23 = vrot.slane %v10775_v35, 1  ;;  %v11974_v22 = vld [vmem:[#allocation23_spill] sm:$0xff] }
 0x11b   : > { %8264 = vmatmul.mubr.msk.f32.gmra.mrb[20].mxu0 %vm195_vm1, %v9972_v51  ;;  %8714 = vmatmul.mubr.msk.f32.gmra.mrb[20].mxu1 %vm195_vm1, %v9972_v51  ;;  %v11962_v51 = vld [vmem:[#allocation12_spill] sm:$0xff]  ;;  %v2008_v17 = vsel %vm519_vm3, %v11965_v52, %v2007_v23  ;;  %v10865_v52 = vrot.slane %v10686_v42, 1 }
 0x11c   : > { %8266 = vmatprep.mubr.msk.f32.mxu0 %vm195_vm1, %v9993_v60  ;;  %8716 = vmatprep.mubr.msk.f32.mxu1 %vm195_vm1, %v9993_v60  ;;  %v1997_v60 = vrot.slane %v10753_v31, 1 }
 0x11f   : > { %8267 = vmatmul.mubr.msk.f32.gmra.mrb[22].mxu0 %vm195_vm1, %v9995_v15  ;;  %8717 = vmatmul.mubr.msk.f32.gmra.mrb[22].mxu1 %vm195_vm1, %v9995_v15  ;;  %v11961_v15 = vld [vmem:[#allocation9_spill] sm:$0xff] }
 0x120   : > { %8269 = vmatprep.mubr.msk.f32.mxu0 %vm195_vm1, %v10016_v53  ;;  %8719 = vmatprep.mubr.msk.f32.mxu1 %vm195_vm1, %v10016_v53  ;;  %v1993_v53 = vsel %vm519_vm3, %v11959_v45, %v1992_v30  ;;  %v1998_v19 = vsel %vm519_vm3, %v11961_v15, %v1997_v60  ;;  %v10830_v45 = vld [vmem:[#allocation2 + $0x148] sm:$0x3]  ;;  %v11973_v60 = vld [vmem:[#allocation21_spill] sm:$0xff] }
 0x121   : > { %v2032_v15 = vrot.slane %v10830_v45, 1 }
 0x123   : > { %8270 = vmatmul.mubr.msk.f32.gmra.mrb[24].mxu0 %vm195_vm1, %v10018_v28  ;;  %8720 = vmatmul.mubr.msk.f32.gmra.mrb[24].mxu1 %vm195_vm1, %v10018_v28 }
 0x124   : > { %8272 = vmatprep.mubr.msk.f32.mxu0 %vm195_vm1, %v10039_v7  ;;  %8722 = vmatprep.mubr.msk.f32.mxu1 %vm195_vm1, %v10039_v7  ;;  %v1987_v7 = vrot.slane %v10727_v2, 1 }
 0x127   : > { %8273 = vmatmul.mubr.msk.f32.gmra.mrb[26].mxu0 %vm195_vm1, %v10041_v26  ;;  %8723 = vmatmul.mubr.msk.f32.gmra.mrb[26].mxu1 %vm195_vm1, %v10041_v26  ;;  %v11957_v26 = vld [vmem:[#allocation5_spill] sm:$0xff] }
 0x128   : > { %8275 = vmatprep.mubr.msk.f32.mxu0 %vm195_vm1, %v10062_v5  ;;  %8725 = vmatprep.mubr.msk.f32.mxu1 %vm195_vm1, %v10062_v5  ;;  %v11955_v5 = vld [vmem:[#allocation3_spill] sm:$0xff]  ;;  %v1988_v28 = vsel %vm519_vm3, %v11957_v26, %v1987_v7  ;;  %v11970_v26 = vld [vmem:[#allocation20_spill] sm:$0xff] }
 0x12b   : > { %8276 = vmatmul.mubr.msk.f32.gmra.mrb[28].mxu0 %vm195_vm1, %v10064_v56  ;;  %8726 = vmatmul.mubr.msk.f32.gmra.mrb[28].mxu1 %vm195_vm1, %v10064_v56  ;;  %v1977_v56 = vrot.slane %v10689_v48, 1 }
 0x12c   : > { %8278 = vmatprep.mubr.msk.f32.mxu0 %vm195_vm1, %v10674_v36  ;;  %8728 = vmatprep.mubr.msk.f32.mxu1 %vm195_vm1, %v10674_v36 }
 0x12d   : > { %v1978_v40 = vsel %vm519_vm3, %v9763_v46, %v1977_v56  ;;  %v11954_v46 = vld [vmem:[#allocation4_spill] sm:$0xff] }
 0x12f   : > { %8279 = vmatmul.mubr.msk.f32.gmra.mrb[30].mxu0 %vm195_vm1, %v10686_v42  ;;  %8729 = vmatmul.mubr.msk.f32.gmra.mrb[30].mxu1 %vm195_vm1, %v10686_v42 }
 0x130   : > { %8283 = vmatprep.mubr.msk.f32.mxu0 %vm195_vm1, %v9774_v50  ;;  %8733 = vmatprep.mubr.msk.f32.mxu1 %vm195_vm1, %v9774_v50  ;;  %v10714_v50 = vld [vmem:[%s11869_s1 + $0x3c] sm:$0xf] }
 0x133   : > { %8284 = vmatmul.mubr.msk.f32.vlgmr.msra.gmra.mrb[0].mxu0 %vm195_vm1, %v1973_v49  ;;  %8734 = vmatmul.mubr.msk.f32.vlgmr.msra.gmra.mrb[0].mxu1 %vm195_vm1, %v1973_v49  ;;  %v11967_v49 = vld [vmem:[#allocation15_spill] sm:$0xff] }
 0x134   : > { %8332 = vmatpush3.msk.msra.mxu0 %vm667_vm0, %v10551_v25  ;;  %8782 = vmatpush3.msk.msra.mxu1 %vm667_vm0, %v10556_v24  ;;  %v2012_v25 = vrot.slane %v10786_v32, 1  ;;  %v10797_v24 = vld [vmem:[#allocation2 + $0x100] sm:$0x3] }
 0x135   : > { %8286 = vmatprep.mubr.msk.f32.mxu0 %vm195_vm1, %v9788_v55  ;;  %8736 = vmatprep.mubr.msk.f32.mxu1 %vm195_vm1, %v9788_v55  ;;  %v1983_v55 = vsel %vm519_vm3, %v11955_v5, %v1982_v1  ;;  %v10808_v1 = vld [vmem:[#allocation2 + $0x118] sm:$0x3]  ;;  %v11969_v5 = vld [vmem:[#allocation17_spill] sm:$0xff] }
 0x136   : > { %8381 = vmatprep.subr.msk.mxu0 %vm667_vm0, %v10709_v58  ;;  %8831 = vmatprep.subr.msk.mxu1 %vm667_vm0, %v10714_v50  ;;  %v2013_v56 = vsel %vm519_vm3, %v11967_v49, %v2012_v25  ;;  %v2022_v7 = vrot.slane %v10808_v1, 1  ;;  %v11975_v25 = vld [vmem:[#allocation25_spill] sm:$0xff] }
 0x137   : > { %8287 = vmatmul.mubr.msk.f32.gmra.mrb[2].mxu0 %vm195_vm1, %v1978_v40  ;;  %8737 = vmatmul.mubr.msk.f32.gmra.mrb[2].mxu1 %vm195_vm1, %v1978_v40  ;;  %v2017_v40 = vrot.slane %v10797_v24, 1 }
 0x138   : > { %8289 = vmatprep.mubr.msk.f32.mxu0 %vm195_vm1, %v11954_v46  ;;  %8739 = vmatprep.mubr.msk.f32.mxu1 %vm195_vm1, %v11954_v46  ;;  %v11968_v46 = vld [vmem:[#allocation18_spill] sm:$0xff] }
 0x13b   : > { %8290 = vmatmul.mubr.msk.f32.gmra.mrb[4].mxu0 %vm195_vm1, %v1983_v55  ;;  %8740 = vmatmul.mubr.msk.f32.gmra.mrb[4].mxu1 %vm195_vm1, %v1983_v55  ;;  %v2018_v55 = vsel %vm519_vm3, %v11969_v5, %v2017_v40  ;;  %v2378_v40 = vrot.slane %v10676_v37, 2  ;;  %v10905_v37 = vld [vmem:[%s11869_s1 + $0x1c] sm:$0xf] }
 0x13c   : > { %8292 = vmatprep.mubr.msk.f32.mxu0 %vm195_vm1, %v11956_v12  ;;  %8742 = vmatprep.mubr.msk.f32.mxu1 %vm195_vm1, %v11956_v12  ;;  %v10819_v12 = vld [vmem:[#allocation2 + $0x130] sm:$0x3] }
 0x13f   : > { %8293 = vmatmul.mubr.msk.f32.gmra.mrb[6].mxu0 %vm195_vm1, %v1988_v28  ;;  %8743 = vmatmul.mubr.msk.f32.gmra.mrb[6].mxu1 %vm195_vm1, %v1988_v28  ;;  %v11971_v28 = vld [vmem:[#allocation19_spill] sm:$0xff] }
 0x140   : > { %8295 = vmatprep.mubr.msk.f32.mxu0 %vm195_vm1, %v11958_v44  ;;  %8745 = vmatprep.mubr.msk.f32.mxu1 %vm195_vm1, %v11958_v44  ;;  %v2023_v30 = vsel %vm519_vm3, %v11971_v28, %v2022_v7  ;;  %v2027_v44 = vrot.slane %v10819_v12, 1  ;;  %v10910_v7 = vld [vmem:[%s11869_s1 + $0x40] sm:$0xf] }
 0x143   : > { %8296 = vmatmul.mubr.msk.f32.gmra.mrb[8].mxu0 %vm195_vm1, %v1993_v53  ;;  %8746 = vmatmul.mubr.msk.f32.gmra.mrb[8].mxu1 %vm195_vm1, %v1993_v53  ;;  %v11972_v53 = vld [vmem:[#allocation22_spill] sm:$0xff] }
 0x144   : > { %8298 = vmatprep.mubr.msk.f32.mxu0 %vm195_vm1, %v11960_v4  ;;  %8748 = vmatprep.mubr.msk.f32.mxu1 %vm195_vm1, %v11960_v4  ;;  %v2028_v4 = vsel %vm519_vm3, %v11973_v60, %v2027_v44 }
 0x147   : > { %8299 = vmatmul.mubr.msk.f32.gmra.mrb[10].mxu0 %vm195_vm1, %v1998_v19  ;;  %8749 = vmatmul.mubr.msk.f32.gmra.mrb[10].mxu1 %vm195_vm1, %v1998_v19  ;;  %v10841_v19 = vld [vmem:[#allocation2 + $0x160] sm:$0x3] }
 0x148   : > { %8301 = vmatprep.mubr.msk.f32.mxu0 %vm195_vm1, %v11962_v51  ;;  %8751 = vmatprep.mubr.msk.f32.mxu1 %vm195_vm1, %v11962_v51  ;;  %v2033_v51 = vsel %vm519_vm3, %v11974_v22, %v2032_v15  ;;  %v2037_v20 = vrot.slane %v10841_v19, 1 }
 0x14b   : > { %8302 = vmatmul.mubr.msk.f32.gmra.mrb[12].mxu0 %vm195_vm1, %v2003_v38  ;;  %8752 = vmatmul.mubr.msk.f32.gmra.mrb[12].mxu1 %vm195_vm1, %v2003_v38  ;;  %v10852_v38 = vld [vmem:[#allocation2 + $0x178] sm:$0x3] }
 0x14c   : > { %8304 = vmatprep.mubr.msk.f32.mxu0 %vm195_vm1, %v11964_v59  ;;  %8754 = vmatprep.mubr.msk.f32.mxu1 %vm195_vm1, %v11964_v59  ;;  %v2042_v23 = vrot.slane %v10852_v38, 1  ;;  %v2044_v59 = vrot.slane %v10674_v36, 1 }
 0x14e   : > { %v10880_v49 = vsel %vm519_vm3, %v2044_v59, %v10865_v52  ;;  %v11084_v59 = vld [vmem:[%s11869_s1 + $0x44] sm:$0xf] }
 0x14f   : > { %8305 = vmatmul.mubr.msk.f32.gmra.mrb[14].mxu0 %vm195_vm1, %v2008_v17  ;;  %8755 = vmatmul.mubr.msk.f32.gmra.mrb[14].mxu1 %vm195_vm1, %v2008_v17  ;;  %v10867_v17 = vld [vmem:[#allocation2 + $0x190] sm:$0x3] }
 0x150   : > { %8307 = vmatprep.mubr.msk.f32.mxu0 %vm195_vm1, %v11966_v43  ;;  %8757 = vmatprep.mubr.msk.f32.mxu1 %vm195_vm1, %v11966_v43  ;;  %v2047_v43 = vrot.slane %v10867_v17, 1 }
 0x153   : > { %8308 = vmatmul.mubr.msk.f32.gmra.mrb[16].mxu0 %vm195_vm1, %v2013_v56  ;;  %8758 = vmatmul.mubr.msk.f32.gmra.mrb[16].mxu1 %vm195_vm1, %v2013_v56  ;;  %v2048_v56 = vsel %vm519_vm3, %v10865_v52, %v2047_v43  ;;  %v11122_v43 = vld [vmem:[#allocation2 + $0x80] sm:$0xff] }
 0x154   : > { %8310 = vmatprep.mubr.msk.f32.mxu0 %vm195_vm1, %v11968_v46  ;;  %8760 = vmatprep.mubr.msk.f32.mxu1 %vm195_vm1, %v11968_v46  ;;  %v11977_v46 = vld [vmem:[#allocation26_spill] sm:$0xff] }
 0x155   : > { %v2379_v5 = vsel %vm1188_vm4, %v11977_v46, %v2378_v40  ;;  %v11134_v40 = vld [vmem:[#allocation2 + $0x98] sm:$0xff]  ;;  %v11136_v46 = vld [vmem:[#allocation2 + $0xa8] sm:$0xff] }
 0x157   : > { %8311 = vmatmul.mubr.msk.f32.gmra.mrb[18].mxu0 %vm195_vm1, %v2018_v55  ;;  %8761 = vmatmul.mubr.msk.f32.gmra.mrb[18].mxu1 %vm195_vm1, %v2018_v55  ;;  %v2383_v55 = vrot.slane %v10689_v48, 2  ;;  %v2388_v48 = vrot.slane %v10702_v57, 2 }
 0x158   : > { %8313 = vmatprep.mubr.msk.f32.mxu0 %vm195_vm1, %v11970_v26  ;;  %8763 = vmatprep.mubr.msk.f32.mxu1 %vm195_vm1, %v11970_v26  ;;  %v11978_v26 = vld [vmem:[#allocation27_spill] sm:$0xff] }
 0x15b   : > { %8314 = vmatmul.mubr.msk.f32.gmra.mrb[20].mxu0 %vm195_vm1, %v2023_v30  ;;  %8764 = vmatmul.mubr.msk.f32.gmra.mrb[20].mxu1 %vm195_vm1, %v2023_v30 }
 0x15c   : > { %8316 = vmatprep.mubr.msk.f32.mxu0 %vm195_vm1, %v11972_v53  ;;  %8766 = vmatprep.mubr.msk.f32.mxu1 %vm195_vm1, %v11972_v53 }
 0x15f   : > { %8317 = vmatmul.mubr.msk.f32.gmra.mrb[22].mxu0 %vm195_vm1, %v2028_v4  ;;  %8767 = vmatmul.mubr.msk.f32.gmra.mrb[22].mxu1 %vm195_vm1, %v2028_v4 }
 0x160   : > { %8319 = vmatprep.mubr.msk.f32.mxu0 %vm195_vm1, %v10054_v16  ;;  %8769 = vmatprep.mubr.msk.f32.mxu1 %vm195_vm1, %v10054_v16  ;;  %v2038_v16 = vsel %vm519_vm3, %v10058_v63, %v2037_v20  ;;  %v11976_v63 = vld [vmem:[#allocation24_spill] sm:$0xff]  ;;  %v2450_v20 = vrot.slane %v10674_v36, 2 }
 0x163   : > { %8320 = vmatmul.mubr.msk.f32.gmra.mrb[24].mxu0 %vm195_vm1, %v2033_v51  ;;  %8770 = vmatmul.mubr.msk.f32.gmra.mrb[24].mxu1 %vm195_vm1, %v2033_v51 }
 0x164   : > { %8322 = vmatprep.mubr.msk.f32.mxu0 %vm195_vm1, %v10077_v39  ;;  %8772 = vmatprep.mubr.msk.f32.mxu1 %vm195_vm1, %v10077_v39  ;;  %v2043_v39 = vsel %vm519_vm3, %v11976_v63, %v2042_v23  ;;  %v11079_v23 = vld [vmem:[%s11869_s1 + $0x20] sm:$0xf]  ;;  %v11110_v63 = vld [vmem:[#allocation2 + $0x68] sm:$0xff] }
 0x167   : > { %8323 = vmatmul.mubr.msk.f32.gmra.mrb[26].mxu0 %vm195_vm1, %v2038_v16  ;;  %8773 = vmatmul.mubr.msk.f32.gmra.mrb[26].mxu1 %vm195_vm1, %v2038_v16  ;;  %v11070_v16 = vld [vmem:[#allocation2 + $0x48] sm:$0xff] }
 0x168   : > { %8325 = vmatprep.mubr.msk.f32.mxu0 %vm195_vm1, %v11975_v25  ;;  %8775 = vmatprep.mubr.msk.f32.mxu1 %vm195_vm1, %v11975_v25  ;;  %v11096_v25 = vld [vmem:[#allocation2 + $0x60] sm:$0xff] }
 0x16b   : > { %8326 = vmatmul.mubr.msk.f32.gmra.mrb[28].mxu0 %vm195_vm1, %v2043_v39  ;;  %8776 = vmatmul.mubr.msk.f32.gmra.mrb[28].mxu1 %vm195_vm1, %v2043_v39  ;;  %v11112_v39 = vld [vmem:[#allocation2 + $0x78] sm:$0xff] }
 0x16c   : > { %8328 = vmatprep.mubr.msk.f32.mxu0 %vm195_vm1, %v10880_v49  ;;  %8778 = vmatprep.mubr.msk.f32.mxu1 %vm195_vm1, %v10880_v49 }
 0x16f   : > { %8329 = vmatmul.mubr.msk.f32.gmra.mrb[30].mxu0 %vm195_vm1, %v2048_v56  ;;  %8779 = vmatmul.mubr.msk.f32.gmra.mrb[30].mxu1 %vm195_vm1, %v2048_v56  ;;  %v11124_v56 = vld [vmem:[#allocation2 + $0x90] sm:$0xff] }
 0x170   : > { %8333 = vmatprep.mubr.msk.f32.mxu0 %vm195_vm1, %v10276_v34  ;;  %8783 = vmatprep.mubr.msk.f32.mxu1 %vm195_vm1, %v10276_v34  ;;  %v2384_v34 = vsel %vm1188_vm4, %v10272_v61, %v2383_v55  ;;  %v11979_v61 = vld [vmem:[#allocation28_spill] sm:$0xff]  ;;  %v11148_v55 = vld [vmem:[#allocation2 + $0xc0] sm:$0xff] }
 0x171   : > { %v2389_v57 = vsel %vm1188_vm4, %v11979_v61, %v2388_v48  ;;  %v11172_v48 = vld [vmem:[#allocation2 + $0xf0] sm:$0xff]  ;;  %v11184_v61 = vld [vmem:[#allocation2 + $0x108] sm:$0xff] }
 0x173   : > { %8334 = vmatmul.mubr.msk.f32.vlgmr.msra.gmra.mrb[0].mxu0 %vm195_vm1, %v2379_v5  ;;  %8784 = vmatmul.mubr.msk.f32.vlgmr.msra.gmra.mrb[0].mxu1 %vm195_vm1, %v2379_v5  ;;  %v11146_v5 = vld [vmem:[#allocation2 + $0xb0] sm:$0xff] }
 0x174   : > { %8382 = vmatpush3.msk.msra.mxu0 %vm667_vm0, %v10709_v58  ;;  %8832 = vmatpush3.msk.msra.mxu1 %vm667_vm0, %v10714_v50  ;;  %v2393_v58 = vrot.slane %v10727_v2, 2  ;;  %v11980_v50 = vld [vmem:[#allocation29_spill] sm:$0xff]  ;;  %v11981_v2 = vld [vmem:[#allocation30_spill] sm:$0xff] }
 0x175   : > { %8336 = vmatprep.mubr.msk.f32.mxu0 %vm195_vm1, %v11978_v26  ;;  %8786 = vmatprep.mubr.msk.f32.mxu1 %vm195_vm1, %v11978_v26  ;;  %v11182_v26 = vld [vmem:[#allocation2 + $0xf8] sm:$0xff] }
 0x176   : > { %8431 = vmatprep.subr.msk.mxu0 %vm667_vm0, %v10905_v37  ;;  %8881 = vmatprep.subr.msk.mxu1 %vm667_vm0, %v10910_v7  ;;  %v2394_v28 = vsel %vm1188_vm4, %v11980_v50, %v2393_v58  ;;  %v11196_v58 = vld [vmem:[#allocation2 + $0x120] sm:$0xff]  ;;  %v11206_v50 = vld [vmem:[#allocation2 + $0x128] sm:$0xff] }
 0x177   : > { %8337 = vmatmul.mubr.msk.f32.gmra.mrb[2].mxu0 %vm195_vm1, %v2384_v34  ;;  %8787 = vmatmul.mubr.msk.f32.gmra.mrb[2].mxu1 %vm195_vm1, %v2384_v34  ;;  %v11170_v34 = vld [vmem:[#allocation2 + $0xe0] sm:$0xff] }
 0x178   : > { %8339 = vmatprep.mubr.msk.f32.mxu0 %vm195_vm1, %v10324_v21  ;;  %8789 = vmatprep.mubr.msk.f32.mxu1 %vm195_vm1, %v10324_v21  ;;  %v2398_v21 = vrot.slane %v10742_v11, 2  ;;  %v11982_v11 = vld [vmem:[#allocation31_spill] sm:$0xff] }
 0x17a   : > { %v2399_v30 = vsel %vm1188_vm4, %v11981_v2, %v2398_v21  ;;  %v11218_v21 = vld [vmem:[#allocation2 + $0x140] sm:$0xff]  ;;  %v11220_v2 = vld [vmem:[#allocation2 + $0x150] sm:$0xff] }
 0x17b   : > { %8340 = vmatmul.mubr.msk.f32.gmra.mrb[4].mxu0 %vm195_vm1, %v2389_v57  ;;  %8790 = vmatmul.mubr.msk.f32.gmra.mrb[4].mxu1 %vm195_vm1, %v2389_v57  ;;  %v11194_v57 = vld [vmem:[#allocation2 + $0x110] sm:$0xff] }
 0x17c   : > { %8342 = vmatprep.mubr.msk.f32.mxu0 %vm195_vm1, %v10341_v6  ;;  %8792 = vmatprep.mubr.msk.f32.mxu1 %vm195_vm1, %v10341_v6  ;;  %v2403_v6 = vrot.slane %v10753_v31, 2  ;;  %v11983_v31 = vld [vmem:[#allocation32_spill] sm:$0xff] }
 0x17e   : > { %v2404_v44 = vsel %vm1188_vm4, %v11982_v11, %v2403_v6  ;;  %v11232_v6 = vld [vmem:[#allocation2 + $0x168] sm:$0xff]  ;;  %v11242_v11 = vld [vmem:[#allocation2 + $0x170] sm:$0xff] }
 0x17f   : > { %8343 = vmatmul.mubr.msk.f32.gmra.mrb[6].mxu0 %vm195_vm1, %v2394_v28  ;;  %8793 = vmatmul.mubr.msk.f32.gmra.mrb[6].mxu1 %vm195_vm1, %v2394_v28  ;;  %v11208_v28 = vld [vmem:[#allocation2 + $0x138] sm:$0xff] }
 0x180   : > { %8345 = vmatprep.mubr.msk.f32.mxu0 %vm195_vm1, %v10358_v14  ;;  %8795 = vmatprep.mubr.msk.f32.mxu1 %vm195_vm1, %v10358_v14  ;;  %v2408_v14 = vrot.slane %v10764_v3, 2  ;;  %v11984_v3 = vld [vmem:[#allocation33_spill] sm:$0xff] }
 0x182   : > { %v2409_v53 = vsel %vm1188_vm4, %v11983_v31, %v2408_v14  ;;  %v11253_v14 = vld [vmem:[#allocation2 + $0x198] sm:$0xff] }
 0x183   : > { %8346 = vmatmul.mubr.msk.f32.gmra.mrb[8].mxu0 %vm195_vm1, %v2399_v30  ;;  %8796 = vmatmul.mubr.msk.f32.gmra.mrb[8].mxu1 %vm195_vm1, %v2399_v30  ;;  %v11230_v30 = vld [vmem:[#allocation2 + $0x158] sm:$0xff] }
 0x184   : > { %8348 = vmatprep.mubr.msk.f32.mxu0 %vm195_vm1, %v10375_v27  ;;  %8798 = vmatprep.mubr.msk.f32.mxu1 %vm195_vm1, %v10375_v27  ;;  %v2413_v27 = vrot.slane %v10775_v35, 2  ;;  %v11985_v35 = vld [vmem:[#allocation34_spill] sm:$0xff] }
 0x186   : > { %v2414_v60 = vsel %vm1188_vm4, %v11984_v3, %v2413_v27 }
 0x187   : > { %8349 = vmatmul.mubr.msk.f32.gmra.mrb[10].mxu0 %vm195_vm1, %v2404_v44  ;;  %8799 = vmatmul.mubr.msk.f32.gmra.mrb[10].mxu1 %vm195_vm1, %v2404_v44 }
 0x188   : > { %8351 = vmatprep.mubr.msk.f32.mxu0 %vm195_vm1, %v10392_v47  ;;  %8801 = vmatprep.mubr.msk.f32.mxu1 %vm195_vm1, %v10392_v47  ;;  %v2418_v47 = vrot.slane %v10786_v32, 2  ;;  %v11986_v32 = vld [vmem:[#allocation35_spill] sm:$0xff] }
 0x18a   : > { %v2419_v4 = vsel %vm1188_vm4, %v11985_v35, %v2418_v47  ;;  %v3160_v47 = vrot.slane %v11070_v16, 1 }
 0x18b   : > { %8352 = vmatmul.mubr.msk.f32.gmra.mrb[12].mxu0 %vm195_vm1, %v2409_v53  ;;  %8802 = vmatmul.mubr.msk.f32.gmra.mrb[12].mxu1 %vm195_vm1, %v2409_v53  ;;  %v11256_v53 = vld [vmem:[#allocation2 + $0x40] sm:$0x3] }
 0x18c   : > { %8354 = vmatprep.mubr.msk.f32.mxu0 %vm195_vm1, %v10409_v54  ;;  %8804 = vmatprep.mubr.msk.f32.mxu1 %vm195_vm1, %v10409_v54  ;;  %v2423_v54 = vrot.slane %v10797_v24, 2  ;;  %v11987_v24 = vld [vmem:[#allocation36_spill] sm:$0xff]  ;;  %v3158_v27 = vrot.slane %v11256_v53, 1 }
 0x18e   : > { %v2424_v15 = vsel %vm1188_vm4, %v11986_v32, %v2423_v54  ;;  %v3165_v54 = vrot.slane %v11096_v25, 1  ;;  %v3166_v32 = vrot.slane %v11110_v63, 1 }
 0x18f   : > { %8355 = vmatmul.mubr.msk.f32.gmra.mrb[14].mxu0 %vm195_vm1, %v2414_v60  ;;  %8805 = vmatmul.mubr.msk.f32.gmra.mrb[14].mxu1 %vm195_vm1, %v2414_v60  ;;  %v11270_v60 = vld [vmem:[#allocation2 + $0x58] sm:$0x3] }
 0x190   : > { %8357 = vmatprep.mubr.msk.f32.mxu0 %vm195_vm1, %v10426_v0  ;;  %8807 = vmatprep.mubr.msk.f32.mxu1 %vm195_vm1, %v10426_v0  ;;  %v2428_v0 = vrot.slane %v10808_v1, 2  ;;  %v11988_v1 = vld [vmem:[#allocation37_spill] sm:$0xff] }
 0x192   : > { %v2429_v22 = vsel %vm1188_vm4, %v11987_v24, %v2428_v0 }
 0x193   : > { %8358 = vmatmul.mubr.msk.f32.gmra.mrb[16].mxu0 %vm195_vm1, %v2419_v4  ;;  %8808 = vmatmul.mubr.msk.f32.gmra.mrb[16].mxu1 %vm195_vm1, %v2419_v4  ;;  %v3163_v4 = vrot.slane %v11270_v60, 1 }
 0x194   : > { %8360 = vmatprep.mubr.msk.f32.mxu0 %vm195_vm1, %v10443_v10  ;;  %8810 = vmatprep.mubr.msk.f32.mxu1 %vm195_vm1, %v10443_v10  ;;  %v2433_v10 = vrot.slane %v10819_v12, 2 }
 0x196   : > { %v2434_v51 = vsel %vm1188_vm4, %v11988_v1, %v2433_v10  ;;  %v3170_v10 = vrot.slane %v11112_v39, 1  ;;  %v3171_v1 = vrot.slane %v11122_v43, 1 }
 0x197   : > { %8361 = vmatmul.mubr.msk.f32.gmra.mrb[18].mxu0 %vm195_vm1, %v2424_v15  ;;  %8811 = vmatmul.mubr.msk.f32.gmra.mrb[18].mxu1 %vm195_vm1, %v2424_v15  ;;  %v11284_v15 = vld [vmem:[#allocation2 + $0x70] sm:$0x3] }
 0x198   : > { %8363 = vmatprep.mubr.msk.f32.mxu0 %vm195_vm1, %v10460_v29  ;;  %8813 = vmatprep.mubr.msk.f32.mxu1 %vm195_vm1, %v10460_v29  ;;  %v2438_v29 = vrot.slane %v10830_v45, 2 }
 0x19a   : > { %v2439_v12 = vsel %vm1188_vm4, %v10481_v9, %v2438_v29  ;;  %v11037_v9 = vrot.slane %v10686_v42, 2  ;;  %v11300_v29 = vld [vmem:[#allocation2 + $0x88] sm:$0x3] }
 0x19b   : > { %8364 = vmatmul.mubr.msk.f32.gmra.mrb[20].mxu0 %vm195_vm1, %v2429_v22  ;;  %8814 = vmatmul.mubr.msk.f32.gmra.mrb[20].mxu1 %vm195_vm1, %v2429_v22  ;;  %v3168_v22 = vrot.slane %v11284_v15, 1 }
 0x19c   : > { %8366 = vmatprep.mubr.msk.f32.mxu0 %vm195_vm1, %v10477_v41  ;;  %8816 = vmatprep.mubr.msk.f32.mxu1 %vm195_vm1, %v10477_v41  ;;  %v2443_v41 = vrot.slane %v10841_v19, 2  ;;  %v11050_v19 = vsel %vm1188_vm4, %v2450_v20, %v11037_v9  ;;  %v3172_v20 = vsel %vm519_vm3, %v3170_v10, %v3171_v1  ;;  %v11344_v10 = vld [vmem:[#allocation2 + $0xe8] sm:$0x3] }
 0x19e   : > { %v2444_v45 = vsel %vm1188_vm4, %v10498_v8, %v2443_v41  ;;  %v3173_v41 = vrot.slane %v11300_v29, 1 }
 0x19f   : > { %8367 = vmatmul.mubr.msk.f32.gmra.mrb[22].mxu0 %vm195_vm1, %v2434_v51  ;;  %8817 = vmatmul.mubr.msk.f32.gmra.mrb[22].mxu1 %vm195_vm1, %v2434_v51  ;;  %v3167_v51 = vsel %vm519_vm3, %v3165_v54, %v3166_v32 }
 0x1a0   : > { %8369 = vmatprep.mubr.msk.f32.mxu0 %vm195_vm1, %v10494_v62  ;;  %8819 = vmatprep.mubr.msk.f32.mxu1 %vm195_vm1, %v10494_v62  ;;  %v2448_v62 = vrot.slane %v10852_v38, 2  ;;  %v11068_v38 = vld [vmem:[#allocation2 + $0x38] sm:$0xff] }
 0x1a1   : > { %v3156_v31 = vrot.slane %v11068_v38, 1 }
 0x1a2   : > { %v2449_v8 = vsel %vm1188_vm4, %v10515_v13, %v2448_v62  ;;  %v11060_v13 = vld [vmem:[#allocation2 + $0x30] sm:$0xff]  ;;  %v3176_v62 = vrot.slane %v11134_v40, 1 }
 0x1a3   : > { %8370 = vmatmul.mubr.msk.f32.gmra.mrb[24].mxu0 %vm195_vm1, %v2439_v12  ;;  %8820 = vmatmul.mubr.msk.f32.gmra.mrb[24].mxu1 %vm195_vm1, %v2439_v12  ;;  %v3155_v44 = vrot.slane %v11060_v13, 1  ;;  %v3169_v12 = vsel %vm519_vm3, %v3166_v32, %v3168_v22 }
 0x1a4   : > { %8372 = vmatprep.mubr.msk.f32.mxu0 %vm195_vm1, %v10511_v18  ;;  %8822 = vmatprep.mubr.msk.f32.mxu1 %vm195_vm1, %v10511_v18  ;;  %v2453_v18 = vrot.slane %v10867_v17, 2  ;;  %v11090_v17 = vld [vmem:[#allocation2 + $0x50] sm:$0xff] }
 0x1a5   : > { %v3157_v3 = vsel %vm519_vm3, %v3155_v44, %v3156_v31  ;;  %v3161_v35 = vrot.slane %v11090_v17, 1 }
 0x1a7   : > { %8373 = vmatmul.mubr.msk.f32.gmra.mrb[26].mxu0 %vm195_vm1, %v2444_v45  ;;  %8823 = vmatmul.mubr.msk.f32.gmra.mrb[26].mxu1 %vm195_vm1, %v2444_v45  ;;  %v3162_v0 = vsel %vm519_vm3, %v3160_v47, %v3161_v35  ;;  %v3164_v24 = vsel %vm519_vm3, %v3161_v35, %v3163_v4  ;;  %v3175_v45 = vrot.slane %v11124_v56, 1  ;;  %v3185_v47 = vrot.slane %v11148_v55, 1  ;;  %v11333_v4 = vld [vmem:[#allocation2 + $0xd0] sm:$0x3] }
 0x1a8   : > { %8375 = vmatprep.mubr.msk.f32.mxu0 %vm195_vm1, %v10528_v33  ;;  %8825 = vmatprep.mubr.msk.f32.mxu1 %vm195_vm1, %v10528_v33  ;;  %v2454_v33 = vsel %vm1188_vm4, %v11037_v9, %v2453_v18  ;;  %v3174_v18 = vsel %vm519_vm3, %v3171_v1, %v3173_v41  ;;  %v3188_v32 = vrot.slane %v11333_v4, 1  ;;  %v3196_v41 = vrot.slane %v11182_v26, 1 }
 0x1a9   : > { %v3177_v44 = vsel %vm519_vm3, %v3175_v45, %v3176_v62 }
 0x1ab   : > { %8376 = vmatmul.mubr.msk.f32.gmra.mrb[28].mxu0 %vm195_vm1, %v2449_v8  ;;  %8826 = vmatmul.mubr.msk.f32.gmra.mrb[28].mxu1 %vm195_vm1, %v2449_v8  ;;  %v11311_v8 = vld [vmem:[#allocation2 + $0xa0] sm:$0x3] }
 0x1ac   : > { %8378 = vmatprep.mubr.msk.f32.mxu0 %vm195_vm1, %v11050_v19  ;;  %8828 = vmatprep.mubr.msk.f32.mxu1 %vm195_vm1, %v11050_v19 }
 0x1af   : > { %8379 = vmatmul.mubr.msk.f32.gmra.mrb[30].mxu0 %vm195_vm1, %v2454_v33  ;;  %8829 = vmatmul.mubr.msk.f32.gmra.mrb[30].mxu1 %vm195_vm1, %v2454_v33  ;;  %v3178_v33 = vrot.slane %v11311_v8, 1 }
 0x1b0   : > { %8383 = vmatprep.mubr.msk.f32.mxu0 %vm195_vm1, %v11060_v13  ;;  %8833 = vmatprep.mubr.msk.f32.mxu1 %vm195_vm1, %v11060_v13 }
 0x1b3   : > { %8384 = vmatmul.mubr.msk.f32.vlgmr.msra.gmra.mrb[0].mxu0 %vm195_vm1, %v11068_v38  ;;  %8834 = vmatmul.mubr.msk.f32.vlgmr.msra.gmra.mrb[0].mxu1 %vm195_vm1, %v11068_v38 }
 0x1b4   : > { %8432 = vmatpush3.msk.msra.mxu0 %vm667_vm0, %v10905_v37  ;;  %8882 = vmatpush3.msk.msra.mxu1 %vm667_vm0, %v10910_v7  ;;  %v11158_v37 = vld [vmem:[#allocation2 + $0xc8] sm:$0xff]  ;;  %v11160_v7 = vld [vmem:[#allocation2 + $0xd8] sm:$0xff] }
 0x1b5   : > { %8386 = vmatprep.mubr.msk.f32.mxu0 %vm195_vm1, %v11070_v16  ;;  %8836 = vmatprep.mubr.msk.f32.mxu1 %vm195_vm1, %v11070_v16  ;;  %v3186_v35 = vrot.slane %v11158_v37, 1 }
 0x1b6   : > { %8481 = vmatprep.subr.msk.mxu0 %vm667_vm0, %v11079_v23  ;;  %8931 = vmatprep.subr.msk.mxu1 %vm667_vm0, %v11084_v59 }
 0x1b7   : > { %8387 = vmatmul.mubr.msk.f32.gmra.mrb[2].mxu0 %vm195_vm1, %v11090_v17  ;;  %8837 = vmatmul.mubr.msk.f32.gmra.mrb[2].mxu1 %vm195_vm1, %v11090_v17  ;;  %v3187_v22 = vsel %vm519_vm3, %v3185_v47, %v3186_v35  ;;  %v3189_v1 = vsel %vm519_vm3, %v3186_v35, %v3188_v32  ;;  %v3205_v47 = vrot.slane %v11196_v58, 1  ;;  %v3206_v35 = vrot.slane %v11206_v50, 1 }
 0x1b8   : > { %8389 = vmatprep.mubr.msk.f32.mxu0 %vm195_vm1, %v11096_v25  ;;  %8839 = vmatprep.mubr.msk.f32.mxu1 %vm195_vm1, %v11096_v25 }
 0x1bb   : > { %8390 = vmatmul.mubr.msk.f32.gmra.mrb[4].mxu0 %vm195_vm1, %v11110_v63  ;;  %8840 = vmatmul.mubr.msk.f32.gmra.mrb[4].mxu1 %vm195_vm1, %v11110_v63 }
 0x1bc   : > { %8392 = vmatprep.mubr.msk.f32.mxu0 %vm195_vm1, %v11112_v39  ;;  %8842 = vmatprep.mubr.msk.f32.mxu1 %vm195_vm1, %v11112_v39 }
 0x1bf   : > { %8393 = vmatmul.mubr.msk.f32.gmra.mrb[6].mxu0 %vm195_vm1, %v11122_v43  ;;  %8843 = vmatmul.mubr.msk.f32.gmra.mrb[6].mxu1 %vm195_vm1, %v11122_v43 }
 0x1c0   : > { %8395 = vmatprep.mubr.msk.f32.mxu0 %vm195_vm1, %v11124_v56  ;;  %8845 = vmatprep.mubr.msk.f32.mxu1 %vm195_vm1, %v11124_v56 }
 0x1c3   : > { %8396 = vmatmul.mubr.msk.f32.gmra.mrb[8].mxu0 %vm195_vm1, %v11134_v40  ;;  %8846 = vmatmul.mubr.msk.f32.gmra.mrb[8].mxu1 %vm195_vm1, %v11134_v40 }
 0x1c4   : > { %8398 = vmatprep.mubr.msk.f32.mxu0 %vm195_vm1, %v11136_v46  ;;  %8848 = vmatprep.mubr.msk.f32.mxu1 %vm195_vm1, %v11136_v46 }
 0x1c7   : > { %8399 = vmatmul.mubr.msk.f32.gmra.mrb[10].mxu0 %vm195_vm1, %v11146_v5  ;;  %8849 = vmatmul.mubr.msk.f32.gmra.mrb[10].mxu1 %vm195_vm1, %v11146_v5 }
 0x1c8   : > { %8401 = vmatprep.mubr.msk.f32.mxu0 %vm195_vm1, %v11148_v55  ;;  %8851 = vmatprep.mubr.msk.f32.mxu1 %vm195_vm1, %v11148_v55 }
 0x1cb   : > { %8402 = vmatmul.mubr.msk.f32.gmra.mrb[12].mxu0 %vm195_vm1, %v11158_v37  ;;  %8852 = vmatmul.mubr.msk.f32.gmra.mrb[12].mxu1 %vm195_vm1, %v11158_v37 }
 0x1cc   : > { %8404 = vmatprep.mubr.msk.f32.mxu0 %vm195_vm1, %v11160_v7  ;;  %8854 = vmatprep.mubr.msk.f32.mxu1 %vm195_vm1, %v11160_v7 }
 0x1cf   : > { %8405 = vmatmul.mubr.msk.f32.gmra.mrb[14].mxu0 %vm195_vm1, %v11170_v34  ;;  %8855 = vmatmul.mubr.msk.f32.gmra.mrb[14].mxu1 %vm195_vm1, %v11170_v34 }
 0x1d0   : > { %8407 = vmatprep.mubr.msk.f32.mxu0 %vm195_vm1, %v11172_v48  ;;  %8857 = vmatprep.mubr.msk.f32.mxu1 %vm195_vm1, %v11172_v48 }
 0x1d3   : > { %8408 = vmatmul.mubr.msk.f32.gmra.mrb[16].mxu0 %vm195_vm1, %v11182_v26  ;;  %8858 = vmatmul.mubr.msk.f32.gmra.mrb[16].mxu1 %vm195_vm1, %v11182_v26 }
 0x1d4   : > { %8410 = vmatprep.mubr.msk.f32.mxu0 %vm195_vm1, %v11184_v61  ;;  %8860 = vmatprep.mubr.msk.f32.mxu1 %vm195_vm1, %v11184_v61 }
 0x1d7   : > { %8411 = vmatmul.mubr.msk.f32.gmra.mrb[18].mxu0 %vm195_vm1, %v11194_v57  ;;  %8861 = vmatmul.mubr.msk.f32.gmra.mrb[18].mxu1 %vm195_vm1, %v11194_v57 }
 0x1d8   : > { %8413 = vmatprep.mubr.msk.f32.mxu0 %vm195_vm1, %v11196_v58  ;;  %8863 = vmatprep.mubr.msk.f32.mxu1 %vm195_vm1, %v11196_v58 }
 0x1db   : > { %8414 = vmatmul.mubr.msk.f32.gmra.mrb[20].mxu0 %vm195_vm1, %v11206_v50  ;;  %8864 = vmatmul.mubr.msk.f32.gmra.mrb[20].mxu1 %vm195_vm1, %v11206_v50 }
 0x1dc   : > { %8416 = vmatprep.mubr.msk.f32.mxu0 %vm195_vm1, %v11208_v28  ;;  %8866 = vmatprep.mubr.msk.f32.mxu1 %vm195_vm1, %v11208_v28 }
 0x1df   : > { %8417 = vmatmul.mubr.msk.f32.gmra.mrb[22].mxu0 %vm195_vm1, %v11218_v21  ;;  %8867 = vmatmul.mubr.msk.f32.gmra.mrb[22].mxu1 %vm195_vm1, %v11218_v21 }
 0x1e0   : > { %8419 = vmatprep.mubr.msk.f32.mxu0 %vm195_vm1, %v11220_v2  ;;  %8869 = vmatprep.mubr.msk.f32.mxu1 %vm195_vm1, %v11220_v2 }
 0x1e3   : > { %8420 = vmatmul.mubr.msk.f32.gmra.mrb[24].mxu0 %vm195_vm1, %v11230_v30  ;;  %8870 = vmatmul.mubr.msk.f32.gmra.mrb[24].mxu1 %vm195_vm1, %v11230_v30 }
 0x1e4   : > { %8422 = vmatprep.mubr.msk.f32.mxu0 %vm195_vm1, %v11232_v6  ;;  %8872 = vmatprep.mubr.msk.f32.mxu1 %vm195_vm1, %v11232_v6 }
 0x1e7   : > { %8423 = vmatmul.mubr.msk.f32.gmra.mrb[26].mxu0 %vm195_vm1, %v11242_v11  ;;  %8873 = vmatmul.mubr.msk.f32.gmra.mrb[26].mxu1 %vm195_vm1, %v11242_v11 }
 0x1e8   : > { %8425 = vmatprep.mubr.msk.f32.mxu0 %vm195_vm1, %v10674_v36  ;;  %8875 = vmatprep.mubr.msk.f32.mxu1 %vm195_vm1, %v10674_v36  ;;  %v11266_v36 = vld [vmem:[#allocation2 + $0x1a0] sm:$0xff] }
 0x1eb   : > { %8426 = vmatmul.mubr.msk.f32.gmra.mrb[28].mxu0 %vm195_vm1, %v10686_v42  ;;  %8876 = vmatmul.mubr.msk.f32.gmra.mrb[28].mxu1 %vm195_vm1, %v10686_v42  ;;  %v3159_v42 = vsel %vm519_vm3, %v3156_v31, %v3158_v27  ;;  %v11322_v31 = vld [vmem:[#allocation2 + $0xb8] sm:$0x3]  ;;  %v3179_v27 = vsel %vm519_vm3, %v3176_v62, %v3178_v33  ;;  %v11355_v62 = vld [vmem:[#allocation2 + $0x100] sm:$0x3]  ;;  %v3200_v33 = vrot.slane %v11184_v61, 1 }
 0x1ec   : > { %8428 = vmatprep.mubr.msk.f32.mxu0 %vm195_vm1, %v11253_v14  ;;  %8878 = vmatprep.mubr.msk.f32.mxu1 %vm195_vm1, %v11253_v14 }
 0x1ef   : > { %8429 = vmatmul.mubr.msk.f32.gmra.mrb[30].mxu0 %vm195_vm1, %v11266_v36  ;;  %8879 = vmatmul.mubr.msk.f32.gmra.mrb[30].mxu1 %vm195_vm1, %v11266_v36 }
 0x1f0   : > { %8433 = vmatprep.mubr.msk.f32.mxu0 %vm195_vm1, %v3157_v3  ;;  %8883 = vmatprep.mubr.msk.f32.mxu1 %vm195_vm1, %v3157_v3  ;;  %v3183_v3 = vrot.slane %v11322_v31, 1 }
 0x1f3   : > { %8434 = vmatmul.mubr.msk.f32.vlgmr.msra.gmra.mrb[0].mxu0 %vm195_vm1, %v3159_v42  ;;  %8884 = vmatmul.mubr.msk.f32.vlgmr.msra.gmra.mrb[0].mxu1 %vm195_vm1, %v3159_v42 }
 0x1f4   : > { %8482 = vmatpush3.msk.msra.mxu0 %vm667_vm0, %v11079_v23  ;;  %8932 = vmatpush3.msk.msra.mxu1 %vm667_vm0, %v11084_v59  ;;  %v3180_v23 = vrot.slane %v11136_v46, 1  ;;  %v3181_v59 = vrot.slane %v11146_v5, 1 }
 0x1f5   : > { %8436 = vmatprep.mubr.msk.f32.mxu0 %vm195_vm1, %v3162_v0  ;;  %8886 = vmatprep.mubr.msk.f32.mxu1 %vm195_vm1, %v3162_v0  ;;  %v3190_v0 = vrot.slane %v11160_v7, 1 }
 0x1f6   : > { %v3182_v42 = vsel %vm519_vm3, %v3180_v23, %v3181_v59  ;;  %v3184_v54 = vsel %vm519_vm3, %v3181_v59, %v3183_v3  ;;  %v3201_v23 = vrot.slane %v11194_v57, 1 }
 0x1f7   : > { %8437 = vmatmul.mubr.msk.f32.gmra.mrb[2].mxu0 %vm195_vm1, %v3164_v24  ;;  %8887 = vmatmul.mubr.msk.f32.gmra.mrb[2].mxu1 %vm195_vm1, %v3164_v24  ;;  %v3191_v24 = vrot.slane %v11170_v34, 1 }
 0x1f8   : > { %8439 = vmatprep.mubr.msk.f32.mxu0 %vm195_vm1, %v3167_v51  ;;  %8889 = vmatprep.mubr.msk.f32.mxu1 %vm195_vm1, %v3167_v51  ;;  %v3193_v51 = vrot.slane %v11344_v10, 1 }
 0x1f9   : > { %v3192_v45 = vsel %vm519_vm3, %v3190_v0, %v3191_v24 }
 0x1fb   : > { %8440 = vmatmul.mubr.msk.f32.gmra.mrb[4].mxu0 %vm195_vm1, %v3169_v12  ;;  %8890 = vmatmul.mubr.msk.f32.gmra.mrb[4].mxu1 %vm195_vm1, %v3169_v12  ;;  %v3195_v12 = vrot.slane %v11172_v48, 1 }
 0x1fc   : > { %8442 = vmatprep.mubr.msk.f32.mxu0 %vm195_vm1, %v3172_v20  ;;  %8892 = vmatprep.mubr.msk.f32.mxu1 %vm195_vm1, %v3172_v20  ;;  %v3194_v20 = vsel %vm519_vm3, %v3191_v24, %v3193_v51  ;;  %v3210_v24 = vrot.slane %v11208_v28, 1  ;;  %v11388_v51 = vld [vmem:[#allocation2 + $0x148] sm:$0x3] }
 0x1fd   : > { %v3197_v59 = vsel %vm519_vm3, %v3195_v12, %v3196_v41 }
 0x1ff   : > { %8443 = vmatmul.mubr.msk.f32.gmra.mrb[6].mxu0 %vm195_vm1, %v3174_v18  ;;  %8893 = vmatmul.mubr.msk.f32.gmra.mrb[6].mxu1 %vm195_vm1, %v3174_v18  ;;  %v3198_v18 = vrot.slane %v11355_v62, 1 }
 0x200   : > { %8445 = vmatprep.mubr.msk.f32.mxu0 %vm195_vm1, %v3177_v44  ;;  %8895 = vmatprep.mubr.msk.f32.mxu1 %vm195_vm1, %v3177_v44  ;;  %v11366_v44 = vld [vmem:[#allocation2 + $0x118] sm:$0x3] }
 0x201   : > { %v3203_v3 = vrot.slane %v11366_v44, 1 }
 0x203   : > { %8446 = vmatmul.mubr.msk.f32.gmra.mrb[8].mxu0 %vm195_vm1, %v3179_v27  ;;  %8896 = vmatmul.mubr.msk.f32.gmra.mrb[8].mxu1 %vm195_vm1, %v3179_v27  ;;  %v3199_v27 = vsel %vm519_vm3, %v3196_v41, %v3198_v18  ;;  %v3204_v32 = vsel %vm519_vm3, %v3201_v23, %v3203_v3  ;;  %v3213_v41 = vrot.slane %v11388_v51, 1  ;;  %v3221_v3 = vrot.slane %v11242_v11, 1 }
 0x204   : > { %8448 = vmatprep.mubr.msk.f32.mxu0 %vm195_vm1, %v3182_v42  ;;  %8898 = vmatprep.mubr.msk.f32.mxu1 %vm195_vm1, %v3182_v42  ;;  %v3202_v42 = vsel %vm519_vm3, %v3200_v33, %v3201_v23  ;;  %v11399_v33 = vld [vmem:[#allocation2 + $0x160] sm:$0x3] }
 0x207   : > { %8449 = vmatmul.mubr.msk.f32.gmra.mrb[10].mxu0 %vm195_vm1, %v3184_v54  ;;  %8899 = vmatmul.mubr.msk.f32.gmra.mrb[10].mxu1 %vm195_vm1, %v3184_v54  ;;  %v11377_v54 = vld [vmem:[#allocation2 + $0x130] sm:$0x3] }
 0x208   : > { %8451 = vmatprep.mubr.msk.f32.mxu0 %vm195_vm1, %v3187_v22  ;;  %8901 = vmatprep.mubr.msk.f32.mxu1 %vm195_vm1, %v3187_v22  ;;  %v3208_v0 = vrot.slane %v11377_v54, 1  ;;  %v3211_v22 = vrot.slane %v11218_v21, 1 }
 0x20a   : > { %v3209_v12 = vsel %vm519_vm3, %v3206_v35, %v3208_v0  ;;  %v3212_v18 = vsel %vm519_vm3, %v3210_v24, %v3211_v22  ;;  %v3214_v23 = vsel %vm519_vm3, %v3211_v22, %v3213_v41  ;;  %v11419_v24 = vld [vmem:[#allocation2 + $0x190] sm:$0x3]  ;;  %v3231_v41 = vrot.slane %v11266_v36, 1 }
 0x20b   : > { %8452 = vmatmul.mubr.msk.f32.gmra.mrb[12].mxu0 %vm195_vm1, %v3189_v1  ;;  %8902 = vmatmul.mubr.msk.f32.gmra.mrb[12].mxu1 %vm195_vm1, %v3189_v1  ;;  %v3207_v1 = vsel %vm519_vm3, %v3205_v47, %v3206_v35  ;;  %v11410_v35 = vld [vmem:[#allocation2 + $0x178] sm:$0x3] }
 0x20c   : > { %8454 = vmatprep.mubr.msk.f32.mxu0 %vm195_vm1, %v3192_v45  ;;  %8904 = vmatprep.mubr.msk.f32.mxu1 %vm195_vm1, %v3192_v45  ;;  %v3215_v45 = vrot.slane %v11220_v2, 1 }
 0x20f   : > { %8455 = vmatmul.mubr.msk.f32.gmra.mrb[14].mxu0 %vm195_vm1, %v3194_v20  ;;  %8905 = vmatmul.mubr.msk.f32.gmra.mrb[14].mxu1 %vm195_vm1, %v3194_v20  ;;  %v3216_v20 = vrot.slane %v11230_v30, 1 }
 0x210   : > { %8457 = vmatprep.mubr.msk.f32.mxu0 %vm195_vm1, %v3197_v59  ;;  %8907 = vmatprep.mubr.msk.f32.mxu1 %vm195_vm1, %v3197_v59  ;;  %v3218_v59 = vrot.slane %v11399_v33, 1 }
 0x211   : > { %v3217_v47 = vsel %vm519_vm3, %v3215_v45, %v3216_v20  ;;  %v11429_v45 = vld [vmem:[#allocation2 + $0x1a8] sm:$0x3] }
 0x213   : > { %8458 = vmatmul.mubr.msk.f32.gmra.mrb[16].mxu0 %vm195_vm1, %v3199_v27  ;;  %8908 = vmatmul.mubr.msk.f32.gmra.mrb[16].mxu1 %vm195_vm1, %v3199_v27  ;;  %v3220_v27 = vrot.slane %v11232_v6, 1 }
 0x214   : > { %8460 = vmatprep.mubr.msk.f32.mxu0 %vm195_vm1, %v3202_v42  ;;  %8910 = vmatprep.mubr.msk.f32.mxu1 %vm195_vm1, %v3202_v42  ;;  %v3219_v42 = vsel %vm519_vm3, %v3216_v20, %v3218_v59 }
 0x215   : > { %v3222_v0 = vsel %vm519_vm3, %v3220_v27, %v3221_v3  ;;  %v3562_v27 = vrot.slane %v11068_v38, 2 }
 0x217   : > { %8461 = vmatmul.mubr.msk.f32.gmra.mrb[18].mxu0 %vm195_vm1, %v3204_v32  ;;  %8911 = vmatmul.mubr.msk.f32.gmra.mrb[18].mxu1 %vm195_vm1, %v3204_v32  ;;  %v3223_v32 = vrot.slane %v11410_v35, 1 }
 0x218   : > { %8463 = vmatprep.mubr.msk.f32.mxu0 %vm195_vm1, %v3207_v1  ;;  %8913 = vmatprep.mubr.msk.f32.mxu1 %vm195_vm1, %v3207_v1  ;;  %v3228_v1 = vrot.slane %v11419_v24, 1 }
 0x219   : > { %v3224_v22 = vsel %vm519_vm3, %v3221_v3, %v3223_v32  ;;  %v3566_v3 = vrot.slane %v11070_v16, 2  ;;  %v3572_v16 = vrot.slane %v11110_v63, 2 }
 0x21a   : > { %v3229_v20 = vsel %vm519_vm3, %v10865_v52, %v3228_v1  ;;  %v3564_v52 = vrot.slane %v11256_v53, 2  ;;  %v3571_v53 = vrot.slane %v11096_v25, 2  ;;  %v3577_v25 = vrot.slane %v11122_v43, 2 }
 0x21b   : > { %8464 = vmatmul.mubr.msk.f32.gmra.mrb[20].mxu0 %vm195_vm1, %v3209_v12  ;;  %8914 = vmatmul.mubr.msk.f32.gmra.mrb[20].mxu1 %vm195_vm1, %v3209_v12  ;;  %v3230_v12 = vrot.slane %v11253_v14, 1  ;;  %v3579_v1 = vrot.slane %v11300_v29, 2  ;;  %v3586_v29 = vrot.slane %v11136_v46, 2  ;;  %v3592_v46 = vrot.slane %v11158_v37, 2 }
 0x21c   : > { %8466 = vmatprep.mubr.msk.f32.mxu0 %vm195_vm1, %v3212_v18  ;;  %8916 = vmatprep.mubr.msk.f32.mxu1 %vm195_vm1, %v3212_v18  ;;  %v3233_v18 = vrot.slane %v11429_v45, 1  ;;  %v3565_v38 = vsel %vm1188_vm4, %v3562_v27, %v3564_v52  ;;  %v3573_v63 = vsel %vm1188_vm4, %v3571_v53, %v3572_v16 }
 0x21d   : > { %v3232_v59 = vsel %vm519_vm3, %v3230_v12, %v3231_v41  ;;  %v3580_v12 = vsel %vm1188_vm4, %v3577_v25, %v3579_v1 }
 0x21f   : > { %8467 = vmatmul.mubr.msk.f32.gmra.mrb[22].mxu0 %vm195_vm1, %v3214_v23  ;;  %8917 = vmatmul.mubr.msk.f32.gmra.mrb[22].mxu1 %vm195_vm1, %v3214_v23  ;;  %v3561_v23 = vrot.slane %v11060_v13, 2  ;;  %v3567_v13 = vrot.slane %v11090_v17, 2 }
 0x220   : > { %8469 = vmatprep.mubr.msk.f32.mxu0 %vm195_vm1, %v3217_v47  ;;  %8919 = vmatprep.mubr.msk.f32.mxu1 %vm195_vm1, %v3217_v47 }
 0x221   : > { %v3563_v47 = vsel %vm1188_vm4, %v3561_v23, %v3562_v27  ;;  %v3568_v17 = vsel %vm1188_vm4, %v3566_v3, %v3567_v13  ;;  %v3604_v3 = vrot.slane %v11355_v62, 2  ;;  %v3611_v62 = vrot.slane %v11196_v58, 2 }
 0x222   : > { %v3617_v58 = vrot.slane %v11218_v21, 2 }
 0x223   : > { %8470 = vmatmul.mubr.msk.f32.gmra.mrb[24].mxu0 %vm195_vm1, %v3219_v42  ;;  %8920 = vmatmul.mubr.msk.f32.gmra.mrb[24].mxu1 %vm195_vm1, %v3219_v42  ;;  %v3569_v42 = vrot.slane %v11270_v60, 2  ;;  %v3576_v60 = vrot.slane %v11112_v39, 2  ;;  %v3582_v39 = vrot.slane %v11134_v40, 2 }
 0x224   : > { %8472 = vmatprep.mubr.msk.f32.mxu0 %vm195_vm1, %v3222_v0  ;;  %8922 = vmatprep.mubr.msk.f32.mxu1 %vm195_vm1, %v3222_v0  ;;  %v3574_v0 = vrot.slane %v11284_v15, 2  ;;  %v3581_v15 = vrot.slane %v11124_v56, 2  ;;  %v3587_v56 = vrot.slane %v11146_v5, 2 }
 0x225   : > { %v3570_v32 = vsel %vm1188_vm4, %v3567_v13, %v3569_v42  ;;  %v3578_v43 = vsel %vm1188_vm4, %v3576_v60, %v3577_v25  ;;  %v3614_v42 = vrot.slane %v11377_v54, 2  ;;  %v3621_v54 = vrot.slane %v11220_v2, 2 }
 0x226   : > { %v3583_v40 = vsel %vm1188_vm4, %v3581_v15, %v3582_v39  ;;  %v3588_v5 = vsel %vm1188_vm4, %v3586_v29, %v3587_v56  ;;  %v3627_v2 = vrot.slane %v11242_v11, 2  ;;  %v3629_v60 = vrot.slane %v11410_v35, 2 }
 0x227   : > { %8473 = vmatmul.mubr.msk.f32.gmra.mrb[26].mxu0 %vm195_vm1, %v3224_v22  ;;  %8923 = vmatmul.mubr.msk.f32.gmra.mrb[26].mxu1 %vm195_vm1, %v3224_v22  ;;  %v3575_v22 = vsel %vm1188_vm4, %v3572_v16, %v3574_v0  ;;  %v3619_v16 = vrot.slane %v11388_v51, 2  ;;  %v3626_v51 = vrot.slane %v11232_v6, 2  ;;  %v3634_v11 = vrot.slane %v11419_v24, 2 }
 0x228   : > { %8475 = vmatprep.mubr.msk.f32.mxu0 %vm195_vm1, %v10880_v49  ;;  %8925 = vmatprep.mubr.msk.f32.mxu1 %vm195_vm1, %v10880_v49  ;;  %v3234_v49 = vsel %vm519_vm3, %v3231_v41, %v3233_v18  ;;  %v3584_v41 = vrot.slane %v11311_v8, 2  ;;  %v3589_v18 = vrot.slane %v11322_v31, 2  ;;  %v3591_v8 = vrot.slane %v11148_v55, 2 }
 0x229   : > { %v3596_v31 = vrot.slane %v11160_v7, 2  ;;  %v3597_v55 = vrot.slane %v11170_v34, 2  ;;  %v3602_v7 = vrot.slane %v11182_v26, 2  ;;  %v3630_v6 = vsel %vm1188_vm4, %v3627_v2, %v3629_v60 }
 0x22a   : > { %v3590_v23 = vsel %vm1188_vm4, %v3587_v56, %v3589_v18  ;;  %v3593_v37 = vsel %vm1188_vm4, %v3591_v8, %v3592_v46  ;;  %v3636_v25 = vrot.slane %v11253_v14, 2  ;;  %v3635_v35 = vsel %vm1188_vm4, %v11037_v9, %v3634_v11  ;;  %v11596_v9 = vld [vmem:[%s11870_s2] ss:$0 sm:$0xff] }
 0x22b   : > { %8476 = vmatmul.mubr.msk.f32.gmra.mrb[28].mxu0 %vm195_vm1, %v3229_v20  ;;  %8926 = vmatmul.mubr.msk.f32.gmra.mrb[28].mxu1 %vm195_vm1, %v3229_v20  ;;  %v3585_v20 = vsel %vm1188_vm4, %v3582_v39, %v3584_v41  ;;  %v3598_v34 = vsel %vm1188_vm4, %v3596_v31, %v3597_v55  ;;  %v3605_v13 = vsel %vm1188_vm4, %v3602_v7, %v3604_v3  ;;  %v3639_v24 = vrot.slane %v11429_v45, 2 }
 0x22c   : > { %8478 = vmatprep.mubr.msk.f32.mxu0 %vm195_vm1, %v3232_v59  ;;  %8928 = vmatprep.mubr.msk.f32.mxu1 %vm195_vm1, %v3232_v59  ;;  %v3594_v59 = vrot.slane %v11333_v4, 2  ;;  %v3601_v4 = vrot.slane %v11172_v48, 2  ;;  %v3607_v48 = vrot.slane %v11194_v57, 2 }
 0x22e   : > { %v3595_v27 = vsel %vm1188_vm4, %v3592_v46, %v3594_v59  ;;  %v3603_v26 = vsel %vm1188_vm4, %v3601_v4, %v3602_v7 }
 0x22f   : > { %8479 = vmatmul.mubr.msk.f32.gmra.mrb[30].mxu0 %vm195_vm1, %v3234_v49  ;;  %8929 = vmatmul.mubr.msk.f32.gmra.mrb[30].mxu1 %vm195_vm1, %v3234_v49  ;;  %v3599_v49 = vrot.slane %v11344_v10, 2  ;;  %v3606_v10 = vrot.slane %v11184_v61, 2  ;;  %v3612_v61 = vrot.slane %v11206_v50, 2 }
 0x230   : > { %8483 = vmatprep.mubr.msk.f32.mxu0 %vm195_vm1, %v3563_v47  ;;  %8933 = vmatprep.mubr.msk.f32.mxu1 %vm195_vm1, %v3563_v47  ;;  %v3609_v47 = vrot.slane %v11366_v44, 2  ;;  %v3616_v44 = vrot.slane %v11208_v28, 2  ;;  %v3622_v28 = vrot.slane %v11230_v30, 2 }
 0x231   : > { %v3600_v52 = vsel %vm1188_vm4, %v3597_v55, %v3599_v49  ;;  %v3608_v57 = vsel %vm1188_vm4, %v3606_v10, %v3607_v48  ;;  %v3613_v50 = vsel %vm1188_vm4, %v3611_v62, %v3612_v61  ;;  %v3615_v53 = vsel %vm1188_vm4, %v3612_v61, %v3614_v42 }
 0x232   : > { %v3618_v21 = vsel %vm1188_vm4, %v3616_v44, %v3617_v58  ;;  %v3623_v30 = vsel %vm1188_vm4, %v3621_v54, %v3622_v28 }
 0x233   : > { %8484 = vmatmul.mubr.msk.f32.vlgmr.msra.gmra.mrb[0].mxu0 %vm195_vm1, %v3565_v38  ;;  %8934 = vmatmul.mubr.msk.f32.vlgmr.msra.gmra.mrb[0].mxu1 %vm195_vm1, %v3565_v38  ;;  %v3610_v38 = vsel %vm1188_vm4, %v3607_v48, %v3609_v47 }
 0x234   : > { %8486 = vmatprep.mubr.msk.f32.mxu0 %vm195_vm1, %v3568_v17  ;;  %8936 = vmatprep.mubr.msk.f32.mxu1 %vm195_vm1, %v3568_v17  ;;  %v3620_v17 = vsel %vm1188_vm4, %v3617_v58, %v3619_v16 }
 0x237   : > { %8487 = vmatmul.mubr.msk.f32.gmra.mrb[2].mxu0 %vm195_vm1, %v3570_v32  ;;  %8937 = vmatmul.mubr.msk.f32.gmra.mrb[2].mxu1 %vm195_vm1, %v3570_v32  ;;  %v3624_v32 = vrot.slane %v11399_v33, 2  ;;  %v3628_v33 = vsel %vm1188_vm4, %v3626_v51, %v3627_v2 }
 0x238   : > { %8489 = vmatprep.mubr.msk.f32.mxu0 %vm195_vm1, %v3573_v63  ;;  %8939 = vmatprep.mubr.msk.f32.mxu1 %vm195_vm1, %v3573_v63  ;;  %v3637_v63 = vrot.slane %v11266_v36, 2 }
 0x239   : > { %v3625_v0 = vsel %vm1188_vm4, %v3622_v28, %v3624_v32 }
 0x23a   : > { %v3638_v14 = vsel %vm1188_vm4, %v3636_v25, %v3637_v63  ;;  %v3640_v36 = vsel %vm1188_vm4, %v3637_v63, %v3639_v24 }
 0x23b   : > { %8490 = vmatmul.mubr.msk.f32.gmra.mrb[4].mxu0 %vm195_vm1, %v3575_v22  ;;  %8940 = vmatmul.mubr.msk.f32.gmra.mrb[4].mxu1 %vm195_vm1, %v3575_v22 }
 0x23c   : > { %8492 = vmatprep.mubr.msk.f32.mxu0 %vm195_vm1, %v3578_v43  ;;  %8942 = vmatprep.mubr.msk.f32.mxu1 %vm195_vm1, %v3578_v43 }
 0x23f   : > { %8493 = vmatmul.mubr.msk.f32.gmra.mrb[6].mxu0 %vm195_vm1, %v3580_v12  ;;  %8943 = vmatmul.mubr.msk.f32.gmra.mrb[6].mxu1 %vm195_vm1, %v3580_v12 }
 0x240   : > { %8495 = vmatprep.mubr.msk.f32.mxu0 %vm195_vm1, %v3583_v40  ;;  %8945 = vmatprep.mubr.msk.f32.mxu1 %vm195_vm1, %v3583_v40 }
 0x243   : > { %8496 = vmatmul.mubr.msk.f32.gmra.mrb[8].mxu0 %vm195_vm1, %v3585_v20  ;;  %8946 = vmatmul.mubr.msk.f32.gmra.mrb[8].mxu1 %vm195_vm1, %v3585_v20 }
 0x244   : > { %8498 = vmatprep.mubr.msk.f32.mxu0 %vm195_vm1, %v3588_v5  ;;  %8948 = vmatprep.mubr.msk.f32.mxu1 %vm195_vm1, %v3588_v5 }
 0x247   : > { %8499 = vmatmul.mubr.msk.f32.gmra.mrb[10].mxu0 %vm195_vm1, %v3590_v23  ;;  %8949 = vmatmul.mubr.msk.f32.gmra.mrb[10].mxu1 %vm195_vm1, %v3590_v23 }
 0x248   : > { %8501 = vmatprep.mubr.msk.f32.mxu0 %vm195_vm1, %v3593_v37  ;;  %8951 = vmatprep.mubr.msk.f32.mxu1 %vm195_vm1, %v3593_v37 }
 0x24b   : > { %8502 = vmatmul.mubr.msk.f32.gmra.mrb[12].mxu0 %vm195_vm1, %v3595_v27  ;;  %8952 = vmatmul.mubr.msk.f32.gmra.mrb[12].mxu1 %vm195_vm1, %v3595_v27 }
 0x24c   : > { %8504 = vmatprep.mubr.msk.f32.mxu0 %vm195_vm1, %v3598_v34  ;;  %8954 = vmatprep.mubr.msk.f32.mxu1 %vm195_vm1, %v3598_v34 }
 0x24f   : > { %8505 = vmatmul.mubr.msk.f32.gmra.mrb[14].mxu0 %vm195_vm1, %v3600_v52  ;;  %8955 = vmatmul.mubr.msk.f32.gmra.mrb[14].mxu1 %vm195_vm1, %v3600_v52 }
 0x250   : > { %8507 = vmatprep.mubr.msk.f32.mxu0 %vm195_vm1, %v3603_v26  ;;  %8957 = vmatprep.mubr.msk.f32.mxu1 %vm195_vm1, %v3603_v26 }
 0x253   : > { %8508 = vmatmul.mubr.msk.f32.gmra.mrb[16].mxu0 %vm195_vm1, %v3605_v13  ;;  %8958 = vmatmul.mubr.msk.f32.gmra.mrb[16].mxu1 %vm195_vm1, %v3605_v13 }
 0x254   : > { %8510 = vmatprep.mubr.msk.f32.mxu0 %vm195_vm1, %v3608_v57  ;;  %8960 = vmatprep.mubr.msk.f32.mxu1 %vm195_vm1, %v3608_v57 }
 0x257   : > { %8511 = vmatmul.mubr.msk.f32.gmra.mrb[18].mxu0 %vm195_vm1, %v3610_v38  ;;  %8961 = vmatmul.mubr.msk.f32.gmra.mrb[18].mxu1 %vm195_vm1, %v3610_v38 }
 0x258   : > { %8513 = vmatprep.mubr.msk.f32.mxu0 %vm195_vm1, %v3613_v50  ;;  %8963 = vmatprep.mubr.msk.f32.mxu1 %vm195_vm1, %v3613_v50 }
 0x25b   : > { %8514 = vmatmul.mubr.msk.f32.gmra.mrb[20].mxu0 %vm195_vm1, %v3615_v53  ;;  %8964 = vmatmul.mubr.msk.f32.gmra.mrb[20].mxu1 %vm195_vm1, %v3615_v53 }
 0x25c   : > { %8516 = vmatprep.mubr.msk.f32.mxu0 %vm195_vm1, %v3618_v21  ;;  %8966 = vmatprep.mubr.msk.f32.mxu1 %vm195_vm1, %v3618_v21 }
 0x25f   : > { %8517 = vmatmul.mubr.msk.f32.gmra.mrb[22].mxu0 %vm195_vm1, %v3620_v17  ;;  %8967 = vmatmul.mubr.msk.f32.gmra.mrb[22].mxu1 %vm195_vm1, %v3620_v17 }
 0x260   : > { %8519 = vmatprep.mubr.msk.f32.mxu0 %vm195_vm1, %v3623_v30  ;;  %8969 = vmatprep.mubr.msk.f32.mxu1 %vm195_vm1, %v3623_v30 }
 0x263   : > { %8520 = vmatmul.mubr.msk.f32.gmra.mrb[24].mxu0 %vm195_vm1, %v3625_v0  ;;  %8970 = vmatmul.mubr.msk.f32.gmra.mrb[24].mxu1 %vm195_vm1, %v3625_v0 }
 0x264   : > { %8522 = vmatprep.mubr.msk.f32.mxu0 %vm195_vm1, %v3628_v33  ;;  %8972 = vmatprep.mubr.msk.f32.mxu1 %vm195_vm1, %v3628_v33 }
 0x267   : > { %8523 = vmatmul.mubr.msk.f32.gmra.mrb[26].mxu0 %vm195_vm1, %v3630_v6  ;;  %8973 = vmatmul.mubr.msk.f32.gmra.mrb[26].mxu1 %vm195_vm1, %v3630_v6 }
 0x268   : > { %8525 = vmatprep.mubr.msk.f32.mxu0 %vm195_vm1, %v11050_v19  ;;  %8975 = vmatprep.mubr.msk.f32.mxu1 %vm195_vm1, %v11050_v19 }
 0x26b   : > { %8526 = vmatmul.mubr.msk.f32.gmra.mrb[28].mxu0 %vm195_vm1, %v3635_v35  ;;  %8976 = vmatmul.mubr.msk.f32.gmra.mrb[28].mxu1 %vm195_vm1, %v3635_v35 }
 0x26c   : > { %8528 = vmatprep.mubr.msk.f32.mxu0 %vm195_vm1, %v3638_v14  ;;  %8978 = vmatprep.mubr.msk.f32.mxu1 %vm195_vm1, %v3638_v14 }
 0x26f   : > { %8529 = vmatmul.mubr.msk.f32.gmra.mrb[30].mxu0 %vm195_vm1, %v3640_v36  ;;  %8979 = vmatmul.mubr.msk.f32.gmra.mrb[30].mxu1 %vm195_vm1, %v3640_v36 }
 0x306   : > { %v8485_v19 = vpop.f32.mrb[0].mxu0  ;;  %v8935_v45 = vpop.f32.mrb[0].mxu1 }
 0x307   : > { %v3974_v22 = vadd.f32 %v8485_v19, %v11596_v9  ;;  %v6461_v1 = vadd.f32 %v8935_v45, %v11596_v9  ;;  %v3776_v15 = vpop.f32.mrb[1].mxu0  ;;  %v6269_v39 = vpop.f32.mrb[1].mxu1 }
 0x308   : > { %v3973_v43 = vadd.f32 %v11596_v9, %v3776_v15  ;;  %v6460_v12 = vadd.f32 %v11596_v9, %v6269_v39 }
 0x309   : > { %vm4006_vm5 = vcmp.ge.f32.partialorder %v3974_v22, 0.0  ;;  %v4038_v41 = vmul.f32 0.2, %v3974_v22  ;;  %vm6493_vm6 = vcmp.ge.f32.partialorder %v6461_v1, 0.0  ;;  %v6525_v29 = vmul.f32 0.2, %v6461_v1 }
 0x30a   : > { %vm4005_vm7 = vcmp.ge.f32.partialorder %v3973_v43, 0.0  ;;  %v4037_v56 = vmul.f32 0.2, %v3973_v43  ;;  %vm6492_vm8 = vcmp.ge.f32.partialorder %v6460_v12, 0.0  ;;  %v6524_v40 = vmul.f32 0.2, %v6460_v12 }
 0x30b   : > { %v4070_v20 = vsel %vm4006_vm5, %v3974_v22, %v4038_v41  ;;  %v6557_v18 = vsel %vm6493_vm6, %v6461_v1, %v6525_v29  ;;  %v8488_v8 = vpop.f32.mrb[2].mxu0  ;;  %v8938_v46 = vpop.f32.mrb[2].mxu1 }
 0x30c   : > { %v4102_v5 = vmul.f32 1.4142135, %v4070_v20  ;;  %v6589_v23 = vmul.f32 1.4142135, %v6557_v18  ;;  %v4069_v59 = vsel %vm4005_vm7, %v3973_v43, %v4037_v56  ;;  %v6556_v31 = vsel %vm6492_vm8, %v6460_v12, %v6524_v40  ;;  %v3786_v55 = vpop.f32.mrb[3].mxu0  ;;  %v6279_v37 = vpop.f32.mrb[3].mxu1 }
 0x30d   : > { %v4101_v27 = vmul.f32 1.4142135, %v4069_v59  ;;  %v6588_v49 = vmul.f32 1.4142135, %v6556_v31  ;;  %v3976_v4 = vadd.f32 %v8488_v8, %v11596_v9  ;;  %v6463_v7 = vadd.f32 %v8938_v46, %v11596_v9 }
 0x30e   : > { %4135 = vst.msk [vmem:[%s11605_s16 + $0x8] sm:$0xff] %vm4133_vm9, %v4102_v5  ;;  %7452 = vst.msk [vmem:[%s11605_s16 + $0x18] sm:$0xff] %vm4133_vm9, %v6589_v23  ;;  %v3975_v34 = vadd.f32 %v11596_v9, %v3786_v55  ;;  %v6462_v52 = vadd.f32 %v11596_v9, %v6279_v37  ;;  %v8491_v3 = vpop.f32.mrb[4].mxu0  ;;  %v8941_v10 = vpop.f32.mrb[4].mxu1 }
 0x30f   : > { %4134 = vst.msk [vmem:[%s11605_s16] sm:$0xff] %vm4133_vm9, %v4101_v27  ;;  %7451 = vst.msk [vmem:[%s11605_s16 + $0x10] sm:$0xff] %vm4133_vm9, %v6588_v49  ;;  %vm4008_vm10 = vcmp.ge.f32.partialorder %v3976_v4, 0.0  ;;  %v4040_v48 = vmul.f32 0.2, %v3976_v4  ;;  %vm6495_vm11 = vcmp.ge.f32.partialorder %v6463_v7, 0.0  ;;  %v3978_v57 = vadd.f32 %v8491_v3, %v11596_v9 }
 0x310   : > { %v6527_v26 = vmul.f32 0.2, %v6463_v7  ;;  %vm4007_vm12 = vcmp.ge.f32.partialorder %v3975_v34, 0.0  ;;  %v4039_v13 = vmul.f32 0.2, %v3975_v34  ;;  %vm6494_vm13 = vcmp.ge.f32.partialorder %v6462_v52, 0.0 }
 0x311   : > { %v6526_v47 = vmul.f32 0.2, %v6462_v52  ;;  %v4072_v62 = vsel %vm4008_vm10, %v3976_v4, %v4040_v48  ;;  %v6465_v38 = vadd.f32 %v8941_v10, %v11596_v9  ;;  %v3796_v42 = vpop.f32.mrb[5].mxu0  ;;  %v6289_v44 = vpop.f32.mrb[5].mxu1  ;;  %vm4010_vm14 = vcmp.ge.f32.partialorder %v3978_v57, 0.0 }
 0x312   : > { %v6559_v61 = vsel %vm6495_vm11, %v6463_v7, %v6527_v26  ;;  %v4104_v58 = vmul.f32 1.4142135, %v4072_v62  ;;  %v4071_v53 = vsel %vm4007_vm12, %v3975_v34, %v4039_v13  ;;  %v8494_v54 = vpop.f32.mrb[6].mxu0  ;;  %v8944_v28 = vpop.f32.mrb[6].mxu1  ;;  %v4042_v32 = vmul.f32 0.2, %v3978_v57 }
 0x313   : > { %v6591_v50 = vmul.f32 1.4142135, %v6559_v61  ;;  %v6558_v16 = vsel %vm6494_vm13, %v6462_v52, %v6526_v47  ;;  %v4103_v21 = vmul.f32 1.4142135, %v4071_v53  ;;  %vm6497_vm15 = vcmp.ge.f32.partialorder %v6465_v38, 0.0  ;;  %v3806_v0 = vpop.f32.mrb[7].mxu0 }
 0x314   : > { %v6590_v17 = vmul.f32 1.4142135, %v6558_v16  ;;  %4137 = vst.msk [vmem:[%s11605_s16 + $0x28] sm:$0xff] %vm4133_vm9, %v4104_v58  ;;  %v6529_v51 = vmul.f32 0.2, %v6465_v38  ;;  %v3977_v2 = vadd.f32 %v11596_v9, %v3796_v42  ;;  %v6464_v30 = vadd.f32 %v11596_v9, %v6289_v44 }
 0x315   : > { %7454 = vst.msk [vmem:[%s11605_s16 + $0x38] sm:$0xff] %vm4133_vm9, %v6591_v50  ;;  %v6299_v60 = vpop.f32.mrb[7].mxu1  ;;  %4136 = vst.msk [vmem:[%s11605_s16 + $0x20] sm:$0xff] %vm4133_vm9, %v4103_v21  ;;  %v3980_v33 = vadd.f32 %v8494_v54, %v11596_v9  ;;  %v6467_v6 = vadd.f32 %v8944_v28, %v11596_v9  ;;  %v3979_v11 = vadd.f32 %v11596_v9, %v3806_v0 }
 0x316   : > { %7453 = vst.msk [vmem:[%s11605_s16 + $0x30] sm:$0xff] %vm4133_vm9, %v6590_v17  ;;  %v6466_v25 = vadd.f32 %v11596_v9, %v6299_v60  ;;  %v4074_v63 = vsel %vm4010_vm14, %v3978_v57, %v4042_v32  ;;  %v6561_v35 = vsel %vm6497_vm15, %v6465_v38, %v6529_v51  ;;  %vm4009_vm0 = vcmp.ge.f32.partialorder %v3977_v2, 0.0  ;;  %v8497_v14 = vpop.f32.mrb[8].mxu0  ;;  %v8947_v36 = vpop.f32.mrb[8].mxu1 }
 0x317   : > { %v4041_v24 = vmul.f32 0.2, %v3977_v2  ;;  %v4106_v19 = vmul.f32 1.4142135, %v4074_v63  ;;  %v6593_v45 = vmul.f32 1.4142135, %v6561_v35  ;;  %v3982_v23 = vadd.f32 %v8497_v14, %v11596_v9 }
 0x318   : > { %vm6496_vm1 = vcmp.ge.f32.partialorder %v6464_v30, 0.0  ;;  %vm4012_vm2 = vcmp.ge.f32.partialorder %v3980_v33, 0.0  ;;  %v6528_v1 = vmul.f32 0.2, %v6464_v30  ;;  %v4044_v15 = vmul.f32 0.2, %v3980_v33 }
 0x319   : > { %v4073_v22 = vsel %vm4009_vm0, %v3977_v2, %v4041_v24  ;;  %vm6499_vm3 = vcmp.ge.f32.partialorder %v6467_v6, 0.0  ;;  %v3816_v39 = vpop.f32.mrb[9].mxu0  ;;  %4139 = vst.msk [vmem:[%s11605_s16 + $0x48] sm:$0xff] %vm4133_vm9, %v4106_v19  ;;  %7456 = vst.msk [vmem:[%s11605_s16 + $0x58] sm:$0xff] %vm4133_vm9, %v6593_v45  ;;  %v6531_v12 = vmul.f32 0.2, %v6467_v6  ;;  %v6469_v49 = vadd.f32 %v8947_v36, %v11596_v9 }
 0x31a   : > { %v4105_v43 = vmul.f32 1.4142135, %v4073_v22  ;;  %vm4011_vm4 = vcmp.ge.f32.partialorder %v3979_v11, 0.0  ;;  %vm6498_vm5 = vcmp.ge.f32.partialorder %v6466_v25, 0.0  ;;  %v6560_v41 = vsel %vm6496_vm1, %v6464_v30, %v6528_v1  ;;  %v6309_v20 = vpop.f32.mrb[9].mxu1  ;;  %v8500_v18 = vpop.f32.mrb[10].mxu0 }
 0x31b   : > { %v4076_v29 = vsel %vm4012_vm2, %v3980_v33, %v4044_v15  ;;  %v4043_v56 = vmul.f32 0.2, %v3979_v11  ;;  %v6530_v40 = vmul.f32 0.2, %v6466_v25  ;;  %v6592_v8 = vmul.f32 1.4142135, %v6560_v41 }
 0x31c   : > { %4138 = vst.msk [vmem:[%s11605_s16 + $0x40] sm:$0xff] %vm4133_vm9, %v4105_v43  ;;  %v4108_v46 = vmul.f32 1.4142135, %v4076_v29  ;;  %v6563_v5 = vsel %vm6499_vm3, %v6467_v6, %v6531_v12  ;;  %v8950_v59 = vpop.f32.mrb[10].mxu1  ;;  %v3826_v31 = vpop.f32.mrb[11].mxu0  ;;  %vm4014_vm6 = vcmp.ge.f32.partialorder %v3982_v23, 0.0  ;;  %v3981_v52 = vadd.f32 %v11596_v9, %v3816_v39 }
 0x31d   : > { %v6595_v55 = vmul.f32 1.4142135, %v6563_v5  ;;  %v4075_v37 = vsel %vm4011_vm4, %v3979_v11, %v4043_v56  ;;  %v6562_v27 = vsel %vm6498_vm5, %v6466_v25, %v6530_v40  ;;  %v6319_v4 = vpop.f32.mrb[11].mxu1  ;;  %7455 = vst.msk [vmem:[%s11605_s16 + $0x50] sm:$0xff] %vm4133_vm9, %v6592_v8  ;;  %vm6501_vm7 = vcmp.ge.f32.partialorder %v6469_v49, 0.0 }
 0x31e   : > { %4141 = vst.msk [vmem:[%s11605_s16 + $0x68] sm:$0xff] %vm4133_vm9, %v4108_v46  ;;  %v4107_v7 = vmul.f32 1.4142135, %v4075_v37  ;;  %v6594_v34 = vmul.f32 1.4142135, %v6562_v27  ;;  %v6468_v48 = vadd.f32 %v11596_v9, %v6309_v20  ;;  %v8503_v26 = vpop.f32.mrb[12].mxu0  ;;  %v3984_v47 = vadd.f32 %v8500_v18, %v11596_v9 }
 0x31f   : > { %7458 = vst.msk [vmem:[%s11605_s16 + $0x78] sm:$0xff] %vm4133_vm9, %v6595_v55  ;;  %v4046_v3 = vmul.f32 0.2, %v3982_v23  ;;  %v6533_v10 = vmul.f32 0.2, %v6469_v49  ;;  %vm4013_vm8 = vcmp.ge.f32.partialorder %v3981_v52, 0.0  ;;  %v6471_v62 = vadd.f32 %v8950_v59, %v11596_v9 }
 0x320   : > { %4140 = vst.msk [vmem:[%s11605_s16 + $0x60] sm:$0xff] %vm4133_vm9, %v4107_v7  ;;  %7457 = vst.msk [vmem:[%s11605_s16 + $0x70] sm:$0xff] %vm4133_vm9, %v6594_v34  ;;  %v4045_v13 = vmul.f32 0.2, %v3981_v52  ;;  %v8953_v61 = vpop.f32.mrb[12].mxu1  ;;  %v3836_v57 = vpop.f32.mrb[13].mxu0  ;;  %v3983_v2 = vadd.f32 %v11596_v9, %v3826_v31  ;;  %v6470_v30 = vadd.f32 %v11596_v9, %v6319_v4  ;;  %v3986_v6 = vadd.f32 %v8503_v26, %v11596_v9 }
 0x321   : > { %v4078_v38 = vsel %vm4014_vm6, %v3982_v23, %v4046_v3  ;;  %v6565_v42 = vsel %vm6501_vm7, %v6469_v49, %v6533_v10  ;;  %vm6500_vm10 = vcmp.ge.f32.partialorder %v6468_v48, 0.0  ;;  %v6532_v44 = vmul.f32 0.2, %v6468_v48  ;;  %v6329_v58 = vpop.f32.mrb[13].mxu1 }
 0x322   : > { %v4110_v50 = vmul.f32 1.4142135, %v4078_v38  ;;  %v6597_v53 = vmul.f32 1.4142135, %v6565_v42  ;;  %v4077_v16 = vsel %vm4013_vm8, %v3981_v52, %v4045_v13  ;;  %vm4016_vm11 = vcmp.ge.f32.partialorder %v3984_v47, 0.0  ;;  %v8506_v17 = vpop.f32.mrb[14].mxu0 }
 0x323   : > { %v4109_v54 = vmul.f32 1.4142135, %v4077_v16  ;;  %v6564_v28 = vsel %vm6500_vm10, %v6468_v48, %v6532_v44  ;;  %v4048_v21 = vmul.f32 0.2, %v3984_v47  ;;  %vm6503_vm12 = vcmp.ge.f32.partialorder %v6471_v62, 0.0  ;;  %v8956_v0 = vpop.f32.mrb[14].mxu1 }
 0x324   : > { %4143 = vst.msk [vmem:[%s11605_s16 + $0x88] sm:$0xff] %vm4133_vm9, %v4110_v50  ;;  %7460 = vst.msk [vmem:[%s11605_s16 + $0x98] sm:$0xff] %vm4133_vm9, %v6597_v53  ;;  %v6596_v32 = vmul.f32 1.4142135, %v6564_v28  ;;  %v6535_v51 = vmul.f32 0.2, %v6471_v62  ;;  %v6473_v11 = vadd.f32 %v8953_v61, %v11596_v9  ;;  %v3985_v25 = vadd.f32 %v11596_v9, %v3836_v57 }
 0x325   : > { %v3846_v60 = vpop.f32.mrb[15].mxu0  ;;  %4142 = vst.msk [vmem:[%s11605_s16 + $0x80] sm:$0xff] %vm4133_vm9, %v4109_v54  ;;  %v4080_v33 = vsel %vm4016_vm11, %v3984_v47, %v4048_v21  ;;  %v6339_v63 = vpop.f32.mrb[15].mxu1  ;;  %vm4015_vm13 = vcmp.ge.f32.partialorder %v3983_v2, 0.0  ;;  %v4047_v14 = vmul.f32 0.2, %v3983_v2  ;;  %v6472_v20 = vadd.f32 %v11596_v9, %v6329_v58 }
 0x326   : > { %7459 = vst.msk [vmem:[%s11605_s16 + $0x90] sm:$0xff] %vm4133_vm9, %v6596_v32  ;;  %v4112_v35 = vmul.f32 1.4142135, %v4080_v33  ;;  %v6567_v24 = vsel %vm6503_vm12, %v6471_v62, %v6535_v51  ;;  %vm6502_vm14 = vcmp.ge.f32.partialorder %v6470_v30, 0.0  ;;  %v6534_v19 = vmul.f32 0.2, %v6470_v30 }
 0x327   : > { %v6599_v36 = vmul.f32 1.4142135, %v6567_v24  ;;  %vm4018_vm15 = vcmp.ge.f32.partialorder %v3986_v6, 0.0  ;;  %v4079_v45 = vsel %vm4015_vm13, %v3983_v2, %v4047_v14  ;;  %v4050_v22 = vmul.f32 0.2, %v3986_v6  ;;  %v8509_v15 = vpop.f32.mrb[16].mxu0 }
 0x328   : > { %4145 = vst.msk [vmem:[%s11605_s16 + $0xa8] sm:$0xff] %vm4133_vm9, %v4112_v35  ;;  %vm6505_vm0 = vcmp.ge.f32.partialorder %v6473_v11, 0.0  ;;  %v6537_v1 = vmul.f32 0.2, %v6473_v11  ;;  %v4111_v39 = vmul.f32 1.4142135, %v4079_v45  ;;  %v6566_v43 = vsel %vm6502_vm14, %v6470_v30, %v6534_v19 }
 0x329   : > { %7462 = vst.msk [vmem:[%s11605_s16 + $0xb8] sm:$0xff] %vm4133_vm9, %v6599_v36  ;;  %vm4017_vm1 = vcmp.ge.f32.partialorder %v3985_v25, 0.0  ;;  %v4049_v12 = vmul.f32 0.2, %v3985_v25  ;;  %v8959_v41 = vpop.f32.mrb[16].mxu1  ;;  %v4082_v56 = vsel %vm4018_vm15, %v3986_v6, %v4050_v22  ;;  %v3856_v18 = vpop.f32.mrb[17].mxu0  ;;  %v3988_v59 = vadd.f32 %v8506_v17, %v11596_v9 }
 0x32a   : > { %v6598_v29 = vmul.f32 1.4142135, %v6566_v43  ;;  %v6569_v40 = vsel %vm6505_vm0, %v6473_v11, %v6537_v1  ;;  %v6349_v8 = vpop.f32.mrb[17].mxu1  ;;  %4144 = vst.msk [vmem:[%s11605_s16 + $0xa0] sm:$0xff] %vm4133_vm9, %v4111_v39  ;;  %v4114_v46 = vmul.f32 1.4142135, %v4082_v56  ;;  %v6475_v49 = vadd.f32 %v8956_v0, %v11596_v9 }
 0x32b   : > { %v6601_v5 = vmul.f32 1.4142135, %v6569_v40  ;;  %v4081_v23 = vsel %vm4017_vm1, %v3985_v25, %v4049_v12  ;;  %v8512_v31 = vpop.f32.mrb[18].mxu0  ;;  %v8962_v55 = vpop.f32.mrb[18].mxu1  ;;  %vm6504_vm2 = vcmp.ge.f32.partialorder %v6472_v20, 0.0  ;;  %vm4020_vm3 = vcmp.ge.f32.partialorder %v3988_v59, 0.0 }
 0x32c   : > { %7461 = vst.msk [vmem:[%s11605_s16 + $0xb0] sm:$0xff] %vm4133_vm9, %v6598_v29  ;;  %v4113_v37 = vmul.f32 1.4142135, %v4081_v23  ;;  %v6536_v27 = vmul.f32 0.2, %v6472_v20  ;;  %4147 = vst.msk [vmem:[%s11605_s16 + $0xc8] sm:$0xff] %vm4133_vm9, %v4114_v46  ;;  %v3987_v34 = vadd.f32 %v11596_v9, %v3846_v60  ;;  %v6474_v52 = vadd.f32 %v11596_v9, %v6339_v63 }
 0x32d   : > { %v3866_v4 = vpop.f32.mrb[19].mxu0  ;;  %7464 = vst.msk [vmem:[%s11605_s16 + $0xd8] sm:$0xff] %vm4133_vm9, %v6601_v5  ;;  %v4052_v7 = vmul.f32 0.2, %v3988_v59  ;;  %v6359_v3 = vpop.f32.mrb[19].mxu1  ;;  %vm6507_vm4 = vcmp.ge.f32.partialorder %v6475_v49, 0.0  ;;  %v3990_v26 = vadd.f32 %v8509_v15, %v11596_v9  ;;  %v6477_v21 = vadd.f32 %v8959_v41, %v11596_v9 }
 0x32e   : > { %4146 = vst.msk [vmem:[%s11605_s16 + $0xc0] sm:$0xff] %vm4133_vm9, %v4113_v37  ;;  %v6568_v10 = vsel %vm6504_vm2, %v6472_v20, %v6536_v27  ;;  %v6539_v48 = vmul.f32 0.2, %v6475_v49  ;;  %vm4019_vm5 = vcmp.ge.f32.partialorder %v3987_v34, 0.0  ;;  %v4051_v62 = vmul.f32 0.2, %v3987_v34 }
 0x32f   : > { %v6600_v13 = vmul.f32 1.4142135, %v6568_v10  ;;  %v4084_v47 = vsel %vm4020_vm3, %v3988_v59, %v4052_v7  ;;  %v8515_v61 = vpop.f32.mrb[20].mxu0  ;;  %vm6506_vm6 = vcmp.ge.f32.partialorder %v6474_v52, 0.0  ;;  %v6538_v42 = vmul.f32 0.2, %v6474_v52 }
 0x330   : > { %v4116_v57 = vmul.f32 1.4142135, %v4084_v47  ;;  %v6571_v38 = vsel %vm6507_vm4, %v6475_v49, %v6539_v48  ;;  %v8965_v44 = vpop.f32.mrb[20].mxu1  ;;  %v4083_v50 = vsel %vm4019_vm5, %v3987_v34, %v4051_v62  ;;  %vm4022_vm7 = vcmp.ge.f32.partialorder %v3990_v26, 0.0  ;;  %v3876_v16 = vpop.f32.mrb[21].mxu0 }
 0x331   : > { %7463 = vst.msk [vmem:[%s11605_s16 + $0xd0] sm:$0xff] %vm4133_vm9, %v6600_v13  ;;  %v6603_v58 = vmul.f32 1.4142135, %v6571_v38  ;;  %v4054_v53 = vmul.f32 0.2, %v3990_v26  ;;  %v6570_v28 = vsel %vm6506_vm6, %v6474_v52, %v6538_v42  ;;  %v3989_v17 = vadd.f32 %v11596_v9, %v3856_v18 }
 0x332   : > { %4149 = vst.msk [vmem:[%s11605_s16 + $0xe8] sm:$0xff] %vm4133_vm9, %v4116_v57  ;;  %v4115_v54 = vmul.f32 1.4142135, %v4083_v50  ;;  %v6369_v32 = vpop.f32.mrb[21].mxu1  ;;  %v6602_v51 = vmul.f32 1.4142135, %v6570_v28  ;;  %v6476_v30 = vadd.f32 %v11596_v9, %v6349_v8  ;;  %v3992_v0 = vadd.f32 %v8512_v31, %v11596_v9 }
 0x333   : > { %7466 = vst.msk [vmem:[%s11605_s16 + $0xf8] sm:$0xff] %vm4133_vm9, %v6603_v58  ;;  %v4086_v2 = vsel %vm4022_vm7, %v3990_v26, %v4054_v53  ;;  %v8518_v60 = vpop.f32.mrb[22].mxu0  ;;  %v8968_v33 = vpop.f32.mrb[22].mxu1  ;;  %vm6509_vm8 = vcmp.ge.f32.partialorder %v6477_v21, 0.0  ;;  %v6541_v11 = vmul.f32 0.2, %v6477_v21  ;;  %v6479_v14 = vadd.f32 %v8962_v55, %v11596_v9 }
 0x334   : > { %4148 = vst.msk [vmem:[%s11605_s16 + $0xe0] sm:$0xff] %vm4133_vm9, %v4115_v54  ;;  %v4118_v6 = vmul.f32 1.4142135, %v4086_v2  ;;  %vm4021_vm10 = vcmp.ge.f32.partialorder %v3989_v17, 0.0  ;;  %7465 = vst.msk [vmem:[%s11605_s16 + $0xf0] sm:$0xff] %vm4133_vm9, %v6602_v51  ;;  %vm6508_vm11 = vcmp.ge.f32.partialorder %v6476_v30, 0.0  ;;  %v3991_v36 = vadd.f32 %v11596_v9, %v3866_v4 }
 0x335   : > { %v4053_v25 = vmul.f32 0.2, %v3989_v17  ;;  %v6540_v63 = vmul.f32 0.2, %v6476_v30  ;;  %vm4024_vm12 = vcmp.ge.f32.partialorder %v3992_v0, 0.0  ;;  %v6573_v35 = vsel %vm6509_vm8, %v6477_v21, %v6541_v11  ;;  %v11715_v19 = vpop.f32.mrb[23].mxu0 }
 0x336   : > { %4151 = vst.msk [vmem:[%s11605_s16 + $0x108] sm:$0xff] %vm4133_vm9, %v4118_v6  ;;  %v4056_v24 = vmul.f32 0.2, %v3992_v0  ;;  %v11717_v45 = vpop.f32.mrb[23].mxu1  ;;  %v6478_v39 = vadd.f32 %v11596_v9, %v6359_v3  ;;  %v11720_v43 = vpop.f32.mrb[24].mxu0  ;;  %vm6511_vm13 = vcmp.ge.f32.partialorder %v6479_v14, 0.0  ;;  %v3994_v5 = vadd.f32 %v8515_v61, %v11596_v9 }
 0x337   : > { %v6605_v22 = vmul.f32 1.4142135, %v6573_v35  ;;  %v4085_v1 = vsel %vm4021_vm10, %v3989_v17, %v4053_v25  ;;  %v6572_v15 = vsel %vm6508_vm11, %v6476_v30, %v6540_v63  ;;  %v11722_v12 = vpop.f32.mrb[24].mxu1  ;;  %v11725_v40 = vpop.f32.mrb[25].mxu0  ;;  %v6543_v18 = vmul.f32 0.2, %v6479_v14 }
 0x338   : > { %v4117_v41 = vmul.f32 1.4142135, %v4085_v1  ;;  %v6604_v29 = vmul.f32 1.4142135, %v6572_v15  ;;  %v4088_v56 = vsel %vm4024_vm12, %v3992_v0, %v4056_v24  ;;  %vm4023_vm14 = vcmp.ge.f32.partialorder %v3991_v36, 0.0  ;;  %v11735_v59 = vpop.f32.mrb[25].mxu1 }
 0x339   : > { %7468 = vst.msk [vmem:[%s11605_s16 + $0x118] sm:$0xff] %vm4133_vm9, %v6605_v22  ;;  %v4120_v20 = vmul.f32 1.4142135, %v4088_v56  ;;  %vm6510_vm15 = vcmp.ge.f32.partialorder %v6478_v39, 0.0  ;;  %v4055_v8 = vmul.f32 0.2, %v3991_v36  ;;  %v6481_v23 = vadd.f32 %v8965_v44, %v11596_v9 }
 0x33a   : > { %4150 = vst.msk [vmem:[%s11605_s16 + $0x100] sm:$0xff] %vm4133_vm9, %v4117_v41  ;;  %7467 = vst.msk [vmem:[%s11605_s16 + $0x110] sm:$0xff] %vm4133_vm9, %v6604_v29  ;;  %v6542_v46 = vmul.f32 0.2, %v6478_v39  ;;  %v6575_v31 = vsel %vm6511_vm13, %v6479_v14, %v6543_v18  ;;  %v3993_v55 = vadd.f32 %v11596_v9, %v3876_v16  ;;  %v6480_v37 = vadd.f32 %v11596_v9, %v6369_v32  ;;  %v11742_v49 = vpop.f32.mrb[26].mxu0  ;;  %v11744_v4 = vpop.f32.mrb[26].mxu1 }
 0x33b   : > { %4153 = vst.msk [vmem:[%s11605_s16 + $0x128] sm:$0xff] %vm4133_vm9, %v4120_v20  ;;  %v3996_v27 = vadd.f32 %v8518_v60, %v11596_v9  ;;  %v6607_v7 = vmul.f32 1.4142135, %v6575_v31  ;;  %v4087_v34 = vsel %vm4023_vm14, %v3991_v36, %v4055_v8  ;;  %vm4026_vm0 = vcmp.ge.f32.partialorder %v3994_v5, 0.0  ;;  %v11748_v3 = vpop.f32.mrb[27].mxu0  ;;  %v11750_v10 = vpop.f32.mrb[27].mxu1 }
 0x33c   : > { %v6574_v52 = vsel %vm6510_vm15, %v6478_v39, %v6542_v46  ;;  %v4119_v48 = vmul.f32 1.4142135, %v4087_v34  ;;  %v4058_v13 = vmul.f32 0.2, %v3994_v5  ;;  %v6483_v47 = vadd.f32 %v8968_v33, %v11596_v9 }
 0x33d   : > { %v6606_v26 = vmul.f32 1.4142135, %v6574_v52  ;;  %7470 = vst.msk [vmem:[%s11605_s16 + $0x138] sm:$0xff] %vm4133_vm9, %v6607_v7  ;;  %vm6513_vm1 = vcmp.ge.f32.partialorder %v6481_v23, 0.0  ;;  %v6545_v62 = vmul.f32 0.2, %v6481_v23  ;;  %v3995_v0 = vadd.f32 %v11596_v9, %v11715_v19 }
 0x33e   : > { %vm4025_vm2 = vcmp.ge.f32.partialorder %v3993_v55, 0.0  ;;  %v4057_v61 = vmul.f32 0.2, %v3993_v55  ;;  %4152 = vst.msk [vmem:[%s11605_s16 + $0x120] sm:$0xff] %vm4133_vm9, %v4119_v48  ;;  %v4090_v57 = vsel %vm4026_vm0, %v3994_v5, %v4058_v13  ;;  %vm6512_vm3 = vcmp.ge.f32.partialorder %v6480_v37, 0.0  ;;  %v11759_v42 = vpop.f32.mrb[28].mxu0 }
 0x33f   : > { %7469 = vst.msk [vmem:[%s11605_s16 + $0x130] sm:$0xff] %vm4133_vm9, %v6606_v26  ;;  %v6544_v38 = vmul.f32 0.2, %v6480_v37  ;;  %vm4028_vm4 = vcmp.ge.f32.partialorder %v3996_v27, 0.0  ;;  %v11761_v44 = vpop.f32.mrb[28].mxu1  ;;  %v6577_v50 = vsel %vm6513_vm1, %v6481_v23, %v6545_v62  ;;  %v11763_v54 = vpop.f32.mrb[29].mxu0  ;;  %v6482_v33 = vadd.f32 %v11596_v9, %v11717_v45 }
 0x340   : > { %v4122_v58 = vmul.f32 1.4142135, %v4090_v57  ;;  %v4089_v53 = vsel %vm4025_vm2, %v3993_v55, %v4057_v61  ;;  %v4060_v16 = vmul.f32 0.2, %v3996_v27  ;;  %v11765_v28 = vpop.f32.mrb[29].mxu1  ;;  %vm6515_vm5 = vcmp.ge.f32.partialorder %v6483_v47, 0.0 }
 0x341   : > { %v6609_v21 = vmul.f32 1.4142135, %v6577_v50  ;;  %v4121_v17 = vmul.f32 1.4142135, %v4089_v53  ;;  %v6576_v32 = vsel %vm6512_vm3, %v6480_v37, %v6544_v38  ;;  %v6547_v30 = vmul.f32 0.2, %v6483_v47 }
 0x342   : > { %4155 = vst.msk [vmem:[%s11605_s16 + $0x148] sm:$0xff] %vm4133_vm9, %v4122_v58  ;;  %v6608_v51 = vmul.f32 1.4142135, %v6576_v32  ;;  %v4092_v2 = vsel %vm4028_vm4, %v3996_v27, %v4060_v16  ;;  %v3998_v6 = vadd.f32 %v11720_v43, %v11596_v9  ;;  %v6485_v11 = vadd.f32 %v11722_v12, %v11596_v9  ;;  %v11781_v25 = vpop.f32.mrb[30].mxu0  ;;  %v11783_v63 = vpop.f32.mrb[30].mxu1 }
 0x343   : > { %7472 = vst.msk [vmem:[%s11605_s16 + $0x158] sm:$0xff] %vm4133_vm9, %v6609_v21  ;;  %4154 = vst.msk [vmem:[%s11605_s16 + $0x140] sm:$0xff] %vm4133_vm9, %v4121_v17  ;;  %v4124_v60 = vmul.f32 1.4142135, %v4092_v2  ;;  %v6579_v35 = vsel %vm6515_vm5, %v6483_v47, %v6547_v30  ;;  %vm4027_vm6 = vcmp.ge.f32.partialorder %v3995_v0, 0.0  ;;  %v3997_v14 = vadd.f32 %v11596_v9, %v11725_v40  ;;  %v11789_v36 = vpop.f32.mrb[31].mxu0 }
 0x344   : > { %7471 = vst.msk [vmem:[%s11605_s16 + $0x150] sm:$0xff] %vm4133_vm9, %v6608_v51  ;;  %v4059_v24 = vmul.f32 0.2, %v3995_v0  ;;  %v11791_v19 = vpop.f32.mrb[31].mxu1  ;;  %vm6514_vm7 = vcmp.ge.f32.partialorder %v6482_v33, 0.0  ;;  %vm4030_vm8 = vcmp.ge.f32.partialorder %v3998_v6, 0.0  ;;  %v6484_v20 = vadd.f32 %v11596_v9, %v11735_v59 }
 0x345   : > { %4157 = vst.msk [vmem:[%s11605_s16 + $0x168] sm:$0xff] %vm4133_vm9, %v4124_v60  ;;  %v6611_v45 = vmul.f32 1.4142135, %v6579_v35  ;;  %v6546_v22 = vmul.f32 0.2, %v6482_v33  ;;  %vm6517_vm10 = vcmp.ge.f32.partialorder %v6485_v11, 0.0  ;;  %v4000_v5 = vadd.f32 %v11742_v49, %v11596_v9 }
 0x346   : > { %v4091_v1 = vsel %vm4027_vm6, %v3995_v0, %v4059_v24  ;;  %v4062_v15 = vmul.f32 0.2, %v3998_v6  ;;  %v6549_v39 = vmul.f32 0.2, %v6485_v11  ;;  %vm4029_vm11 = vcmp.ge.f32.partialorder %v3997_v14, 0.0 }
 0x347   : > { %7474 = vst.msk [vmem:[%s11605_s16 + $0x178] sm:$0xff] %vm4133_vm9, %v6611_v45  ;;  %v4123_v43 = vmul.f32 1.4142135, %v4091_v1  ;;  %v6578_v12 = vsel %vm6514_vm7, %v6482_v33, %v6546_v22  ;;  %v4061_v41 = vmul.f32 0.2, %v3997_v14  ;;  %vm6516_vm12 = vcmp.ge.f32.partialorder %v6484_v20, 0.0 }
 0x348   : > { %v6610_v29 = vmul.f32 1.4142135, %v6578_v12  ;;  %v4094_v56 = vsel %vm4030_vm8, %v3998_v6, %v4062_v15  ;;  %v6581_v40 = vsel %vm6517_vm10, %v6485_v11, %v6549_v39  ;;  %v6548_v31 = vmul.f32 0.2, %v6484_v20 }
 0x349   : > { %4156 = vst.msk [vmem:[%s11605_s16 + $0x160] sm:$0xff] %vm4133_vm9, %v4123_v43  ;;  %v4126_v18 = vmul.f32 1.4142135, %v4094_v56  ;;  %v6613_v8 = vmul.f32 1.4142135, %v6581_v40  ;;  %v4093_v46 = vsel %vm4029_vm11, %v3997_v14, %v4061_v41  ;;  %v6487_v55 = vadd.f32 %v11744_v4, %v11596_v9 }
 0x34a   : > { %7473 = vst.msk [vmem:[%s11605_s16 + $0x170] sm:$0xff] %vm4133_vm9, %v6610_v29  ;;  %v4125_v23 = vmul.f32 1.4142135, %v4093_v46  ;;  %vm4032_vm13 = vcmp.ge.f32.partialorder %v4000_v5, 0.0  ;;  %v4064_v59 = vmul.f32 0.2, %v4000_v5  ;;  %v3999_v37 = vadd.f32 %v11596_v9, %v11748_v3 }
 0x34b   : > { %4159 = vst.msk [vmem:[%s11605_s16 + $0x188] sm:$0xff] %vm4133_vm9, %v4126_v18  ;;  %7476 = vst.msk [vmem:[%s11605_s16 + $0x198] sm:$0xff] %vm4133_vm9, %v6613_v8  ;;  %v6486_v27 = vadd.f32 %v11596_v9, %v11750_v10  ;;  %v6580_v49 = vsel %vm6516_vm12, %v6484_v20, %v6548_v31  ;;  %vm6519_vm14 = vcmp.ge.f32.partialorder %v6487_v55, 0.0  ;;  %v6551_v7 = vmul.f32 0.2, %v6487_v55 }
 0x34c   : > { %4158 = vst.msk [vmem:[%s11605_s16 + $0x180] sm:$0xff] %vm4133_vm9, %v4125_v23  ;;  %v4002_v4 = vadd.f32 %v11759_v42, %v11596_v9  ;;  %v6612_v34 = vmul.f32 1.4142135, %v6580_v49  ;;  %v4096_v52 = vsel %vm4032_vm13, %v4000_v5, %v4064_v59  ;;  %vm4031_vm15 = vcmp.ge.f32.partialorder %v3999_v37, 0.0 }
 0x34d   : > { %v4063_v48 = vmul.f32 0.2, %v3999_v37  ;;  %v4128_v26 = vmul.f32 1.4142135, %v4096_v52  ;;  %v6583_v13 = vsel %vm6519_vm14, %v6487_v55, %v6551_v7  ;;  %vm6518_vm0 = vcmp.ge.f32.partialorder %v6486_v27, 0.0 }
 0x34e   : > { %v6550_v3 = vmul.f32 0.2, %v6486_v27  ;;  %7475 = vst.msk [vmem:[%s11605_s16 + $0x190] sm:$0xff] %vm4133_vm9, %v6612_v34  ;;  %v6615_v10 = vmul.f32 1.4142135, %v6583_v13  ;;  %vm4034_vm1 = vcmp.ge.f32.partialorder %v4002_v4, 0.0  ;;  %v6489_v38 = vadd.f32 %v11761_v44, %v11596_v9 }
 0x34f   : > { %v4095_v47 = vsel %vm4031_vm15, %v3999_v37, %v4063_v48  ;;  %v4066_v62 = vmul.f32 0.2, %v4002_v4  ;;  %4161 = vst.msk [vmem:[%s11605_s16 + $0x1a8] sm:$0xff] %vm4133_vm9, %v4128_v26  ;;  %v4001_v42 = vadd.f32 %v11596_v9, %v11763_v54  ;;  %v6488_v53 = vadd.f32 %v11596_v9, %v11765_v28 }
 0x350   : > { %v4127_v61 = vmul.f32 1.4142135, %v4095_v47  ;;  %v6582_v57 = vsel %vm6518_vm0, %v6486_v27, %v6550_v3  ;;  %7478 = vst.msk [vmem:[%s11605_s16 + $0x1b8] sm:$0xff] %vm4133_vm9, %v6615_v10  ;;  %v4004_v16 = vadd.f32 %v11781_v25, %v11596_v9  ;;  %vm6521_vm2 = vcmp.ge.f32.partialorder %v6489_v38, 0.0 }
 0x351   : > { %v6614_v58 = vmul.f32 1.4142135, %v6582_v57  ;;  %v4098_v50 = vsel %vm4034_vm1, %v4002_v4, %v4066_v62  ;;  %v6553_v17 = vmul.f32 0.2, %v6489_v38  ;;  %vm4033_vm3 = vcmp.ge.f32.partialorder %v4001_v42, 0.0 }
 0x352   : > { %4160 = vst.msk [vmem:[%s11605_s16 + $0x1a0] sm:$0xff] %vm4133_vm9, %v4127_v61  ;;  %v4130_v21 = vmul.f32 1.4142135, %v4098_v50  ;;  %v4065_v44 = vmul.f32 0.2, %v4001_v42  ;;  %vm6520_vm4 = vcmp.ge.f32.partialorder %v6488_v53, 0.0  ;;  %v6491_v51 = vadd.f32 %v11783_v63, %v11596_v9 }
 0x353   : > { %7477 = vst.msk [vmem:[%s11605_s16 + $0x1b0] sm:$0xff] %vm4133_vm9, %v6614_v58  ;;  %v6552_v54 = vmul.f32 0.2, %v6488_v53  ;;  %vm4036_vm5 = vcmp.ge.f32.partialorder %v4004_v16, 0.0  ;;  %v6585_v32 = vsel %vm6521_vm2, %v6489_v38, %v6553_v17  ;;  %v4068_v28 = vmul.f32 0.2, %v4004_v16 }
 0x354   : > { %4163 = vst.msk [vmem:[%s11605_s16 + $0x1c8] sm:$0xff] %vm4133_vm9, %v4130_v21  ;;  %v4003_v2 = vadd.f32 %v11596_v9, %v11789_v36  ;;  %v6617_v30 = vmul.f32 1.4142135, %v6585_v32  ;;  %v4097_v0 = vsel %vm4033_vm3, %v4001_v42, %v4065_v44  ;;  %v6490_v33 = vadd.f32 %v11596_v9, %v11791_v19 }
 0x355   : > { %v6584_v60 = vsel %vm6520_vm4, %v6488_v53, %v6552_v54  ;;  %v4129_v6 = vmul.f32 1.4142135, %v4097_v0  ;;  %v4100_v25 = vsel %vm4036_vm5, %v4004_v16, %v4068_v28  ;;  %vm6523_vm6 = vcmp.ge.f32.partialorder %v6491_v51, 0.0 }
 0x356   : > { %v6616_v11 = vmul.f32 1.4142135, %v6584_v60  ;;  %7480 = vst.msk [vmem:[%s11605_s16 + $0x1d8] sm:$0xff] %vm4133_vm9, %v6617_v30  ;;  %v4132_v35 = vmul.f32 1.4142135, %v4100_v25  ;;  %vm4035_vm7 = vcmp.ge.f32.partialorder %v4003_v2, 0.0 }
 0x357   : > { %v6555_v63 = vmul.f32 0.2, %v6491_v51  ;;  %vm6522_vm8 = vcmp.ge.f32.partialorder %v6490_v33, 0.0  ;;  %4162 = vst.msk [vmem:[%s11605_s16 + $0x1c0] sm:$0xff] %vm4133_vm9, %v4129_v6  ;;  %v4067_v24 = vmul.f32 0.2, %v4003_v2 }
 0x358   : > { %7479 = vst.msk [vmem:[%s11605_s16 + $0x1d0] sm:$0xff] %vm4133_vm9, %v6616_v11  ;;  %v6554_v14 = vmul.f32 0.2, %v6490_v33  ;;  %4165 = vst.msk [vmem:[%s11605_s16 + $0x1e8] sm:$0xff] %vm4133_vm9, %v4132_v35 }
 0x359   : > { %v6587_v9 = vsel %vm6523_vm6, %v6491_v51, %v6555_v63  ;;  %v4099_v19 = vsel %vm4035_vm7, %v4003_v2, %v4067_v24 }
 0x35a   : > { %v6619_v36 = vmul.f32 1.4142135, %v6587_v9  ;;  %v6586_v45 = vsel %vm6522_vm8, %v6490_v33, %v6554_v14  ;;  %v4131_v22 = vmul.f32 1.4142135, %v4099_v19 }
 0x35b   : > { %v6618_v1 = vmul.f32 1.4142135, %v6586_v45 }
 0x35c   : > { %7482 = vst.msk [vmem:[%s11605_s16 + $0x1f8] sm:$0xff] %vm4133_vm9, %v6619_v36  ;;  %4164 = vst.msk [vmem:[%s11605_s16 + $0x1e0] sm:$0xff] %vm4133_vm9, %v4131_v22 }
 0x35d   : > { %7481 = vst.msk [vmem:[%s11605_s16 + $0x1f0] sm:$0xff] %vm4133_vm9, %v6618_v1 }
 0x35e PF: > { %s13_s14 = sadd.s32 1, %s9540_s14   ;;  %s11989_s12 = smov %s9536_s13 }
 0x35f   : > { %p10_p6 = scmp.ge.s32.totalorder %s13_s14, 4   ;;  %s11990_s13 = smov %s11992_s15 }
 0x361   :  { %12 = sbr.rel (!%p10_p6) target bundleno = 2 (0x2), region = 88 }

</bundles_post_ra>
